<compile_context>
chip_gen: v5e
topology: v5e:2x2
jax: 0.10.0
libtpu: 0.0.40
codegen_flags: <defaults>
</compile_context>

<pallas_src>
import jax
import jax.numpy as jnp
from jax.experimental import pallas as pl
from jax.experimental.pallas import tpu as pltpu


NUM_CLASSES = 100
LAYER_DIMS = [600, 1024, 512, 256, 128, NUM_CLASSES]


def _round_up(x, m):
    return (x + m - 1) // m * m


D_IN_PAD = _round_up(LAYER_DIMS[0], 128)      # 600 -> 640
OUT_PAD = _round_up(NUM_CLASSES, 128)         # 100 -> 128


def purchase_mlp_kernel(
    x_ref,
    w1_ref, b1_ref,
    w2_ref, b2_ref,
    w3_ref, b3_ref,
    w4_ref, b4_ref,
    w5_ref, b5_ref,
    out_ref,
):
    """Fused 5-layer MLP on one batch tile.

    x_ref:  (bt, 640) bf16      weights: (in, out) bf16      biases: (1, out) f32
    out_ref: (bt, 128) f32 (padded classifier head)
    """
    h = x_ref[...]  # bf16

    # features: 4 x (Linear + Tanh).  Matmul in bf16 -> f32 acc, tanh in f32.
    for w_ref, b_ref in (
        (w1_ref, b1_ref),
        (w2_ref, b2_ref),
        (w3_ref, b3_ref),
        (w4_ref, b4_ref),
    ):
        z = jnp.dot(h, w_ref[...], preferred_element_type=jnp.float32) + b_ref[...]
        h = jnp.tanh(z).astype(jnp.bfloat16)

    # classifier: Linear (no activation), padded to 128 output lanes.
    out = jnp.dot(h, w5_ref[...], preferred_element_type=jnp.float32) + b5_ref[...]
    out_ref[...] = out.astype(out_ref.dtype)


def purchase_classifier_forward(x, params, *, batch_tile=256):
    """Forward pass.

    x:      (B, 600) float32
    params: list of 5 (W, b) pairs with W shaped (in, out) (already transposed
            relative to PyTorch's Linear.weight) and b shaped (out,).
    Returns (B, NUM_CLASSES) float32.
    """
    B, d_in = x.shape
    assert d_in == LAYER_DIMS[0], (d_in, LAYER_DIMS[0])
    assert len(params) == len(LAYER_DIMS) - 1

    # --- prepare (pad + cast) parameters -------------------------------------
    flat_params = []
    weight_specs = []
    n_layers = len(params)
    for li, (w, b) in enumerate(params):
        w = jnp.asarray(w, jnp.float32)
        b = jnp.asarray(b, jnp.float32).reshape(1, -1)
        if li == 0:
            # pad contraction dim 600 -> 640 with zero rows
            w = jnp.pad(w, ((0, D_IN_PAD - w.shape[0]), (0, 0)))
        if li == n_layers - 1:
            # pad classifier head 100 -> 128 with zero columns
            w = jnp.pad(w, ((0, 0), (0, OUT_PAD - w.shape[1])))
            b = jnp.pad(b, ((0, 0), (0, OUT_PAD - b.shape[1])))
        w_bf16 = w.astype(jnp.bfloat16)   # halves the weight DMA, 2x MXU rate
        flat_params += [w_bf16, b]
        # Full-array blocks, constant block index -> weights are fetched once
        # and stay resident across the whole batch grid.
        weight_specs.append(pl.BlockSpec(w_bf16.shape, lambda i: (0, 0)))
        weight_specs.append(pl.BlockSpec(b.shape, lambda i: (0, 0)))

    # --- batch tiling ---------------------------------------------------------
    # Keep the tile a multiple of 8 (f32 sublane); small batches run in a
    # single grid step with the whole (padded) batch in one tile.
    bt = min(batch_tile, _round_up(B, 8))
    bt = _round_up(bt, 8)
    B_pad = _round_up(B, bt)

    x_pad = jnp.pad(
        jnp.asarray(x, jnp.float32),
        ((0, B_pad - B), (0, D_IN_PAD - d_in)),
    ).astype(jnp.bfloat16)

    grid = (B_pad // bt,)
    out_shape = jax.ShapeDtypeStruct((B_pad, OUT_PAD), jnp.float32)

    out = pl.pallas_call(
        purchase_mlp_kernel,
        out_shape=out_shape,
        grid_spec=pltpu.PrefetchScalarGridSpec(
            num_scalar_prefetch=0,
            grid=grid,
            in_specs=[pl.BlockSpec((bt, D_IN_PAD), lambda i: (i, 0))] + weight_specs,
            out_specs=pl.BlockSpec((bt, OUT_PAD), lambda i: (i, 0)),
        ),
        compiler_params=pltpu.CompilerParams(
            # batch axis is embarrassingly parallel -> shards across v7x's 2 TCs
            dimension_semantics=("parallel",),
            # explicit headroom so large batch tiles don't hit the default
            # scoped-VMEM limit (safe on v5e/v6e/v7x).
            vmem_limit_bytes=48 * 1024 * 1024,
        ),
    )(x_pad, *flat_params)

    # drop batch padding rows and the zero-padded class columns
    return out[:B, :NUM_CLASSES]


def init_params(key):
    """PyTorch-Linear-like init (U[-1/sqrt(in), 1/sqrt(in)]).
    Weights are returned already transposed to (in, out); biases as (out,)."""
    params = []
    for idx in range(len(LAYER_DIMS) - 1):
        d_in, d_out = LAYER_DIMS[idx], LAYER_DIMS[idx + 1]
        key, kw, kb = jax.random.split(key, 3)
        bound = 1.0 / jnp.sqrt(jnp.float32(d_in))
        w = jax.random.uniform(
            kw, (d_in, d_out), dtype=jnp.float32, minval=-bound, maxval=bound
        )
        b = jax.random.uniform(
            kb, (d_out,), dtype=jnp.float32, minval=-bound, maxval=bound
        )
        params.append((w, b))
    return params


def reference_forward_f32(x, params):
    """Plain-JAX f32 reference of the same forward pass."""
    h = x
    for w, b in params[:-1]:
        h = jnp.tanh(h @ w + b.reshape(1, -1))
    w, b = params[-1]
    return h @ w + b.reshape(1, -1)


def reference_forward_bf16(x, params):
    """Plain-JAX reference using the same bf16-weight / f32-accumulate numerics
    as the kernel (for tight correctness checking)."""
    h = jnp.asarray(x, jnp.float32).astype(jnp.bfloat16)
    for w, b in params[:-1]:
        z = jnp.dot(h, w.astype(jnp.bfloat16), preferred_element_type=jnp.float32)
        z = z + b.reshape(1, -1)
        h = jnp.tanh(z).astype(jnp.bfloat16)
    w, b = params[-1]
    z = jnp.dot(h, w.astype(jnp.bfloat16), preferred_element_type=jnp.float32)
    return z + b.reshape(1, -1)


if __name__ == "__main__":
    key = jax.random.PRNGKey(0)
    key, kx1, kx2 = jax.random.split(key, 3)
    params = init_params(key)

    # --- small batch: single grid step, whole batch in one tile --------------
    B = 8
    x = jax.random.normal(kx1, (B, LAYER_DIMS[0]), dtype=jnp.float32)
    out = purchase_classifier_forward(x, params)
    out = jax.block_until_ready(out)
    assert out.shape == (B, NUM_CLASSES), out.shape

    ref_bf16 = reference_forward_bf16(x, params)
    ref_f32 = reference_forward_f32(x, params)
    err = float(jnp.max(jnp.abs(out - ref_bf16)))
    assert jnp.allclose(out, ref_bf16, atol=1e-2, rtol=1e-2), err
    # sanity vs. the pure-f32 math (loose: bf16 weights/activations)
    assert jnp.allclose(out, ref_f32, atol=1.5e-1, rtol=1.5e-1), (
        float(jnp.max(jnp.abs(out - ref_f32)))
    )

    # --- ragged batch: exercises batch padding + multi-step grid -------------
    B2 = 20
    x2 = jax.random.normal(kx2, (B2, LAYER_DIMS[0]), dtype=jnp.float32)
    out2 = jax.block_until_ready(
        purchase_classifier_forward(x2, params, batch_tile=8)
    )
    assert out2.shape == (B2, NUM_CLASSES), out2.shape
    ref2 = reference_forward_bf16(x2, params)
    assert jnp.allclose(out2, ref2, atol=1e-2, rtol=1e-2), (
        float(jnp.max(jnp.abs(out2 - ref2)))
    )

    print("KERNEL_OK")
</pallas_src>

<mosaic_0001>
module attributes {stable_mosaic.version = 11 : i64} {
  func.func @purchase_mlp_kernel(%arg0: i32, %arg1: memref<8x640xbf16, #tpu.memory_space<vmem>>, %arg2: memref<640x1024xbf16, #tpu.memory_space<vmem>>, %arg3: memref<1x1024xf32, #tpu.memory_space<vmem>>, %arg4: memref<1024x512xbf16, #tpu.memory_space<vmem>>, %arg5: memref<1x512xf32, #tpu.memory_space<vmem>>, %arg6: memref<512x256xbf16, #tpu.memory_space<vmem>>, %arg7: memref<1x256xf32, #tpu.memory_space<vmem>>, %arg8: memref<256x128xbf16, #tpu.memory_space<vmem>>, %arg9: memref<1x128xf32, #tpu.memory_space<vmem>>, %arg10: memref<128x128xbf16, #tpu.memory_space<vmem>>, %arg11: memref<1x128xf32, #tpu.memory_space<vmem>>, %arg12: memref<8x128xf32, #tpu.memory_space<vmem>>) attributes {dimension_semantics = [#tpu.dimension_semantics<parallel>], iteration_bounds = array<i64: 1>, scalar_prefetch = 0 : i64, scratch_operands = 0 : i64, tpu.core_type = #tpu.core_type<tc>, window_params = [{transform_indices = @transform_0, window_bounds = array<i64: 8, 640>}, {pipeline_mode = #tpu.pipeline_mode<synchronous>, transform_indices = @transform_1, window_bounds = array<i64: 640, 1024>}, {pipeline_mode = #tpu.pipeline_mode<synchronous>, transform_indices = @transform_2, window_bounds = array<i64: 1, 1024>}, {pipeline_mode = #tpu.pipeline_mode<synchronous>, transform_indices = @transform_3, window_bounds = array<i64: 1024, 512>}, {pipeline_mode = #tpu.pipeline_mode<synchronous>, transform_indices = @transform_4, window_bounds = array<i64: 1, 512>}, {pipeline_mode = #tpu.pipeline_mode<synchronous>, transform_indices = @transform_5, window_bounds = array<i64: 512, 256>}, {pipeline_mode = #tpu.pipeline_mode<synchronous>, transform_indices = @transform_6, window_bounds = array<i64: 1, 256>}, {pipeline_mode = #tpu.pipeline_mode<synchronous>, transform_indices = @transform_7, window_bounds = array<i64: 256, 128>}, {pipeline_mode = #tpu.pipeline_mode<synchronous>, transform_indices = @transform_8, window_bounds = array<i64: 1, 128>}, {pipeline_mode = #tpu.pipeline_mode<synchronous>, transform_indices = @transform_9, window_bounds = array<i64: 128, 128>}, {pipeline_mode = #tpu.pipeline_mode<synchronous>, transform_indices = @transform_10, window_bounds = array<i64: 1, 128>}, {transform_indices = @transform_11, window_bounds = array<i64: 8, 128>}]} {
    %c0 = arith.constant 0 : index
    %c0_0 = arith.constant 0 : index
    %0 = vector.load %arg1[%c0, %c0_0] : memref<8x640xbf16, #tpu.memory_space<vmem>>, vector<8x640xbf16>
    %c0_1 = arith.constant 0 : index
    %c0_2 = arith.constant 0 : index
    %1 = vector.load %arg2[%c0_1, %c0_2] : memref<640x1024xbf16, #tpu.memory_space<vmem>>, vector<640x1024xbf16>
    %cst = arith.constant dense<0.000000e+00> : vector<8x1024xf32>
    %2 = tpu.matmul %0, %1, %cst {dimension_numbers = #tpu.dot_dimension_numbers<[1], [0], [0], [1], [0, 0, 1, 1], [], []>} : vector<8x640xbf16>, vector<640x1024xbf16>, vector<8x1024xf32> -> vector<8x1024xf32>
    %c0_3 = arith.constant 0 : index
    %c0_4 = arith.constant 0 : index
    %3 = vector.load %arg3[%c0_3, %c0_4] : memref<1x1024xf32, #tpu.memory_space<vmem>>, vector<1x1024xf32>
    %4 = vector.broadcast %3 : vector<1x1024xf32> to vector<8x1024xf32>
    %5 = arith.addf %2, %4 : vector<8x1024xf32>
    %6 = math.tanh %5 : vector<8x1024xf32>
    %7 = arith.truncf %6 : vector<8x1024xf32> to vector<8x1024xbf16>
    %c0_5 = arith.constant 0 : index
    %c0_6 = arith.constant 0 : index
    %8 = vector.load %arg4[%c0_5, %c0_6] : memref<1024x512xbf16, #tpu.memory_space<vmem>>, vector<1024x512xbf16>
    %cst_7 = arith.constant dense<0.000000e+00> : vector<8x512xf32>
    %9 = tpu.matmul %7, %8, %cst_7 {dimension_numbers = #tpu.dot_dimension_numbers<[1], [0], [0], [1], [0, 0, 1, 1], [], []>} : vector<8x1024xbf16>, vector<1024x512xbf16>, vector<8x512xf32> -> vector<8x512xf32>
    %c0_8 = arith.constant 0 : index
    %c0_9 = arith.constant 0 : index
    %10 = vector.load %arg5[%c0_8, %c0_9] : memref<1x512xf32, #tpu.memory_space<vmem>>, vector<1x512xf32>
    %11 = vector.broadcast %10 : vector<1x512xf32> to vector<8x512xf32>
    %12 = arith.addf %9, %11 : vector<8x512xf32>
    %13 = math.tanh %12 : vector<8x512xf32>
    %14 = arith.truncf %13 : vector<8x512xf32> to vector<8x512xbf16>
    %c0_10 = arith.constant 0 : index
    %c0_11 = arith.constant 0 : index
    %15 = vector.load %arg6[%c0_10, %c0_11] : memref<512x256xbf16, #tpu.memory_space<vmem>>, vector<512x256xbf16>
    %cst_12 = arith.constant dense<0.000000e+00> : vector<8x256xf32>
    %16 = tpu.matmul %14, %15, %cst_12 {dimension_numbers = #tpu.dot_dimension_numbers<[1], [0], [0], [1], [0, 0, 1, 1], [], []>} : vector<8x512xbf16>, vector<512x256xbf16>, vector<8x256xf32> -> vector<8x256xf32>
    %c0_13 = arith.constant 0 : index
    %c0_14 = arith.constant 0 : index
    %17 = vector.load %arg7[%c0_13, %c0_14] : memref<1x256xf32, #tpu.memory_space<vmem>>, vector<1x256xf32>
    %18 = vector.broadcast %17 : vector<1x256xf32> to vector<8x256xf32>
    %19 = arith.addf %16, %18 : vector<8x256xf32>
    %20 = math.tanh %19 : vector<8x256xf32>
    %21 = arith.truncf %20 : vector<8x256xf32> to vector<8x256xbf16>
    %c0_15 = arith.constant 0 : index
    %c0_16 = arith.constant 0 : index
    %22 = vector.load %arg8[%c0_15, %c0_16] : memref<256x128xbf16, #tpu.memory_space<vmem>>, vector<256x128xbf16>
    %cst_17 = arith.constant dense<0.000000e+00> : vector<8x128xf32>
    %23 = tpu.matmul %21, %22, %cst_17 {dimension_numbers = #tpu.dot_dimension_numbers<[1], [0], [0], [1], [0, 0, 1, 1], [], []>} : vector<8x256xbf16>, vector<256x128xbf16>, vector<8x128xf32> -> vector<8x128xf32>
    %c0_18 = arith.constant 0 : index
    %c0_19 = arith.constant 0 : index
    %24 = vector.load %arg9[%c0_18, %c0_19] : memref<1x128xf32, #tpu.memory_space<vmem>>, vector<1x128xf32>
    %25 = vector.broadcast %24 : vector<1x128xf32> to vector<8x128xf32>
    %26 = arith.addf %23, %25 : vector<8x128xf32>
    %27 = math.tanh %26 : vector<8x128xf32>
    %28 = arith.truncf %27 : vector<8x128xf32> to vector<8x128xbf16>
    %c0_20 = arith.constant 0 : index
    %c0_21 = arith.constant 0 : index
    %29 = vector.load %arg10[%c0_20, %c0_21] : memref<128x128xbf16, #tpu.memory_space<vmem>>, vector<128x128xbf16>
    %cst_22 = arith.constant dense<0.000000e+00> : vector<8x128xf32>
    %30 = tpu.matmul %28, %29, %cst_22 {dimension_numbers = #tpu.dot_dimension_numbers<[1], [0], [0], [1], [0, 0, 1, 1], [], []>} : vector<8x128xbf16>, vector<128x128xbf16>, vector<8x128xf32> -> vector<8x128xf32>
    %c0_23 = arith.constant 0 : index
    %c0_24 = arith.constant 0 : index
    %31 = vector.load %arg11[%c0_23, %c0_24] : memref<1x128xf32, #tpu.memory_space<vmem>>, vector<1x128xf32>
    %32 = vector.broadcast %31 : vector<1x128xf32> to vector<8x128xf32>
    %33 = arith.addf %30, %32 : vector<8x128xf32>
    %c0_25 = arith.constant 0 : index
    %c0_26 = arith.constant 0 : index
    %34 = vector.load %arg12[%c0_25, %c0_26] : memref<8x128xf32, #tpu.memory_space<vmem>>, vector<8x128xf32>
    tpu.vector_store %arg12[%c0_25, %c0_26], %33 {strides = array<i32>} : memref<8x128xf32, #tpu.memory_space<vmem>>, vector<8x128xf32>,
    return
  }
  func.func @transform_0(%arg0: i32) -> (i32, i32) {
    %c0_i32 = arith.constant 0 : i32
    %c0_i32_0 = arith.constant 0 : i32
    return %arg0, %c0_i32 : i32, i32
  }
  func.func @transform_1(%arg0: i32) -> (i32, i32) {
    %c0_i32 = arith.constant 0 : i32
    %c0_i32_0 = arith.constant 0 : i32
    %c0_i32_1 = arith.constant 0 : i32
    return %c0_i32, %c0_i32_0 : i32, i32
  }
  func.func @transform_2(%arg0: i32) -> (i32, i32) {
    %c0_i32 = arith.constant 0 : i32
    %c0_i32_0 = arith.constant 0 : i32
    %c0_i32_1 = arith.constant 0 : i32
    return %c0_i32, %c0_i32_0 : i32, i32
  }
  func.func @transform_3(%arg0: i32) -> (i32, i32) {
    %c0_i32 = arith.constant 0 : i32
    %c0_i32_0 = arith.constant 0 : i32
    %c0_i32_1 = arith.constant 0 : i32
    return %c0_i32, %c0_i32_0 : i32, i32
  }
  func.func @transform_4(%arg0: i32) -> (i32, i32) {
    %c0_i32 = arith.constant 0 : i32
    %c0_i32_0 = arith.constant 0 : i32
    %c0_i32_1 = arith.constant 0 : i32
    return %c0_i32, %c0_i32_0 : i32, i32
  }
  func.func @transform_5(%arg0: i32) -> (i32, i32) {
    %c0_i32 = arith.constant 0 : i32
    %c0_i32_0 = arith.constant 0 : i32
    %c0_i32_1 = arith.constant 0 : i32
    return %c0_i32, %c0_i32_0 : i32, i32
  }
  func.func @transform_6(%arg0: i32) -> (i32, i32) {
    %c0_i32 = arith.constant 0 : i32
    %c0_i32_0 = arith.constant 0 : i32
    %c0_i32_1 = arith.constant 0 : i32
    return %c0_i32, %c0_i32_0 : i32, i32
  }
  func.func @transform_7(%arg0: i32) -> (i32, i32) {
    %c0_i32 = arith.constant 0 : i32
    %c0_i32_0 = arith.constant 0 : i32
    %c0_i32_1 = arith.constant 0 : i32
    return %c0_i32, %c0_i32_0 : i32, i32
  }
  func.func @transform_8(%arg0: i32) -> (i32, i32) {
    %c0_i32 = arith.constant 0 : i32
    %c0_i32_0 = arith.constant 0 : i32
    %c0_i32_1 = arith.constant 0 : i32
    return %c0_i32, %c0_i32_0 : i32, i32
  }
  func.func @transform_9(%arg0: i32) -> (i32, i32) {
    %c0_i32 = arith.constant 0 : i32
    %c0_i32_0 = arith.constant 0 : i32
    %c0_i32_1 = arith.constant 0 : i32
    return %c0_i32, %c0_i32_0 : i32, i32
  }
  func.func @transform_10(%arg0: i32) -> (i32, i32) {
    %c0_i32 = arith.constant 0 : i32
    %c0_i32_0 = arith.constant 0 : i32
    %c0_i32_1 = arith.constant 0 : i32
    return %c0_i32, %c0_i32_0 : i32, i32
  }
  func.func @transform_11(%arg0: i32) -> (i32, i32) {
    %c0_i32 = arith.constant 0 : i32
    %c0_i32_0 = arith.constant 0 : i32
    return %arg0, %c0_i32 : i32, i32
  }
}

</mosaic_0001>

<bundles_post_ra>
// kernel: tpu_custom_call.1
= control target key start
LH: loop header
LB: loop body
LE: loop exit
PB: predicated region body
PF: predicated region fallthrough
CT: control target
= control target key end

     0   :  { %16 = vsyncpa [#allocation3], 0  ;;  %s9449_s0 = inlined_call_operand.hbm [shape: bf16[8,640], index: 0, kind: input, shape index: {}]   ;;  %s9450_s1 = inlined_call_operand.hbm [shape: bf16[640,1024], index: 1, kind: input, shape index: {}]   ;;  %s9451_s2 = inlined_call_operand.hbm [shape: f32[1,1024], index: 2, kind: input, shape index: {}]   ;;  %s9452_s3 = inlined_call_operand.hbm [shape: bf16[1024,512], index: 3, kind: input, shape index: {}]   ;;  %s9453_s4 = inlined_call_operand.hbm [shape: f32[1,512], index: 4, kind: input, shape index: {}]   ;;  %s9454_s5 = inlined_call_operand.hbm [shape: bf16[512,256], index: 5, kind: input, shape index: {}]   ;;  %s9455_s6 = inlined_call_operand.hbm [shape: f32[1,256], index: 6, kind: input, shape index: {}]   ;;  %s9456_s7 = inlined_call_operand.hbm [shape: bf16[256,128], index: 7, kind: input, shape index: {}]   ;;  %s9457_s8 = inlined_call_operand.hbm [shape: f32[1,128], index: 8, kind: input, shape index: {}]   ;;  %s9458_s9 = inlined_call_operand.hbm [shape: bf16[128,128], index: 9, kind: input, shape index: {}]   ;;  %s9459_s10 = inlined_call_operand.hbm [shape: f32[1,128], index: 10, kind: input, shape index: {}]   ;;  %s9460_s11 = inlined_call_operand.hbm [shape: f32[8,128], index: 11, kind: output, shape index: {}]  }
   0x1   :  { %17 = vsyncpa [#allocation6], 0 }
   0x2   :  { %18 = vsyncpa [#allocation9], 0 }
   0x3   :  { %19 = vsyncpa [#allocation12], 0 }
   0x4   :  { %20 = vsyncpa [#allocation15], 0 }
   0x5   :  { %21 = vsyncpa [#allocation18], 0  ;;  %s38_s19 = sshll.u32 %s9450_s1, 4  ;;  %s39_s19 = int_to_ptr.hbm [resolvable:$true] %s38_s19 }
   0x6   :  { %22 = vsyncpa [#allocation4], 0  ;;  %s9102_s20 = smov [#allocation5]   ;;  %s62_s24 = sshll.u32 %s9452_s3, 4  ;;  %s63_s24 = int_to_ptr.hbm [resolvable:$true] %s62_s24 }
   0x7   :  { %s40_s21 = sshll.u32 %s9102_s20, 4  ;;  %s9103_s25 = smov 512   ;;  %s41_s21 = int_to_ptr.vmem [resolvable:$true] %s40_s21 }
   0x8   :  { %s9104_s26 = smov 32   ;;  %s9105_s27 = smov [#allocation8]  }
   0x9   :  { %46 = dma.hbm_to_vmem [thread:$0]  %s39_s19, 40960, %s41_s21, [#allocation6], %s9103_s25, %s9103_s25, %s9104_s26  }
   0xa   :  { %s64_s28 = sshll.u32 %s9105_s27, 4  ;;  %s9106_s29 = smov 256   ;;  %s65_s28 = int_to_ptr.vmem [resolvable:$true] %s64_s28 }
   0xb   :  { %s9107_s30 = smov 16   ;;  %s86_s13 = sshll.u32 %s9454_s5, 4  ;;  %s87_s13 = int_to_ptr.hbm [resolvable:$true] %s86_s13 }
   0xc   :  { %70 = dma.hbm_to_vmem [thread:$0]  %s63_s24, 32768, %s65_s28, [#allocation9], %s9106_s29, %s9106_s29, %s9107_s30  }
   0xd   :  { %s9108_s14 = smov [#allocation11]   ;;  %s110_s17 = sshll.u32 %s9456_s7, 4  ;;  %s111_s17 = int_to_ptr.hbm [resolvable:$true] %s110_s17 }
   0xe   :  { %s88_s15 = sshll.u32 %s9108_s14, 4  ;;  %s9109_s18 = smov 128   ;;  %s89_s15 = int_to_ptr.vmem [resolvable:$true] %s88_s15 }
   0xf   :  { %s9110_s19 = smov 8   ;;  %s9111_s20 = smov [#allocation14]  }
  0x10   :  { %94 = dma.hbm_to_vmem [thread:$0]  %s87_s13, 8192, %s89_s15, [#allocation12], %s9109_s18, %s9109_s18, %s9110_s19  }
  0x11   :  { %s112_s21 = sshll.u32 %s9111_s20, 4  ;;  %s9112_s22 = smov 64   ;;  %s113_s21 = int_to_ptr.vmem [resolvable:$true] %s112_s21 }
  0x12   :  { %s9113_s23 = smov 4   ;;  %s134_s25 = sshll.u32 %s9458_s9, 4  ;;  %s135_s25 = int_to_ptr.hbm [resolvable:$true] %s134_s25 }
  0x13   :  { %118 = dma.hbm_to_vmem [thread:$0]  %s111_s17, 2048, %s113_s21, [#allocation15], %s9112_s22, %s9112_s22, %s9113_s23  }
  0x14   :  { %s9114_s26 = smov [#allocation17]   ;;  %s28_s29 = sshll.u32 %s9449_s0, 4  ;;  %s29_s29 = int_to_ptr.hbm [resolvable:$true] %s28_s29 }
  0x15   :  { %s136_s27 = sshll.u32 %s9114_s26, 4  ;;  %s9115_s30 = smov [#allocation2]   ;;  %s137_s27 = int_to_ptr.vmem [resolvable:$true] %s136_s27 }
  0x16   :  { %142 = dma.hbm_to_vmem [thread:$0]  %s135_s25, 1024, %s137_s27, [#allocation18], %s9112_s22, %s9112_s22, %s9113_s23  }
  0x17   :  { %s30_s1 = sshll.u32 %s9115_s30, 4  ;;  %s52_s14 = sshll.u32 %s9451_s2, 4  ;;  %s31_s1 = int_to_ptr.vmem [resolvable:$true] %s30_s1  ;;  %s53_s14 = int_to_ptr.hbm [resolvable:$true] %s52_s14 }
  0x18   :  { %33 = dma.hbm_to_vmem [thread:$0]  %s29_s29, 320, %s31_s1, [#allocation3]  }
  0x19   :  { %s76_s16 = sshll.u32 %s9453_s4, 4  ;;  %s9116_s3 = smov [#allocation7]   ;;  %s77_s16 = int_to_ptr.hbm [resolvable:$true] %s76_s16 }
  0x1a   :  { %s54_s17 = sshll.u32 %s9116_s3, 4  ;;  %s9117_s0 = smov [#allocation10]   ;;  %s55_s17 = int_to_ptr.vmem [resolvable:$true] %s54_s17 }
  0x1b   :  { %57 = dma.hbm_to_vmem [thread:$0]  %s53_s14, 128, %s55_s17, [#allocation6]  }
  0x1c   :  { %s78_s18 = sshll.u32 %s9117_s0, 4  ;;  %s100_s21 = sshll.u32 %s9455_s6, 4  ;;  %s79_s18 = int_to_ptr.vmem [resolvable:$true] %s78_s18  ;;  %s101_s21 = int_to_ptr.hbm [resolvable:$true] %s100_s21 }
  0x1d   :  { %81 = dma.hbm_to_vmem [thread:$0]  %s77_s16, 64, %s79_s18, [#allocation9]  }
  0x1e   :  { %s124_s23 = sshll.u32 %s9457_s8, 4  ;;  %s9118_s24 = smov [#allocation13]   ;;  %s125_s23 = int_to_ptr.hbm [resolvable:$true] %s124_s23 }
  0x1f   :  { %s102_s4 = sshll.u32 %s9118_s24, 4  ;;  %s9119_s5 = smov [#allocation16]   ;;  %s103_s4 = int_to_ptr.vmem [resolvable:$true] %s102_s4 }
  0x20   :  { %105 = dma.hbm_to_vmem [thread:$0]  %s101_s21, 32, %s103_s4, [#allocation12]  }
  0x21   :  { %s126_s25 = sshll.u32 %s9119_s5, 4  ;;  %s148_s28 = sshll.u32 %s9459_s10, 4  ;;  %s127_s25 = int_to_ptr.vmem [resolvable:$true] %s126_s25  ;;  %s149_s28 = int_to_ptr.hbm [resolvable:$true] %s148_s28 }
  0x22   :  { %129 = dma.hbm_to_vmem [thread:$0]  %s125_s23, 16, %s127_s25, [#allocation15]  }
  0x23   :  { %s9120_s6 = smov [#allocation19]  }
  0x24   :  { %s150_s7 = sshll.u32 %s9120_s6, 4  ;;  %s151_s7 = int_to_ptr.vmem [resolvable:$true] %s150_s7 }
  0x25   :  { %153 = dma.hbm_to_vmem [thread:$0]  %s149_s28, 16, %s151_s7, [#allocation18]  }
  0x26   :  { %9088 = dma.done.wait [#allocation3], 320  }
  0x27   :  { %9089 = vsyncadd [#allocation3], 4294966976 }
  0x28   :  { %9090 = dma.done.wait [#allocation6], 41088  }
  0x29   :  { %9091 = vsyncadd [#allocation6], 4294926208 }
  0x2a   :  { %9092 = dma.done.wait [#allocation9], 32832  }
  0x2b   :  { %9093 = vsyncadd [#allocation9], 4294934464 }
  0x2c   :  { %9094 = dma.done.wait [#allocation12], 8224  }
  0x2d   :  { %9095 = vsyncadd [#allocation12], 4294959072 }
  0x2e   :  { %9096 = dma.done.wait [#allocation15], 2064  }
  0x2f   :  { %9097 = vsyncadd [#allocation15], 4294965232 }
  0x30   :  { %9098 = dma.done.wait [#allocation18], 1040  }
  0x31   :  { %9099 = vsyncadd [#allocation18], 4294966256  ;;  %v5651_v0 = vld [vmem:[#allocation5 + $0x1c0] sm:$0xf]  ;;  %s9121_s8 = smov [#allocation20]   ;;  %s5410_s1 = sshll.u32 %s9460_s11, 4  ;;  %s5411_s1 = int_to_ptr.hbm [resolvable:$true] %s5410_s1 }
  0x32   :  { %v8141_v1 = vld [vmem:[#allocation5 + $0x1dc] sm:$0xf0]  ;;  %s5408_s10 = sshll.u32 %s9121_s8, 4  ;;  %s5409_s10 = int_to_ptr.vmem [resolvable:$true] %s5408_s10 }
  0x33   :  { %v5907_v2 = vld [vmem:[#allocation5 + $0x3c0] sm:$0xf]  ;;  %v5652_v3 = vor.u32 %v8141_v1, %v5651_v0 }
  0x34   :  { %v8205_v4 = vld [vmem:[#allocation5 + $0x3dc] sm:$0xf0] }
  0x35   :  { %v6163_v5 = vld [vmem:[#allocation5 + $0x5c0] sm:$0xf]  ;;  %v5908_v7 = vor.u32 %v8205_v4, %v5907_v2  ;;  %2157 = vmatpush.bf16.msra.mxu0 %v5652_v3 }
  0x36   :  { %v8269_v6 = vld [vmem:[#allocation5 + $0x5dc] sm:$0xf0] }
  0x37   :  { %v6164_v8 = vor.u32 %v8269_v6, %v6163_v5  ;;  %v6419_v9 = vld [vmem:[#allocation5 + $0x7c0] sm:$0xf]  ;;  %2170 = vmatpush.bf16.msra.mxu1 %v5908_v7 }
  0x38   :  { %v8333_v10 = vld [vmem:[#allocation5 + $0x7dc] sm:$0xf0] }
  0x39   :  { %v5619_v11 = vld [vmem:[#allocation5 + $0x180] sm:$0xf]  ;;  %v6420_v12 = vor.u32 %v8333_v10, %v6419_v9  ;;  %2183 = vmatpush.bf16.msra.mxu2 %v6164_v8 }
  0x3a   :  { %v8133_v13 = vld [vmem:[#allocation5 + $0x19c] sm:$0xf0] }
  0x3b   :  { %v5875_v14 = vld [vmem:[#allocation5 + $0x380] sm:$0xf]  ;;  %v5620_v16 = vor.u32 %v8133_v13, %v5619_v11  ;;  %2196 = vmatpush.bf16.msra.mxu3 %v6420_v12 }
  0x3c   :  { %v8197_v15 = vld [vmem:[#allocation5 + $0x39c] sm:$0xf0] }
  0x3d   :  { %v5876_v17 = vor.u32 %v8197_v15, %v5875_v14  ;;  %v6131_v18 = vld [vmem:[#allocation5 + $0x580] sm:$0xf]  ;;  %2158 = vmatpush.bf16.msra.mxu0 %v5620_v16 }
  0x3e   :  { %v8261_v19 = vld [vmem:[#allocation5 + $0x59c] sm:$0xf0] }
  0x3f   :  { %v6387_v20 = vld [vmem:[#allocation5 + $0x780] sm:$0xf]  ;;  %v6132_v21 = vor.u32 %v8261_v19, %v6131_v18  ;;  %2171 = vmatpush.bf16.msra.mxu1 %v5876_v17 }
  0x40   :  { %v8325_v22 = vld [vmem:[#allocation5 + $0x79c] sm:$0xf0] }
  0x41   :  { %v5587_v23 = vld [vmem:[#allocation5 + $0x140] sm:$0xf]  ;;  %v6388_v25 = vor.u32 %v8325_v22, %v6387_v20  ;;  %2184 = vmatpush.bf16.msra.mxu2 %v6132_v21 }
  0x42   :  { %v8125_v24 = vld [vmem:[#allocation5 + $0x15c] sm:$0xf0] }
  0x43   :  { %v5843_v26 = vld [vmem:[#allocation5 + $0x340] sm:$0xf]  ;;  %v5588_v29 = vor.u32 %v8125_v24, %v5587_v23  ;;  %2197 = vmatpush.bf16.msra.mxu3 %v6388_v25 }
  0x44   :  { %v8189_v27 = vld [vmem:[#allocation5 + $0x35c] sm:$0xf0] }
  0x45   :  { %v6099_v28 = vld [vmem:[#allocation5 + $0x540] sm:$0xf]  ;;  %v5844_v33 = vor.u32 %v8189_v27, %v5843_v26  ;;  %2159 = vmatpush.bf16.msra.mxu0 %v5588_v29 }
  0x46   :  { %v8253_v30 = vld [vmem:[#allocation5 + $0x55c] sm:$0xf0] }
  0x47   :  { %v6355_v31 = vld [vmem:[#allocation5 + $0x740] sm:$0xf]  ;;  %v6100_v34 = vor.u32 %v8253_v30, %v6099_v28  ;;  %2172 = vmatpush.bf16.msra.mxu1 %v5844_v33  ;;  %v8137_v30 = vld [vmem:[#allocation5 + $0x1c4] sm:$0xf] }
  0x48   :  { %v8317_v32 = vld [vmem:[#allocation5 + $0x75c] sm:$0xf0]  ;;  %v8201_v33 = vld [vmem:[#allocation5 + $0x3c4] sm:$0xf] }
  0x49   :  { %v5555_v35 = vld [vmem:[#allocation5 + $0x100] sm:$0xf]  ;;  %v6356_v38 = vor.u32 %v8317_v32, %v6355_v31  ;;  %2185 = vmatpush.bf16.msra.mxu2 %v6100_v34  ;;  %v5653_v32 = vld [vmem:[#allocation5 + $0x1e0] sm:$0xf0] }
  0x4a   :  { %v8117_v36 = vld [vmem:[#allocation5 + $0x11c] sm:$0xf0]  ;;  %v5909_v34 = vld [vmem:[#allocation5 + $0x3e0] sm:$0xf0] }
  0x4b   :  { %v5811_v37 = vld [vmem:[#allocation5 + $0x300] sm:$0xf]  ;;  %v5556_v44 = vor.u32 %v8117_v36, %v5555_v35  ;;  %2198 = vmatpush.bf16.msra.mxu3 %v6356_v38  ;;  %v6165_v38 = vld [vmem:[#allocation5 + $0x5e0] sm:$0xf0] }
  0x4c   :  { %v8181_v39 = vld [vmem:[#allocation5 + $0x31c] sm:$0xf0] }
  0x4d   :  { %v6067_v40 = vld [vmem:[#allocation5 + $0x500] sm:$0xf]  ;;  %v5812_v45 = vor.u32 %v8181_v39, %v5811_v37  ;;  %2160 = vmatpush.bf16.msra.mxu0 %v5556_v44  ;;  %v8265_v37 = vld [vmem:[#allocation5 + $0x5c4] sm:$0xf] }
  0x4e   :  { %v8245_v41 = vld [vmem:[#allocation5 + $0x51c] sm:$0xf0] }
  0x4f   :  { %v6323_v42 = vld [vmem:[#allocation5 + $0x700] sm:$0xf]  ;;  %v6068_v46 = vor.u32 %v8245_v41, %v6067_v40  ;;  %2173 = vmatpush.bf16.msra.mxu1 %v5812_v45  ;;  %v5656_v41 = vor.u32 %v8137_v30, %v5653_v32  ;;  %v8129_v45 = vld [vmem:[#allocation5 + $0x184] sm:$0xf] }
  0x50   :  { %v8309_v43 = vld [vmem:[#allocation5 + $0x71c] sm:$0xf0]  ;;  %v8169_v30 = vld [vmem:[#allocation5 + $0x2c4] sm:$0xf] }
  0x51   :  { %v5523_v47 = vld [vmem:[#allocation5 + $0xc0] sm:$0xf]  ;;  %v6324_v50 = vor.u32 %v8309_v43, %v6323_v42  ;;  %2186 = vmatpush.bf16.msra.mxu2 %v6068_v46  ;;  %v5912_v42 = vor.u32 %v8201_v33, %v5909_v34  ;;  %v6168_v46 = vor.u32 %v8265_v37, %v6165_v38  ;;  %v8233_v32 = vld [vmem:[#allocation5 + $0x4c4] sm:$0xf] }
  0x52   :  { %v8109_v48 = vld [vmem:[#allocation5 + $0xdc] sm:$0xf0]  ;;  %v6037_v33 = vld [vmem:[#allocation5 + $0x4e0] sm:$0xf0] }
  0x53   :  { %v5779_v49 = vld [vmem:[#allocation5 + $0x2c0] sm:$0xf]  ;;  %v5524_v56 = vor.u32 %v8109_v48, %v5523_v47  ;;  %2199 = vmatpush.bf16.msra.mxu3 %v6324_v50  ;;  %v5621_v47 = vld [vmem:[#allocation5 + $0x1a0] sm:$0xf0] }
  0x54   :  { %v8173_v51 = vld [vmem:[#allocation5 + $0x2dc] sm:$0xf0]  ;;  %v8193_v48 = vld [vmem:[#allocation5 + $0x384] sm:$0xf] }
  0x55   :  { %v6035_v52 = vld [vmem:[#allocation5 + $0x4c0] sm:$0xf]  ;;  %v5780_v57 = vor.u32 %v8173_v51, %v5779_v49  ;;  %2161 = vmatpush.bf16.msra.mxu0 %v5524_v56  ;;  %v5877_v49 = vld [vmem:[#allocation5 + $0x3a0] sm:$0xf0] }
  0x56   :  { %v8237_v53 = vld [vmem:[#allocation5 + $0x4dc] sm:$0xf0]  ;;  %v8257_v50 = vld [vmem:[#allocation5 + $0x584] sm:$0xf] }
  0x57   :  { %v6291_v54 = vld [vmem:[#allocation5 + $0x6c0] sm:$0xf]  ;;  %v6036_v58 = vor.u32 %v8237_v53, %v6035_v52  ;;  %2174 = vmatpush.bf16.msra.mxu1 %v5780_v57  ;;  %v6133_v51 = vld [vmem:[#allocation5 + $0x5a0] sm:$0xf0] }
  0x58   :  { %v8301_v55 = vld [vmem:[#allocation5 + $0x6dc] sm:$0xf0]  ;;  %v8121_v57 = vld [vmem:[#allocation5 + $0x144] sm:$0xf] }
  0x59   :  { %v5491_v59 = vld [vmem:[#allocation5 + $0x80] sm:$0xf]  ;;  %v6292_v62 = vor.u32 %v8301_v55, %v6291_v54  ;;  %2187 = vmatpush.bf16.msra.mxu2 %v6036_v58  ;;  %v5624_v54 = vor.u32 %v8129_v45, %v5621_v47  ;;  %v5880_v55 = vor.u32 %v8193_v48, %v5877_v49  ;;  %v5589_v58 = vld [vmem:[#allocation5 + $0x160] sm:$0xf0] }
  0x5a   :  { %v8101_v60 = vld [vmem:[#allocation5 + $0x9c] sm:$0xf0]  ;;  %v6005_v45 = vld [vmem:[#allocation5 + $0x4a0] sm:$0xf0] }
  0x5b   :  { %v5747_v61 = vld [vmem:[#allocation5 + $0x280] sm:$0xf]  ;;  %v5492_v4 = vor.u32 %v8101_v60, %v5491_v59  ;;  %2200 = vmatpush.bf16.msra.mxu3 %v6292_v62  ;;  %v6136_v59 = vor.u32 %v8257_v50, %v6133_v51  ;;  %v8185_v60 = vld [vmem:[#allocation5 + $0x344] sm:$0xf] }
  0x5c   :  { %v8165_v63 = vld [vmem:[#allocation5 + $0x29c] sm:$0xf0]  ;;  %v8249_v62 = vld [vmem:[#allocation5 + $0x544] sm:$0xf] }
  0x5d   :  { %v6003_v0 = vld [vmem:[#allocation5 + $0x480] sm:$0xf]  ;;  %v5748_v5 = vor.u32 %v8165_v63, %v5747_v61  ;;  %2162 = vmatpush.bf16.msra.mxu0 %v5492_v4  ;;  %v5845_v61 = vld [vmem:[#allocation5 + $0x360] sm:$0xf0] }
  0x5e   :  { %v8229_v1 = vld [vmem:[#allocation5 + $0x49c] sm:$0xf0]  ;;  %v6101_v63 = vld [vmem:[#allocation5 + $0x560] sm:$0xf0]  ;;  %v5848_v4 = vor.u32 %v8185_v60, %v5845_v61 }
  0x5f   :  { %v6259_v2 = vld [vmem:[#allocation5 + $0x680] sm:$0xf]  ;;  %v6004_v6 = vor.u32 %v8229_v1, %v6003_v0  ;;  %2175 = vmatpush.bf16.msra.mxu1 %v5748_v5  ;;  %v5592_v1 = vor.u32 %v8121_v57, %v5589_v58  ;;  %v8089_v51 = vld [vmem:[#allocation5 + $0x44] sm:$0xf] }
  0x60   :  { %v8293_v3 = vld [vmem:[#allocation5 + $0x69c] sm:$0xf0]  ;;  %v5973_v57 = vld [vmem:[#allocation5 + $0x460] sm:$0xf0] }
  0x61   :  { %v5459_v7 = vld [vmem:[#allocation5 + $0x40] sm:$0xf]  ;;  %v6260_v10 = vor.u32 %v8293_v3, %v6259_v2  ;;  %2188 = vmatpush.bf16.msra.mxu2 %v6004_v6  ;;  %v199_v2 = vld [vmem:[#allocation2 + $0x8] sm:$0xff]  ;;  %v198_v3 = vld [vmem:[#allocation2] sm:$0xff] }
  0x62   :  { %v8093_v8 = vld [vmem:[#allocation5 + $0x5c] sm:$0xf0]  ;;  %v8081_v61 = vld [vmem:[#allocation5 + $0x4] sm:$0xf] }
  0x63   :  { %v5715_v9 = vld [vmem:[#allocation5 + $0x240] sm:$0xf]  ;;  %v5460_v16 = vor.u32 %v8093_v8, %v5459_v7  ;;  %2201 = vmatpush.bf16.msra.mxu3 %v6260_v10  ;;  %v8113_v7 = vld [vmem:[#allocation5 + $0x104] sm:$0xf]  ;;  %v544_v8 = vunpack.c.l.b16 %v199_v2  ;;  %v545_v10 = vunpack.c.h.b16 %v199_v2  ;;  %v200_v2 = vld [vmem:[#allocation2 + $0x10] sm:$0xf] }
  0x64   :  { %v8157_v11 = vld [vmem:[#allocation5 + $0x25c] sm:$0xf0] }
  0x65   :  { %v5971_v12 = vld [vmem:[#allocation5 + $0x440] sm:$0xf]  ;;  %v5716_v19 = vor.u32 %v8157_v11, %v5715_v9  ;;  %2163 = vmatpush.bf16.msra.mxu0 %v5460_v16  ;;  %v542_v9 = vunpack.c.l.b16 %v198_v3  ;;  %v6104_v11 = vor.u32 %v8249_v62, %v6101_v63  ;;  %v8241_v16 = vld [vmem:[#allocation5 + $0x504] sm:$0xf] }
  0x66   :  { %v8221_v13 = vld [vmem:[#allocation5 + $0x45c] sm:$0xf0] }
  0x67   :  { %v6227_v14 = vld [vmem:[#allocation5 + $0x640] sm:$0xf]  ;;  %v5972_v20 = vor.u32 %v8221_v13, %v5971_v12  ;;  %2176 = vmatpush.bf16.msra.mxu1 %v5716_v19  ;;  %v5557_v12 = vld [vmem:[#allocation5 + $0x120] sm:$0xf0]  ;;  %v9217_v19 = vpack.c.b16 %v542_v9, %v542_v9 }
  0x68   :  { %v8285_v15 = vld [vmem:[#allocation5 + $0x65c] sm:$0xf0]  ;;  %v8177_v13 = vld [vmem:[#allocation5 + $0x304] sm:$0xf] }
  0x69   :  { %v5427_v17 = vld [vmem:[#allocation5] sm:$0xf]  ;;  %v6228_v24 = vor.u32 %v8285_v15, %v6227_v14  ;;  %2189 = vmatpush.bf16.msra.mxu2 %v5972_v20  ;;  %v5813_v14 = vld [vmem:[#allocation5 + $0x320] sm:$0xf0]  ;;  %v543_v15 = vunpack.c.h.b16 %v198_v3  ;;  %v9219_v20 = vpack.c.b16 %v545_v10, %v545_v10 }
  0x6a   :  { %v8085_v18 = vld [vmem:[#allocation5 + $0x1c] sm:$0xf0]  ;;  %v8393_v9 = vld [vmem:[#allocation5 + $0x9c4] sm:$0xf] }
  0x6b   :  { %v5683_v21 = vld [vmem:[#allocation5 + $0x200] sm:$0xf]  ;;  %v5428_v31 = vor.u32 %v8085_v18, %v5427_v17  ;;  %2202 = vmatpush.bf16.msra.mxu3 %v6228_v24  ;;  %v6069_v17 = vld [vmem:[#allocation5 + $0x520] sm:$0xf0]  ;;  %v9215_v18 = vpack.c.b16 %v544_v8, %v544_v8  ;;  %v5816_v24 = vor.u32 %v8177_v13, %v5813_v14  ;;  %v8142_v13 = vld [vmem:[#allocation5 + $0x1e4] sm:$0xf0]  ;;  %v546_v14 = vunpack.c.l.b16 %v200_v2 }
  0x6c   :  { %v8149_v22 = vld [vmem:[#allocation5 + $0x21c] sm:$0xf0]  ;;  %v6421_v8 = vld [vmem:[#allocation5 + $0x7e0] sm:$0xf0] }
  0x6d   :  { %v5939_v23 = vld [vmem:[#allocation5 + $0x400] sm:$0xf]  ;;  %v5684_v35 = vor.u32 %v8149_v22, %v5683_v21  ;;  %2164 = vmatpush.bf16.msra.mxu0 %v5428_v31  ;;  %v9221_v22 = vpack.c.b16 %v543_v15, %v543_v15  ;;  %v5781_v31 = vld [vmem:[#allocation5 + $0x2e0] sm:$0xf0] }
  0x6e   :  { %v8213_v25 = vld [vmem:[#allocation5 + $0x41c] sm:$0xf0]  ;;  %v8361_v2 = vld [vmem:[#allocation5 + $0x8c4] sm:$0xf] }
  0x6f   :  { %v6195_v26 = vld [vmem:[#allocation5 + $0x600] sm:$0xf]  ;;  %v5940_v36 = vor.u32 %v8213_v25, %v5939_v23  ;;  %2177 = vmatpush.bf16.msra.mxu1 %v5684_v35  ;;  %v5560_v23 = vor.u32 %v8113_v7, %v5557_v12  ;;  %v8329_v7 = vld [vmem:[#allocation5 + $0x7c4] sm:$0xf]  ;;  %v5659_v12 = vld [vmem:[#allocation5 + $0x1c8] sm:$0xf] }
  0x70   :  { %v8277_v27 = vld [vmem:[#allocation5 + $0x61c] sm:$0xf0]  ;;  %2165 = vmatmul.bf16.vlgmr.msra.gmra.mxu0 %v9217_v19 }
  0x71   :  { %v6675_v28 = vld [vmem:[#allocation5 + $0x9c0] sm:$0xf]  ;;  %v6196_v39 = vor.u32 %v8277_v27, %v6195_v26  ;;  %2190 = vmatpush.bf16.msra.mxu2 %v5940_v36  ;;  %v8105_v27 = vld [vmem:[#allocation5 + $0xc4] sm:$0xf]  ;;  %v5784_v36 = vor.u32 %v8169_v30, %v5781_v31 }
  0x72   :  { %v8397_v29 = vld [vmem:[#allocation5 + $0x9dc] sm:$0xf0]  ;;  %2178 = vmatmul.bf16.vlgmr.msra.gmra.mxu1 %v9221_v22  ;;  %v6645_v31 = vld [vmem:[#allocation5 + $0x9a0] sm:$0xf0] }
  0x73   :  { %v6676_v40 = vor.u32 %v8397_v29, %v6675_v28  ;;  %v6643_v43 = vld [vmem:[#allocation5 + $0x980] sm:$0xf]  ;;  %2203 = vmatpush.bf16.msra.mxu3 %v6196_v39  ;;  %2222 = vmatpush.bf16.msrb.mxu1 %v5656_v41  ;;  %v6072_v28 = vor.u32 %v8241_v16, %v6069_v17  ;;  %v5525_v29 = vld [vmem:[#allocation5 + $0xe0] sm:$0xf0]  ;;  %v5915_v17 = vld [vmem:[#allocation5 + $0x3c8] sm:$0xf] }
  0x74   :  { %v8389_v44 = vld [vmem:[#allocation5 + $0x99c] sm:$0xf0]  ;;  %2191 = vmatmul.bf16.vlgmr.msra.gmra.mxu2 %v9215_v18  ;;  %v5528_v35 = vor.u32 %v8105_v27, %v5525_v29  ;;  %v8097_v39 = vld [vmem:[#allocation5 + $0x84] sm:$0xf] }
  0x75   :  { %2209 = vmatpush.bf16.msrb.mxu0 %v6676_v40  ;;  %v6644_v52 = vor.u32 %v8389_v44, %v6643_v43  ;;  %v6611_v53 = vld [vmem:[#allocation5 + $0x940] sm:$0xf]  ;;  %2235 = vmatpush.bf16.msrb.mxu2 %v5912_v42  ;;  %v6040_v40 = vor.u32 %v8233_v32, %v6037_v33  ;;  %v5493_v41 = vld [vmem:[#allocation5 + $0xa0] sm:$0xf0]  ;;  %v5627_v32 = vld [vmem:[#allocation5 + $0x188] sm:$0xf] }
  0x76   :  { %v8381_v56 = vld [vmem:[#allocation5 + $0x95c] sm:$0xf0]  ;;  %2204 = vmatmul.bf16.vlgmr.msra.gmra.mxu3 %v9219_v20  ;;  %v8161_v42 = vld [vmem:[#allocation5 + $0x284] sm:$0xf]  ;;  %v5496_v47 = vor.u32 %v8097_v39, %v5493_v41  ;;  %v8134_v33 = vld [vmem:[#allocation5 + $0x1a4] sm:$0xf0] }
  0x77   :  { %2248 = vmatpush.bf16.msrb.mxu3 %v6168_v46  ;;  %v6612_v0 = vor.u32 %v8381_v56, %v6611_v53  ;;  %2223 = vmatpush.bf16.msrb.mxu1 %v5624_v54  ;;  %v6579_v5 = vld [vmem:[#allocation5 + $0x900] sm:$0xf]  ;;  %v5749_v43 = vld [vmem:[#allocation5 + $0x2a0] sm:$0xf0]  ;;  %v5628_v39 = vor.u32 %v8134_v33, %v5627_v32  ;;  %v5467_v33 = vld [vmem:[#allocation5 + $0x48] sm:$0xf] }
  0x78   :  { %v8373_v6 = vld [vmem:[#allocation5 + $0x91c] sm:$0xf0]  ;;  %v8225_v44 = vld [vmem:[#allocation5 + $0x484] sm:$0xf]  ;;  %v5752_v48 = vor.u32 %v8161_v42, %v5749_v43 }
  0x79   :  { %2210 = vmatpush.bf16.msrb.mxu0 %v6644_v52  ;;  %2236 = vmatpush.bf16.msrb.mxu2 %v5880_v55  ;;  %v6580_v21 = vor.u32 %v8373_v6, %v6579_v5  ;;  %v6547_v25 = vld [vmem:[#allocation5 + $0x8c0] sm:$0xf]  ;;  %v6008_v52 = vor.u32 %v8225_v44, %v6005_v45  ;;  %v5461_v53 = vld [vmem:[#allocation5 + $0x60] sm:$0xf0]  ;;  %v5595_v45 = vld [vmem:[#allocation5 + $0x148] sm:$0xf] }
  0x7a   :  { %v8365_v26 = vld [vmem:[#allocation5 + $0x8dc] sm:$0xf0]  ;;  %v8153_v54 = vld [vmem:[#allocation5 + $0x244] sm:$0xf]  ;;  %v5464_v62 = vor.u32 %v8089_v51, %v5461_v53 }
  0x7b   :  { %2249 = vmatpush.bf16.msrb.mxu3 %v6136_v59  ;;  %2224 = vmatpush.bf16.msrb.mxu1 %v5592_v1  ;;  %v6548_v34 = vor.u32 %v8365_v26, %v6547_v25  ;;  %v6515_v37 = vld [vmem:[#allocation5 + $0x880] sm:$0xf]  ;;  %v5717_v55 = vld [vmem:[#allocation5 + $0x260] sm:$0xf0]  ;;  %v5660_v26 = vor.u32 %v8142_v13, %v5659_v12 }
  0x7c   :  { %v8357_v38 = vld [vmem:[#allocation5 + $0x89c] sm:$0xf0]  ;;  %v8217_v56 = vld [vmem:[#allocation5 + $0x444] sm:$0xf]  ;;  %v5720_v63 = vor.u32 %v8153_v54, %v5717_v55 }
  0x7d   :  { %2211 = vmatpush.bf16.msrb.mxu0 %v6612_v0  ;;  %2237 = vmatpush.bf16.msrb.mxu2 %v5848_v4  ;;  %v6516_v46 = vor.u32 %v8357_v38, %v6515_v37  ;;  %v6483_v49 = vld [vmem:[#allocation5 + $0x840] sm:$0xf]  ;;  %v5429_v0 = vld [vmem:[#allocation5 + $0x20] sm:$0xf0]  ;;  %v5976_v3 = vor.u32 %v8217_v56, %v5973_v57  ;;  %v5563_v57 = vld [vmem:[#allocation5 + $0x108] sm:$0xf] }
  0x7e   :  { %v8349_v50 = vld [vmem:[#allocation5 + $0x85c] sm:$0xf0]  ;;  %v8145_v1 = vld [vmem:[#allocation5 + $0x204] sm:$0xf]  ;;  %v5432_v15 = vor.u32 %v8081_v61, %v5429_v0 }
  0x7f   :  { %2250 = vmatpush.bf16.msrb.mxu3 %v6104_v11  ;;  %2225 = vmatpush.bf16.msrb.mxu1 %v5560_v23  ;;  %v6484_v58 = vor.u32 %v8349_v50, %v6483_v49  ;;  %v6451_v59 = vld [vmem:[#allocation5 + $0x800] sm:$0xf]  ;;  %v5685_v4 = vld [vmem:[#allocation5 + $0x220] sm:$0xf0] }
  0x80   :  { %v8341_v60 = vld [vmem:[#allocation5 + $0x81c] sm:$0xf0]  ;;  %v8209_v5 = vld [vmem:[#allocation5 + $0x404] sm:$0xf]  ;;  %v5688_v16 = vor.u32 %v8145_v1, %v5685_v4 }
  0x81   :  { %2212 = vmatpush.bf16.msrb.mxu0 %v6580_v21  ;;  %2238 = vmatpush.bf16.msrb.mxu2 %v5816_v24  ;;  %v5941_v6 = vld [vmem:[#allocation5 + $0x420] sm:$0xf0]  ;;  %v6452_v10 = vor.u32 %v8341_v60, %v6451_v59  ;;  %v8206_v21 = vld [vmem:[#allocation5 + $0x3e4] sm:$0xf0]  ;;  %v6424_v24 = vor.u32 %v8329_v7, %v6421_v8 }
  0x82   :  { %v6677_v11 = vld [vmem:[#allocation5 + $0x9e0] sm:$0xf0]  ;;  %v5944_v23 = vor.u32 %v8209_v5, %v5941_v6  ;;  %v5916_v30 = vor.u32 %v8206_v21, %v5915_v17  ;;  %v5819_v59 = vld [vmem:[#allocation5 + $0x308] sm:$0xf] }
  0x83   :  { %2251 = vmatpush.bf16.msrb.mxu3 %v6072_v28  ;;  %2226 = vmatpush.bf16.msrb.mxu1 %v5528_v35  ;;  %v6680_v25 = vor.u32 %v8393_v9, %v6677_v11  ;;  %v8321_v27 = vld [vmem:[#allocation5 + $0x784] sm:$0xf]  ;;  %v5883_v35 = vld [vmem:[#allocation5 + $0x388] sm:$0xf] }
  0x84   :  { %v6389_v28 = vld [vmem:[#allocation5 + $0x7a0] sm:$0xf0]  ;;  %v8182_v60 = vld [vmem:[#allocation5 + $0x324] sm:$0xf0] }
  0x85   :  { %2213 = vmatpush.bf16.msrb.mxu0 %v6548_v34  ;;  %2239 = vmatpush.bf16.msrb.mxu2 %v5784_v36  ;;  %v8385_v29 = vld [vmem:[#allocation5 + $0x984] sm:$0xf]  ;;  %v9227_v34 = vpack.c.b16 %v546_v14, %v546_v14  ;;  %v8198_v36 = vld [vmem:[#allocation5 + $0x3a4] sm:$0xf0]  ;;  %v6392_v37 = vor.u32 %v8321_v27, %v6389_v28 }
  0x86   :  { %v6648_v38 = vor.u32 %v8385_v29, %v6645_v31  ;;  %v6357_v41 = vld [vmem:[#allocation5 + $0x760] sm:$0xf0]  ;;  %v5884_v43 = vor.u32 %v8198_v36, %v5883_v35  ;;  %v5531_v5 = vld [vmem:[#allocation5 + $0xc8] sm:$0xf] }
  0x87   :  { %2252 = vmatpush.bf16.msrb.mxu3 %v6040_v40  ;;  %2227 = vmatpush.bf16.msrb.mxu1 %v5496_v47  ;;  %v8313_v40 = vld [vmem:[#allocation5 + $0x744] sm:$0xf]  ;;  %v5851_v47 = vld [vmem:[#allocation5 + $0x348] sm:$0xf] }
  0x88   :  { %v8377_v42 = vld [vmem:[#allocation5 + $0x944] sm:$0xf]  ;;  %v6360_v49 = vor.u32 %v8313_v40, %v6357_v41  ;;  %v8110_v6 = vld [vmem:[#allocation5 + $0xe4] sm:$0xf0] }
  0x89   :  { %2214 = vmatpush.bf16.msrb.mxu0 %v6516_v46  ;;  %2240 = vmatpush.bf16.msrb.mxu2 %v5752_v48  ;;  %v6613_v44 = vld [vmem:[#allocation5 + $0x960] sm:$0xf0]  ;;  %v8126_v46 = vld [vmem:[#allocation5 + $0x164] sm:$0xf0]  ;;  %v5532_v12 = vor.u32 %v8110_v6, %v5531_v5 }
  0x8a   :  { %v8190_v48 = vld [vmem:[#allocation5 + $0x364] sm:$0xf0]  ;;  %v6616_v50 = vor.u32 %v8377_v42, %v6613_v44  ;;  %v5596_v51 = vor.u32 %v8126_v46, %v5595_v45  ;;  %v6325_v53 = vld [vmem:[#allocation5 + $0x720] sm:$0xf0] }
  0x8b   :  { %2253 = vmatpush.bf16.msrb.mxu3 %v6008_v52  ;;  %2228 = vmatpush.bf16.msrb.mxu1 %v5464_v62  ;;  %v8305_v52 = vld [vmem:[#allocation5 + $0x704] sm:$0xf]  ;;  %v5852_v55 = vor.u32 %v8190_v48, %v5851_v47  ;;  %v5787_v7 = vld [vmem:[#allocation5 + $0x2c8] sm:$0xf] }
  0x8c   :  { %v8369_v54 = vld [vmem:[#allocation5 + $0x904] sm:$0xf]  ;;  %v6328_v61 = vor.u32 %v8305_v52, %v6325_v53  ;;  %v8174_v8 = vld [vmem:[#allocation5 + $0x2e4] sm:$0xf0] }
  0x8d   :  { %2215 = vmatpush.bf16.msrb.mxu0 %v6484_v58  ;;  %2241 = vmatpush.bf16.msrb.mxu2 %v5720_v63  ;;  %v6581_v56 = vld [vmem:[#allocation5 + $0x920] sm:$0xf0]  ;;  %v8118_v58 = vld [vmem:[#allocation5 + $0x124] sm:$0xf0] }
  0x8e   :  { %v6584_v62 = vor.u32 %v8369_v54, %v6581_v56  ;;  %v5564_v63 = vor.u32 %v8118_v58, %v5563_v57  ;;  %v8297_v0 = vld [vmem:[#allocation5 + $0x6c4] sm:$0xf]  ;;  %v5499_v17 = vld [vmem:[#allocation5 + $0x88] sm:$0xf] }
  0x8f   :  { %2254 = vmatpush.bf16.msrb.mxu3 %v5976_v3  ;;  %2229 = vmatpush.bf16.msrb.mxu1 %v5432_v15  ;;  %v6293_v1 = vld [vmem:[#allocation5 + $0x6e0] sm:$0xf0]  ;;  %v5820_v3 = vor.u32 %v8182_v60, %v5819_v59  ;;  %v8102_v21 = vld [vmem:[#allocation5 + $0xa4] sm:$0xf0]  ;;  %v8138_v59 = vld [vmem:[#allocation5 + $0x1cc] sm:$0xf] }
  0x90   :  { %v6549_v4 = vld [vmem:[#allocation5 + $0x8e0] sm:$0xf0]  ;;  %v6296_v9 = vor.u32 %v8297_v0, %v6293_v1  ;;  %v5500_v27 = vor.u32 %v8102_v21, %v5499_v17  ;;  %v8094_v35 = vld [vmem:[#allocation5 + $0x64] sm:$0xf0]  ;;  %v5661_v60 = vld [vmem:[#allocation5 + $0x1e8] sm:$0xf0] }
  0x91   :  { %2216 = vmatpush.bf16.msrb.mxu0 %v6452_v10  ;;  %2242 = vmatpush.bf16.msrb.mxu2 %v5688_v16  ;;  %v8289_v10 = vld [vmem:[#allocation5 + $0x684] sm:$0xf]  ;;  %v6552_v11 = vor.u32 %v8361_v2, %v6549_v4  ;;  %v5788_v16 = vor.u32 %v8174_v8, %v5787_v7  ;;  %v5723_v36 = vld [vmem:[#allocation5 + $0x248] sm:$0xf]  ;;  %v5468_v42 = vor.u32 %v8094_v35, %v5467_v33  ;;  %v8130_v8 = vld [vmem:[#allocation5 + $0x18c] sm:$0xf] }
  0x92   :  { %2230 = vmatmul.bf16.vlgmr.msrb.gmra.mxu1 %v9217_v19  ;;  %v6261_v13 = vld [vmem:[#allocation5 + $0x6a0] sm:$0xf0]  ;;  %v5435_v45 = vld [vmem:[#allocation5 + $0x8] sm:$0xf]  ;;  %v5664_v4 = vor.u32 %v8138_v59, %v5661_v60 }
  0x93   :  { %2255 = vmatpush.bf16.msrb.mxu3 %v5944_v23  ;;  %2274 = vmatpush.bf16.msra.mxu1 %v6680_v25  ;;  %v8353_v14 = vld [vmem:[#allocation5 + $0x884] sm:$0xf]  ;;  %v5755_v23 = vld [vmem:[#allocation5 + $0x288] sm:$0xf]  ;;  %v6264_v25 = vor.u32 %v8289_v10, %v6261_v13 }
  0x94   :  { %2217 = vmatmul.bf16.vlgmr.msrb.gmra.mxu0 %v9227_v34  ;;  %2243 = vmatmul.bf16.vlgmr.msrb.gmra.mxu2 %v9221_v22  ;;  %v6517_v15 = vld [vmem:[#allocation5 + $0x8a0] sm:$0xf0]  ;;  %v8086_v47 = vld [vmem:[#allocation5 + $0x24] sm:$0xf0] }
  0x95   :  { %2261 = vmatpush.bf16.msra.mxu0 %v6424_v24  ;;  %2287 = vmatpush.bf16.msra.mxu2 %v5660_v26  ;;  %v8166_v24 = vld [vmem:[#allocation5 + $0x2a4] sm:$0xf0]  ;;  %v6520_v26 = vor.u32 %v8353_v14, %v6517_v15  ;;  %v8281_v28 = vld [vmem:[#allocation5 + $0x644] sm:$0xf]  ;;  %v5436_v58 = vor.u32 %v8086_v47, %v5435_v45 }
  0x96   :  { %2256 = vmatmul.bf16.vlgmr.msrb.gmra.mxu3 %v9215_v18  ;;  %v6229_v29 = vld [vmem:[#allocation5 + $0x660] sm:$0xf0]  ;;  %v5756_v31 = vor.u32 %v8166_v24, %v5755_v23  ;;  %v5691_v48 = vld [vmem:[#allocation5 + $0x208] sm:$0xf]  ;;  %v8122_v24 = vld [vmem:[#allocation5 + $0x14c] sm:$0xf] }
  0x97   :  { %2300 = vmatpush.bf16.msra.mxu3 %v5916_v30  ;;  %2275 = vmatpush.bf16.msra.mxu1 %v6648_v38  ;;  %v8345_v30 = vld [vmem:[#allocation5 + $0x844] sm:$0xf]  ;;  %v6232_v38 = vor.u32 %v8281_v28, %v6229_v29  ;;  %v6427_v52 = vld [vmem:[#allocation5 + $0x7c8] sm:$0xf] }
  0x98   :  { %v6485_v32 = vld [vmem:[#allocation5 + $0x860] sm:$0xf0]  ;;  %v8334_v54 = vld [vmem:[#allocation5 + $0x7e4] sm:$0xf0] }
  0x99   :  { %2262 = vmatpush.bf16.msra.mxu0 %v6392_v37  ;;  %2288 = vmatpush.bf16.msra.mxu2 %v5628_v39  ;;  %v8158_v37 = vld [vmem:[#allocation5 + $0x264] sm:$0xf0]  ;;  %v8273_v39 = vld [vmem:[#allocation5 + $0x604] sm:$0xf]  ;;  %v6488_v41 = vor.u32 %v8345_v30, %v6485_v32 }
  0x9a   :  { %v6197_v40 = vld [vmem:[#allocation5 + $0x620] sm:$0xf0]  ;;  %v5724_v46 = vor.u32 %v8158_v37, %v5723_v36  ;;  %v8398_v56 = vld [vmem:[#allocation5 + $0x9e4] sm:$0xf0]  ;;  %v8114_v37 = vld [vmem:[#allocation5 + $0x10c] sm:$0xf] }
  0x9b   :  { %2301 = vmatpush.bf16.msra.mxu3 %v5884_v43  ;;  %2276 = vmatpush.bf16.msra.mxu1 %v6616_v50  ;;  %v8337_v43 = vld [vmem:[#allocation5 + $0x804] sm:$0xf]  ;;  %v6171_v50 = vld [vmem:[#allocation5 + $0x5c8] sm:$0xf]  ;;  %v6200_v53 = vor.u32 %v8273_v39, %v6197_v40 }
  0x9c   :  { %v6453_v44 = vld [vmem:[#allocation5 + $0x820] sm:$0xf0]  ;;  %v6139_v1 = vld [vmem:[#allocation5 + $0x588] sm:$0xf] }
  0x9d   :  { %2263 = vmatpush.bf16.msra.mxu0 %v6360_v49  ;;  %2289 = vmatpush.bf16.msra.mxu2 %v5596_v51  ;;  %v8150_v49 = vld [vmem:[#allocation5 + $0x224] sm:$0xf0]  ;;  %v6456_v57 = vor.u32 %v8337_v43, %v6453_v44 }
  0x9e   :  { %v8270_v51 = vld [vmem:[#allocation5 + $0x5e4] sm:$0xf0] }
  0x9f   :  { %2302 = vmatpush.bf16.msra.mxu3 %v5852_v55  ;;  %2277 = vmatpush.bf16.msra.mxu1 %v6584_v62  ;;  %v6683_v55 = vld [vmem:[#allocation5 + $0x9c8] sm:$0xf]  ;;  %v6172_v62 = vor.u32 %v8270_v51, %v6171_v50  ;;  %v5533_v50 = vld [vmem:[#allocation5 + $0xe8] sm:$0xf0] }
  0xa0   :  { %v6684_v0 = vor.u32 %v8398_v56, %v6683_v55  ;;  %v8262_v2 = vld [vmem:[#allocation5 + $0x5a4] sm:$0xf0] }
  0xa1   :  { %2264 = vmatpush.bf16.msra.mxu0 %v6328_v61  ;;  %2290 = vmatpush.bf16.msra.mxu2 %v5564_v63  ;;  %v5692_v61 = vor.u32 %v8150_v49, %v5691_v48  ;;  %v6428_v63 = vor.u32 %v8334_v54, %v6427_v52  ;;  %v8326_v5 = vld [vmem:[#allocation5 + $0x7a4] sm:$0xf0]  ;;  %v6140_v10 = vor.u32 %v8262_v2, %v6139_v1  ;;  %v8106_v49 = vld [vmem:[#allocation5 + $0xcc] sm:$0xf] }
  0xa2   :  { %v6651_v6 = vld [vmem:[#allocation5 + $0x988] sm:$0xf] }
  0xa3   :  { %2303 = vmatpush.bf16.msra.mxu3 %v5820_v3  ;;  %2278 = vmatpush.bf16.msra.mxu1 %v6552_v11  ;;  %v6395_v3 = vld [vmem:[#allocation5 + $0x788] sm:$0xf] }
  0xa4   :  { %v8390_v7 = vld [vmem:[#allocation5 + $0x9a4] sm:$0xf0]  ;;  %v6396_v11 = vor.u32 %v8326_v5, %v6395_v3 }
  0xa5   :  { %2265 = vmatpush.bf16.msra.mxu0 %v6296_v9  ;;  %2291 = vmatpush.bf16.msra.mxu2 %v5532_v12  ;;  %v5629_v9 = vld [vmem:[#allocation5 + $0x1a8] sm:$0xf0]  ;;  %v6652_v12 = vor.u32 %v8390_v7, %v6651_v6  ;;  %v6107_v13 = vld [vmem:[#allocation5 + $0x548] sm:$0xf] }
  0xa6   :  { %v8254_v14 = vld [vmem:[#allocation5 + $0x564] sm:$0xf0] }
  0xa7   :  { %2304 = vmatpush.bf16.msra.mxu3 %v5788_v16  ;;  %2279 = vmatpush.bf16.msra.mxu1 %v6520_v26  ;;  %v6363_v15 = vld [vmem:[#allocation5 + $0x748] sm:$0xf]  ;;  %v5632_v16 = vor.u32 %v8130_v8, %v5629_v9  ;;  %v6108_v26 = vor.u32 %v8254_v14, %v6107_v13  ;;  %v8090_v9 = vld [vmem:[#allocation5 + $0x4c] sm:$0xf] }
  0xa8   :  { %v8318_v17 = vld [vmem:[#allocation5 + $0x764] sm:$0xf0] }
  0xa9   :  { %2266 = vmatpush.bf16.msra.mxu0 %v6264_v25  ;;  %2292 = vmatpush.bf16.msra.mxu2 %v5500_v27  ;;  %v6619_v21 = vld [vmem:[#allocation5 + $0x948] sm:$0xf]  ;;  %v5597_v25 = vld [vmem:[#allocation5 + $0x168] sm:$0xf0]  ;;  %v6364_v27 = vor.u32 %v8318_v17, %v6363_v15 }
  0xaa   :  { %v8382_v23 = vld [vmem:[#allocation5 + $0x964] sm:$0xf0]  ;;  %v5600_v32 = vor.u32 %v8122_v24, %v5597_v25  ;;  %v8082_v25 = vld [vmem:[#allocation5 + $0xc] sm:$0xf] }
  0xab   :  { %2305 = vmatpush.bf16.msra.mxu3 %v5756_v31  ;;  %2280 = vmatpush.bf16.msra.mxu1 %v6488_v41  ;;  %v6620_v28 = vor.u32 %v8382_v23, %v6619_v21  ;;  %v6075_v29 = vld [vmem:[#allocation5 + $0x508] sm:$0xf] }
  0xac   :  { %v8246_v30 = vld [vmem:[#allocation5 + $0x524] sm:$0xf0] }
  0xad   :  { %2267 = vmatpush.bf16.msra.mxu0 %v6232_v38  ;;  %2293 = vmatpush.bf16.msra.mxu2 %v5468_v42  ;;  %v6331_v31 = vld [vmem:[#allocation5 + $0x708] sm:$0xf]  ;;  %v5565_v38 = vld [vmem:[#allocation5 + $0x128] sm:$0xf0]  ;;  %v6076_v39 = vor.u32 %v8246_v30, %v6075_v29 }
  0xae   :  { %v8310_v33 = vld [vmem:[#allocation5 + $0x724] sm:$0xf0]  ;;  %v5568_v45 = vor.u32 %v8114_v37, %v5565_v38  ;;  %v8266_v29 = vld [vmem:[#allocation5 + $0x5cc] sm:$0xf] }
  0xaf   :  { %2306 = vmatpush.bf16.msra.mxu3 %v5724_v46  ;;  %2281 = vmatpush.bf16.msra.mxu1 %v6456_v57  ;;  %v6587_v35 = vld [vmem:[#allocation5 + $0x908] sm:$0xf]  ;;  %v6332_v40 = vor.u32 %v8310_v33, %v6331_v31  ;;  %v5536_v57 = vor.u32 %v8106_v49, %v5533_v50  ;;  %v6173_v31 = vld [vmem:[#allocation5 + $0x5e8] sm:$0xf0] }
  0xb0   :  { %v8374_v36 = vld [vmem:[#allocation5 + $0x924] sm:$0xf0]  ;;  %v6429_v33 = vld [vmem:[#allocation5 + $0x7e8] sm:$0xf0] }
  0xb1   :  { %2268 = vmatpush.bf16.msra.mxu0 %v6200_v53  ;;  %2294 = vmatpush.bf16.msra.mxu2 %v5436_v58  ;;  %v6588_v41 = vor.u32 %v8374_v36, %v6587_v35  ;;  %v6043_v42 = vld [vmem:[#allocation5 + $0x4c8] sm:$0xf]  ;;  %v8394_v37 = vld [vmem:[#allocation5 + $0x9cc] sm:$0xf] }
  0xb2   :  { %2282 = vmatmul.bf16.vlgmr.msra.gmra.mxu1 %v9227_v34  ;;  %v8238_v43 = vld [vmem:[#allocation5 + $0x4e4] sm:$0xf0]  ;;  %v6685_v38 = vld [vmem:[#allocation5 + $0x9e8] sm:$0xf0] }
  0xb3   :  { %2307 = vmatpush.bf16.msra.mxu3 %v5692_v61  ;;  %2326 = vmatpush.bf16.msrb.mxu1 %v6428_v63  ;;  %v6299_v44 = vld [vmem:[#allocation5 + $0x6c8] sm:$0xf]  ;;  %v6044_v51 = vor.u32 %v8238_v43, %v6043_v42  ;;  %v8098_v61 = vld [vmem:[#allocation5 + $0x8c] sm:$0xf] }
  0xb4   :  { %2269 = vmatmul.bf16.vlgmr.msra.gmra.mxu0 %v9219_v20  ;;  %2295 = vmatmul.bf16.vlgmr.msra.gmra.mxu2 %v9217_v19  ;;  %v8302_v46 = vld [vmem:[#allocation5 + $0x6e4] sm:$0xf0]  ;;  %v8194_v43 = vld [vmem:[#allocation5 + $0x38c] sm:$0xf] }
  0xb5   :  { %2313 = vmatpush.bf16.msrb.mxu0 %v6172_v62  ;;  %2339 = vmatpush.bf16.msrb.mxu2 %v6684_v0  ;;  %v6555_v47 = vld [vmem:[#allocation5 + $0x8c8] sm:$0xf]  ;;  %v6300_v52 = vor.u32 %v8302_v46, %v6299_v44  ;;  %v5501_v62 = vld [vmem:[#allocation5 + $0xa8] sm:$0xf0]  ;;  %v6688_v46 = vor.u32 %v8394_v37, %v6685_v38 }
  0xb6   :  { %2308 = vmatmul.bf16.vlgmr.msra.gmra.mxu3 %v9221_v22  ;;  %v8366_v48 = vld [vmem:[#allocation5 + $0x8e4] sm:$0xf0]  ;;  %v5504_v5 = vor.u32 %v8098_v61, %v5501_v62  ;;  %v5885_v44 = vld [vmem:[#allocation5 + $0x3a8] sm:$0xf0] }
  0xb7   :  { %2352 = vmatpush.bf16.msrb.mxu3 %v5664_v4  ;;  %2327 = vmatpush.bf16.msrb.mxu1 %v6396_v11  ;;  %v6556_v53 = vor.u32 %v8366_v48, %v6555_v47  ;;  %v6011_v54 = vld [vmem:[#allocation5 + $0x488] sm:$0xf]  ;;  %v6141_v47 = vld [vmem:[#allocation5 + $0x5a8] sm:$0xf0] }
  0xb8   :  { %v8230_v55 = vld [vmem:[#allocation5 + $0x4a4] sm:$0xf0]  ;;  %v8322_v48 = vld [vmem:[#allocation5 + $0x78c] sm:$0xf] }
  0xb9   :  { %2314 = vmatpush.bf16.msrb.mxu0 %v6140_v10  ;;  %2340 = vmatpush.bf16.msrb.mxu2 %v6652_v12  ;;  %v6267_v56 = vld [vmem:[#allocation5 + $0x688] sm:$0xf]  ;;  %v6012_v63 = vor.u32 %v8230_v55, %v6011_v54  ;;  %v5469_v10 = vld [vmem:[#allocation5 + $0x68] sm:$0xf0] }
  0xba   :  { %v8294_v58 = vld [vmem:[#allocation5 + $0x6a4] sm:$0xf0]  ;;  %v5472_v23 = vor.u32 %v8090_v9, %v5469_v10  ;;  %v6397_v49 = vld [vmem:[#allocation5 + $0x7a8] sm:$0xf0] }
  0xbb   :  { %2353 = vmatpush.bf16.msrb.mxu3 %v5632_v16  ;;  %2328 = vmatpush.bf16.msrb.mxu1 %v6364_v27  ;;  %v6523_v59 = vld [vmem:[#allocation5 + $0x888] sm:$0xf]  ;;  %v6268_v0 = vor.u32 %v8294_v58, %v6267_v56  ;;  %v8202_v27 = vld [vmem:[#allocation5 + $0x3cc] sm:$0xf]  ;;  %v6400_v54 = vor.u32 %v8322_v48, %v6397_v49 }
  0xbc   :  { %v8358_v60 = vld [vmem:[#allocation5 + $0x8a4] sm:$0xf0]  ;;  %v8386_v50 = vld [vmem:[#allocation5 + $0x98c] sm:$0xf] }
  0xbd   :  { %2315 = vmatpush.bf16.msrb.mxu0 %v6108_v26  ;;  %2341 = vmatpush.bf16.msrb.mxu2 %v6620_v28  ;;  %v6524_v1 = vor.u32 %v8358_v60, %v6523_v59  ;;  %v5979_v2 = vld [vmem:[#allocation5 + $0x448] sm:$0xf]  ;;  %v5437_v26 = vld [vmem:[#allocation5 + $0x28] sm:$0xf0] }
  0xbe   :  { %v8222_v3 = vld [vmem:[#allocation5 + $0x464] sm:$0xf0]  ;;  %v5917_v28 = vld [vmem:[#allocation5 + $0x3e8] sm:$0xf0] }
  0xbf   :  { %2354 = vmatpush.bf16.msrb.mxu3 %v5600_v32  ;;  %2329 = vmatpush.bf16.msrb.mxu1 %v6332_v40  ;;  %v6235_v4 = vld [vmem:[#allocation5 + $0x648] sm:$0xf]  ;;  %v5980_v11 = vor.u32 %v8222_v3, %v5979_v2  ;;  %v8330_v32 = vld [vmem:[#allocation5 + $0x7cc] sm:$0xf]  ;;  %v5920_v40 = vor.u32 %v8202_v27, %v5917_v28 }
  0xc0   :  { %v8286_v6 = vld [vmem:[#allocation5 + $0x664] sm:$0xf0]  ;;  %v6432_v42 = vor.u32 %v8330_v32, %v6429_v33  ;;  %v8186_v55 = vld [vmem:[#allocation5 + $0x34c] sm:$0xf] }
  0xc1   :  { %2316 = vmatpush.bf16.msrb.mxu0 %v6076_v39  ;;  %2342 = vmatpush.bf16.msrb.mxu2 %v6588_v41  ;;  %v6491_v7 = vld [vmem:[#allocation5 + $0x848] sm:$0xf]  ;;  %v6236_v14 = vor.u32 %v8286_v6, %v6235_v4  ;;  %v5440_v39 = vor.u32 %v8082_v25, %v5437_v26  ;;  %v6176_v41 = vor.u32 %v8266_v29, %v6173_v31  ;;  %v5853_v56 = vld [vmem:[#allocation5 + $0x368] sm:$0xf0] }
  0xc2   :  { %v8350_v8 = vld [vmem:[#allocation5 + $0x864] sm:$0xf0]  ;;  %v6109_v59 = vld [vmem:[#allocation5 + $0x568] sm:$0xf0] }
  0xc3   :  { %2355 = vmatpush.bf16.msrb.mxu3 %v5568_v45  ;;  %2330 = vmatpush.bf16.msrb.mxu1 %v6300_v52  ;;  %v5947_v12 = vld [vmem:[#allocation5 + $0x408] sm:$0xf]  ;;  %v6492_v15 = vor.u32 %v8350_v8, %v6491_v7  ;;  %v8258_v45 = vld [vmem:[#allocation5 + $0x58c] sm:$0xf]  ;;  %v5888_v52 = vor.u32 %v8194_v43, %v5885_v44 }
  0xc4   :  { %v8214_v13 = vld [vmem:[#allocation5 + $0x424] sm:$0xf0]  ;;  %v8314_v60 = vld [vmem:[#allocation5 + $0x74c] sm:$0xf] }
  0xc5   :  { %2317 = vmatpush.bf16.msrb.mxu0 %v6044_v51  ;;  %2343 = vmatpush.bf16.msrb.mxu2 %v6556_v53  ;;  %v6203_v16 = vld [vmem:[#allocation5 + $0x608] sm:$0xf]  ;;  %v5948_v30 = vor.u32 %v8214_v13, %v5947_v12  ;;  %v6653_v51 = vld [vmem:[#allocation5 + $0x9a8] sm:$0xf0]  ;;  %v6144_v53 = vor.u32 %v8258_v45, %v6141_v47 }
  0xc6   :  { %v8278_v17 = vld [vmem:[#allocation5 + $0x624] sm:$0xf0]  ;;  %v6656_v58 = vor.u32 %v8386_v50, %v6653_v51  ;;  %v6365_v61 = vld [vmem:[#allocation5 + $0x768] sm:$0xf0] }
  0xc7   :  { %2356 = vmatpush.bf16.msrb.mxu3 %v5536_v57  ;;  %2331 = vmatpush.bf16.msrb.mxu1 %v6268_v0  ;;  %v6459_v21 = vld [vmem:[#allocation5 + $0x808] sm:$0xf]  ;;  %v6204_v35 = vor.u32 %v8278_v17, %v6203_v16  ;;  %v8250_v57 = vld [vmem:[#allocation5 + $0x54c] sm:$0xf]  ;;  %v5856_v0 = vor.u32 %v8186_v55, %v5853_v56  ;;  %v6368_v2 = vor.u32 %v8314_v60, %v6365_v61 }
  0xc8   :  { %v8342_v24 = vld [vmem:[#allocation5 + $0x824] sm:$0xf0]  ;;  %v8378_v62 = vld [vmem:[#allocation5 + $0x94c] sm:$0xf] }
  0xc9   :  { %2318 = vmatpush.bf16.msrb.mxu0 %v6012_v63  ;;  %2344 = vmatpush.bf16.msrb.mxu2 %v6524_v1  ;;  %v6460_v36 = vor.u32 %v8342_v24, %v6459_v21  ;;  %v6621_v63 = vld [vmem:[#allocation5 + $0x968] sm:$0xf0]  ;;  %v6112_v1 = vor.u32 %v8250_v57, %v6109_v59 }
  0xca   :  { %v8178_v3 = vld [vmem:[#allocation5 + $0x30c] sm:$0xf]  ;;  %v6624_v6 = vor.u32 %v8378_v62, %v6621_v63 }
  0xcb   :  { %2357 = vmatpush.bf16.msrb.mxu3 %v5504_v5  ;;  %2332 = vmatpush.bf16.msrb.mxu1 %v6236_v14  ;;  %v5821_v4 = vld [vmem:[#allocation5 + $0x328] sm:$0xf0] }
  0xcc   :  { %v8242_v5 = vld [vmem:[#allocation5 + $0x50c] sm:$0xf]  ;;  %v5824_v12 = vor.u32 %v8178_v3, %v5821_v4  ;;  %v5923_v3 = vld [vmem:[#allocation5 + $0x3d0] sm:$0xf] }
  0xcd   :  { %2319 = vmatpush.bf16.msrb.mxu0 %v5980_v11  ;;  %2345 = vmatpush.bf16.msrb.mxu2 %v6492_v15  ;;  %v6077_v7 = vld [vmem:[#allocation5 + $0x528] sm:$0xf0] }
  0xce   :  { %v8306_v8 = vld [vmem:[#allocation5 + $0x70c] sm:$0xf]  ;;  %v6080_v13 = vor.u32 %v8242_v5, %v6077_v7  ;;  %v8207_v5 = vld [vmem:[#allocation5 + $0x3ec] sm:$0xf0] }
  0xcf   :  { %2358 = vmatpush.bf16.msrb.mxu3 %v5472_v23  ;;  %2333 = vmatpush.bf16.msrb.mxu1 %v6204_v35  ;;  %v6333_v9 = vld [vmem:[#allocation5 + $0x728] sm:$0xf0]  ;;  %v8271_v7 = vld [vmem:[#allocation5 + $0x5ec] sm:$0xf0] }
  0xd0   :  { %v8370_v10 = vld [vmem:[#allocation5 + $0x90c] sm:$0xf]  ;;  %v6336_v14 = vor.u32 %v8306_v8, %v6333_v9 }
  0xd1   :  { %2320 = vmatpush.bf16.msrb.mxu0 %v5948_v30  ;;  %2346 = vmatpush.bf16.msrb.mxu2 %v6460_v36  ;;  %v6589_v11 = vld [vmem:[#allocation5 + $0x928] sm:$0xf0] }
  0xd2   :  { %2334 = vmatmul.bf16.vlgmr.msrb.gmra.mxu1 %v9219_v20  ;;  %v8170_v15 = vld [vmem:[#allocation5 + $0x2cc] sm:$0xf]  ;;  %v6592_v21 = vor.u32 %v8370_v10, %v6589_v11  ;;  %v6435_v10 = vld [vmem:[#allocation5 + $0x7d0] sm:$0xf] }
  0xd3   :  { %2359 = vmatpush.bf16.msrb.mxu3 %v5440_v39  ;;  %2378 = vmatpush.bf16.msra.mxu1 %v6176_v41  ;;  %v5789_v16 = vld [vmem:[#allocation5 + $0x2e8] sm:$0xf0]  ;;  %v8335_v11 = vld [vmem:[#allocation5 + $0x7ec] sm:$0xf0] }
  0xd4   :  { %2347 = vmatmul.bf16.vlgmr.msrb.gmra.mxu2 %v9227_v34  ;;  %2321 = vmatmul.bf16.vlgmr.msrb.gmra.mxu0 %v9215_v18  ;;  %v8234_v17 = vld [vmem:[#allocation5 + $0x4cc] sm:$0xf]  ;;  %v5792_v28 = vor.u32 %v8170_v15, %v5789_v16  ;;  %v5635_v16 = vld [vmem:[#allocation5 + $0x190] sm:$0xf] }
  0xd5   :  { %2365 = vmatpush.bf16.msra.mxu0 %v5920_v40  ;;  %2391 = vmatpush.bf16.msra.mxu2 %v6432_v42  ;;  %v6045_v23 = vld [vmem:[#allocation5 + $0x4e8] sm:$0xf0] }
  0xd6   :  { %2360 = vmatmul.bf16.vlgmr.msrb.gmra.mxu3 %v9217_v19  ;;  %v8298_v24 = vld [vmem:[#allocation5 + $0x6cc] sm:$0xf]  ;;  %v6048_v29 = vor.u32 %v8234_v17, %v6045_v23  ;;  %v8135_v17 = vld [vmem:[#allocation5 + $0x1ac] sm:$0xf0]  ;;  %v6436_v23 = vor.u32 %v8335_v11, %v6435_v10 }
  0xd7   :  { %2404 = vmatpush.bf16.msra.mxu3 %v6688_v46  ;;  %2379 = vmatpush.bf16.msra.mxu1 %v6144_v53  ;;  %v6301_v25 = vld [vmem:[#allocation5 + $0x6e8] sm:$0xf0]  ;;  %v8167_v11 = vld [vmem:[#allocation5 + $0x2ac] sm:$0xf0] }
  0xd8   :  { %v8362_v26 = vld [vmem:[#allocation5 + $0x8cc] sm:$0xf]  ;;  %v6304_v30 = vor.u32 %v8298_v24, %v6301_v25  ;;  %v8199_v24 = vld [vmem:[#allocation5 + $0x3ac] sm:$0xf0] }
  0xd9   :  { %2366 = vmatpush.bf16.msra.mxu0 %v5888_v52  ;;  %2392 = vmatpush.bf16.msra.mxu2 %v6400_v54  ;;  %v6557_v27 = vld [vmem:[#allocation5 + $0x8e8] sm:$0xf0]  ;;  %v6147_v25 = vld [vmem:[#allocation5 + $0x590] sm:$0xf] }
  0xda   :  { %v8162_v31 = vld [vmem:[#allocation5 + $0x28c] sm:$0xf]  ;;  %v6560_v35 = vor.u32 %v8362_v26, %v6557_v27  ;;  %v8263_v26 = vld [vmem:[#allocation5 + $0x5ac] sm:$0xf0] }
  0xdb   :  { %2405 = vmatpush.bf16.msra.mxu3 %v6656_v58  ;;  %2380 = vmatpush.bf16.msra.mxu1 %v6112_v1  ;;  %v5757_v32 = vld [vmem:[#allocation5 + $0x2a8] sm:$0xf0]  ;;  %v5667_v1 = vld [vmem:[#allocation5 + $0x1d0] sm:$0xf] }
  0xdc   :  { %v8226_v33 = vld [vmem:[#allocation5 + $0x48c] sm:$0xf]  ;;  %v5760_v41 = vor.u32 %v8162_v31, %v5757_v32  ;;  %v6403_v27 = vld [vmem:[#allocation5 + $0x790] sm:$0xf]  ;;  %v6148_v31 = vor.u32 %v8263_v26, %v6147_v25 }
  0xdd   :  { %2367 = vmatpush.bf16.msra.mxu0 %v5856_v0  ;;  %2393 = vmatpush.bf16.msra.mxu2 %v6368_v2  ;;  %v6013_v36 = vld [vmem:[#allocation5 + $0x4a8] sm:$0xf0]  ;;  %v8143_v2 = vld [vmem:[#allocation5 + $0x1ec] sm:$0xf0] }
  0xde   :  { %v8290_v37 = vld [vmem:[#allocation5 + $0x68c] sm:$0xf]  ;;  %v6016_v42 = vor.u32 %v8226_v33, %v6013_v36  ;;  %v5603_v32 = vld [vmem:[#allocation5 + $0x150] sm:$0xf] }
  0xdf   :  { %2406 = vmatpush.bf16.msra.mxu3 %v6624_v6  ;;  %2381 = vmatpush.bf16.msra.mxu1 %v6080_v13  ;;  %v6269_v38 = vld [vmem:[#allocation5 + $0x6a8] sm:$0xf0]  ;;  %v6179_v6 = vld [vmem:[#allocation5 + $0x5d0] sm:$0xf]  ;;  %v5668_v13 = vor.u32 %v8143_v2, %v5667_v1 }
  0xe0   :  { %v8354_v39 = vld [vmem:[#allocation5 + $0x88c] sm:$0xf]  ;;  %v6272_v43 = vor.u32 %v8290_v37, %v6269_v38  ;;  %v6180_v15 = vor.u32 %v8271_v7, %v6179_v6  ;;  %v8127_v33 = vld [vmem:[#allocation5 + $0x16c] sm:$0xf0] }
  0xe1   :  { %2368 = vmatpush.bf16.msra.mxu0 %v5824_v12  ;;  %2394 = vmatpush.bf16.msra.mxu2 %v6336_v14  ;;  %v6525_v40 = vld [vmem:[#allocation5 + $0x8a8] sm:$0xf0]  ;;  %v5924_v14 = vor.u32 %v8207_v5, %v5923_v3  ;;  %v8191_v37 = vld [vmem:[#allocation5 + $0x36c] sm:$0xf0] }
  0xe2   :  { %v8154_v44 = vld [vmem:[#allocation5 + $0x24c] sm:$0xf]  ;;  %v6528_v47 = vor.u32 %v8354_v39, %v6525_v40  ;;  %v6115_v38 = vld [vmem:[#allocation5 + $0x550] sm:$0xf] }
  0xe3   :  { %2407 = vmatpush.bf16.msra.mxu3 %v6592_v21  ;;  %2382 = vmatpush.bf16.msra.mxu1 %v6048_v29  ;;  %v5725_v45 = vld [vmem:[#allocation5 + $0x268] sm:$0xf0]  ;;  %v5891_v21 = vld [vmem:[#allocation5 + $0x390] sm:$0xf]  ;;  %v5636_v29 = vor.u32 %v8135_v17, %v5635_v16 }
  0xe4   :  { %v8218_v46 = vld [vmem:[#allocation5 + $0x44c] sm:$0xf]  ;;  %v5728_v53 = vor.u32 %v8154_v44, %v5725_v45  ;;  %v8255_v39 = vld [vmem:[#allocation5 + $0x56c] sm:$0xf0] }
  0xe5   :  { %2369 = vmatpush.bf16.msra.mxu0 %v5792_v28  ;;  %2395 = vmatpush.bf16.msra.mxu2 %v6304_v30  ;;  %v5981_v48 = vld [vmem:[#allocation5 + $0x468] sm:$0xf0]  ;;  %v8327_v28 = vld [vmem:[#allocation5 + $0x7ac] sm:$0xf0]  ;;  %v5892_v30 = vor.u32 %v8199_v24, %v5891_v21  ;;  %v6116_v44 = vor.u32 %v8255_v39, %v6115_v38 }
  0xe6   :  { %v8282_v49 = vld [vmem:[#allocation5 + $0x64c] sm:$0xf]  ;;  %v5984_v56 = vor.u32 %v8218_v46, %v5981_v48  ;;  %v6404_v36 = vor.u32 %v8327_v28, %v6403_v27  ;;  %v6371_v40 = vld [vmem:[#allocation5 + $0x750] sm:$0xf] }
  0xe7   :  { %2408 = vmatpush.bf16.msra.mxu3 %v6560_v35  ;;  %v6237_v50 = vld [vmem:[#allocation5 + $0x668] sm:$0xf0]  ;;  %2383 = vmatpush.bf16.msra.mxu1 %v6016_v42  ;;  %v5859_v35 = vld [vmem:[#allocation5 + $0x350] sm:$0xf]  ;;  %v5604_v42 = vor.u32 %v8127_v33, %v5603_v32 }
  0xe8   :  { %v8346_v51 = vld [vmem:[#allocation5 + $0x84c] sm:$0xf]  ;;  %v6240_v57 = vor.u32 %v8282_v49, %v6237_v50  ;;  %v5571_v45 = vld [vmem:[#allocation5 + $0x110] sm:$0xf] }
  0xe9   :  { %v6493_v52 = vld [vmem:[#allocation5 + $0x868] sm:$0xf0]  ;;  %2370 = vmatpush.bf16.msra.mxu0 %v5760_v41  ;;  %2396 = vmatpush.bf16.msra.mxu2 %v6272_v43  ;;  %v8319_v41 = vld [vmem:[#allocation5 + $0x76c] sm:$0xf0]  ;;  %v5860_v43 = vor.u32 %v8191_v37, %v5859_v35 }
  0xea   :  { %v8146_v54 = vld [vmem:[#allocation5 + $0x20c] sm:$0xf]  ;;  %v6496_v61 = vor.u32 %v8346_v51, %v6493_v52  ;;  %v8119_v46 = vld [vmem:[#allocation5 + $0x12c] sm:$0xf0]  ;;  %v6372_v48 = vor.u32 %v8319_v41, %v6371_v40 }
  0xeb   :  { %v5693_v55 = vld [vmem:[#allocation5 + $0x228] sm:$0xf0]  ;;  %2409 = vmatpush.bf16.msra.mxu3 %v6528_v47  ;;  %2384 = vmatpush.bf16.msra.mxu1 %v5984_v56  ;;  %v5827_v47 = vld [vmem:[#allocation5 + $0x310] sm:$0xf] }
  0xec   :  { %v8210_v58 = vld [vmem:[#allocation5 + $0x40c] sm:$0xf]  ;;  %v5696_v4 = vor.u32 %v8146_v54, %v5693_v55  ;;  %v8183_v49 = vld [vmem:[#allocation5 + $0x32c] sm:$0xf0]  ;;  %v5572_v54 = vor.u32 %v8119_v46, %v5571_v45 }
  0xed   :  { %v5949_v59 = vld [vmem:[#allocation5 + $0x428] sm:$0xf0]  ;;  %2371 = vmatpush.bf16.msra.mxu0 %v5728_v53  ;;  %2397 = vmatpush.bf16.msra.mxu2 %v6240_v57  ;;  %v6083_v50 = vld [vmem:[#allocation5 + $0x510] sm:$0xf]  ;;  %v5828_v56 = vor.u32 %v8183_v49, %v5827_v47  ;;  %v2166_v17 = vpop.f32.mrf.mxu0 }
  0xee   :  { %v8274_v60 = vld [vmem:[#allocation5 + $0x60c] sm:$0xf]  ;;  %v5952_v8 = vor.u32 %v8210_v58, %v5949_v59  ;;  %v8247_v51 = vld [vmem:[#allocation5 + $0x52c] sm:$0xf0] }
  0xef   :  { %v6205_v62 = vld [vmem:[#allocation5 + $0x628] sm:$0xf0]  ;;  %2410 = vmatpush.bf16.msra.mxu3 %v6496_v61  ;;  %v6339_v52 = vld [vmem:[#allocation5 + $0x710] sm:$0xf]  ;;  %v6084_v57 = vor.u32 %v8247_v51, %v6083_v50  ;;  %v2179_v28 = vpop.f32.mrf.mxu1 }
  0xf0   :  { %v8338_v63 = vld [vmem:[#allocation5 + $0x80c] sm:$0xf]  ;;  %v6208_v9 = vor.u32 %v8274_v60, %v6205_v62  ;;  %2385 = vmatpush.bf16.msra.mxu1 %v5952_v8  ;;  %v8311_v53 = vld [vmem:[#allocation5 + $0x72c] sm:$0xf0] }
  0xf1   :  { %v6461_v0 = vld [vmem:[#allocation5 + $0x828] sm:$0xf0]  ;;  %2372 = vmatpush.bf16.msra.mxu0 %v5696_v4  ;;  %v5539_v55 = vld [vmem:[#allocation5 + $0xd0] sm:$0xf]  ;;  %v6340_v61 = vor.u32 %v8311_v53, %v6339_v52 }
  0xf2   :  { %v6464_v12 = vor.u32 %v8338_v63, %v6461_v0  ;;  %2398 = vmatpush.bf16.msra.mxu2 %v6208_v9  ;;  %v8111_v58 = vld [vmem:[#allocation5 + $0xec] sm:$0xf0]  ;;  %v9245_v0 = vld [vmem:[#allocation7] sm:$0xff] }
  0xf3   :  { %2386 = vmatmul.bf16.vlgmr.msra.gmra.mxu1 %v9215_v18  ;;  %v5795_v59 = vld [vmem:[#allocation5 + $0x2d0] sm:$0xf]  ;;  %v5540_v3 = vor.u32 %v8111_v58, %v5539_v55  ;;  %v523_v9 = vperm.slane %v9245_v0, 0  ;;  %v5925_v58 = vld [vmem:[#allocation5 + $0x3f0] sm:$0xf0] }
  0xf4   :  { %2411 = vmatpush.bf16.msra.mxu3 %v6464_v12  ;;  %2430 = vmatpush.bf16.msrb.mxu1 %v5924_v14  ;;  %v8175_v60 = vld [vmem:[#allocation5 + $0x2ec] sm:$0xf0] }
  0xf5   :  { %2417 = vmatpush.bf16.msrb.mxu0 %v5668_v13  ;;  %2399 = vmatmul.bf16.vlgmr.msra.gmra.mxu2 %v9219_v20  ;;  %v6051_v62 = vld [vmem:[#allocation5 + $0x4d0] sm:$0xf]  ;;  %v5796_v5 = vor.u32 %v8175_v60, %v5795_v59  ;;  %v2167_v27 = vadd.f32 %v2166_v17, %v523_v9  ;;  %v2168_v60 = vpop.f32.mrf.mxu0  ;;  %v8131_v9 = vld [vmem:[#allocation5 + $0x194] sm:$0xf] }
  0xf6   :  { %2443 = vmatpush.bf16.msrb.mxu2 %v6180_v15  ;;  %2373 = vmatmul.bf16.vlgmr.msra.gmra.mxu0 %v9221_v22  ;;  %v8239_v63 = vld [vmem:[#allocation5 + $0x4ec] sm:$0xf0]  ;;  %v8171_v60 = vld [vmem:[#allocation5 + $0x2d4] sm:$0xf] }
  0xf7   :  { %2412 = vmatmul.bf16.vlgmr.msra.gmra.mxu3 %v9227_v34  ;;  %v6307_v1 = vld [vmem:[#allocation5 + $0x6d0] sm:$0xf]  ;;  %v6052_v6 = vor.u32 %v8239_v63, %v6051_v62  ;;  %v2192_v45 = vpop.f32.mrf.mxu2  ;;  %v8267_v63 = vld [vmem:[#allocation5 + $0x5d4] sm:$0xf] }
  0xf8   :  { %2456 = vmatpush.bf16.msrb.mxu3 %v6436_v23  ;;  %2431 = vmatpush.bf16.msrb.mxu1 %v5892_v30  ;;  %v8303_v2 = vld [vmem:[#allocation5 + $0x6ec] sm:$0xf0] }
  0xf9   :  { %2418 = vmatpush.bf16.msrb.mxu0 %v5636_v29  ;;  %v5507_v4 = vld [vmem:[#allocation5 + $0x90] sm:$0xf]  ;;  %v6308_v10 = vor.u32 %v8303_v2, %v6307_v1  ;;  %v2205_v51 = vpop.f32.mrf.mxu3  ;;  %v6181_v1 = vld [vmem:[#allocation5 + $0x5f0] sm:$0xf0]  ;;  %v2181_v2 = vpop.f32.mrf.mxu1 }
  0xfa   :  { %2444 = vmatpush.bf16.msrb.mxu2 %v6148_v31  ;;  %v8103_v7 = vld [vmem:[#allocation5 + $0xac] sm:$0xf0] }
  0xfb   :  { %v5763_v8 = vld [vmem:[#allocation5 + $0x290] sm:$0xf]  ;;  %v5508_v16 = vor.u32 %v8103_v7, %v5507_v4 }
  0xfc   :  { %2457 = vmatpush.bf16.msrb.mxu3 %v6404_v36  ;;  %2432 = vmatpush.bf16.msrb.mxu1 %v5860_v43  ;;  %v6019_v12 = vld [vmem:[#allocation5 + $0x490] sm:$0xf]  ;;  %v5764_v21 = vor.u32 %v8167_v11, %v5763_v8  ;;  %v2180_v36 = vadd.f32 %v2179_v28, %v2167_v27  ;;  %v5637_v11 = vld [vmem:[#allocation5 + $0x1b0] sm:$0xf0] }
  0xfd   :  { %2419 = vmatpush.bf16.msrb.mxu0 %v5604_v42  ;;  %v8231_v13 = vld [vmem:[#allocation5 + $0x4ac] sm:$0xf0]  ;;  %v8123_v27 = vld [vmem:[#allocation5 + $0x154] sm:$0xf] }
  0xfe   :  { %2445 = vmatpush.bf16.msrb.mxu2 %v6116_v44  ;;  %v6275_v14 = vld [vmem:[#allocation5 + $0x690] sm:$0xf]  ;;  %v6020_v23 = vor.u32 %v8231_v13, %v6019_v12  ;;  %v2193_v50 = vadd.f32 %v2192_v45, %v2180_v36  ;;  %v8195_v12 = vld [vmem:[#allocation5 + $0x394] sm:$0xf] }
  0xff   :  { %v8295_v15 = vld [vmem:[#allocation5 + $0x6ac] sm:$0xf0]  ;;  %v5893_v13 = vld [vmem:[#allocation5 + $0x3b0] sm:$0xf0] }
 0x100   :  { %2458 = vmatpush.bf16.msrb.mxu3 %v6372_v48  ;;  %2433 = vmatpush.bf16.msrb.mxu1 %v5828_v56  ;;  %v5475_v24 = vld [vmem:[#allocation5 + $0x50] sm:$0xf]  ;;  %v6276_v29 = vor.u32 %v8295_v15, %v6275_v14  ;;  %v5669_v56 = vld [vmem:[#allocation5 + $0x1f0] sm:$0xf0]  ;;  %v9248_v59 = vadd.f32 %v2205_v51, %v2193_v50 }
 0x101   :  { %2420 = vmatpush.bf16.msrb.mxu0 %v5572_v54  ;;  %v8095_v25 = vld [vmem:[#allocation5 + $0x6c] sm:$0xf0]  ;;  %v8139_v54 = vld [vmem:[#allocation5 + $0x1d4] sm:$0xf] }
 0x102   :  { %2446 = vmatpush.bf16.msrb.mxu2 %v6084_v57  ;;  %v5731_v26 = vld [vmem:[#allocation5 + $0x250] sm:$0xf]  ;;  %v5476_v37 = vor.u32 %v8095_v25, %v5475_v24  ;;  %v8203_v57 = vld [vmem:[#allocation5 + $0x3d4] sm:$0xf]  ;;  %v5896_v24 = vor.u32 %v8195_v12, %v5893_v13 }
 0x103   :  { %v8159_v30 = vld [vmem:[#allocation5 + $0x26c] sm:$0xf0]  ;;  %v8259_v14 = vld [vmem:[#allocation5 + $0x594] sm:$0xf] }
 0x104   :  { %2459 = vmatpush.bf16.msrb.mxu3 %v6340_v61  ;;  %2434 = vmatpush.bf16.msrb.mxu1 %v5796_v5  ;;  %v5987_v31 = vld [vmem:[#allocation5 + $0x450] sm:$0xf]  ;;  %v5732_v40 = vor.u32 %v8159_v30, %v5731_v26  ;;  %v5672_v5 = vor.u32 %v8139_v54, %v5669_v56  ;;  %v6149_v15 = vld [vmem:[#allocation5 + $0x5b0] sm:$0xf0] }
 0x105   :  { %2421 = vmatpush.bf16.msrb.mxu0 %v5540_v3  ;;  %v8223_v32 = vld [vmem:[#allocation5 + $0x46c] sm:$0xf0]  ;;  %v6152_v28 = vor.u32 %v8259_v14, %v6149_v15  ;;  %v8187_v30 = vld [vmem:[#allocation5 + $0x354] sm:$0xf] }
 0x106   :  { %2447 = vmatpush.bf16.msrb.mxu2 %v6052_v6  ;;  %v6243_v33 = vld [vmem:[#allocation5 + $0x650] sm:$0xf]  ;;  %v5988_v41 = vor.u32 %v8223_v32, %v5987_v31  ;;  %v5928_v6 = vor.u32 %v8203_v57, %v5925_v58  ;;  %v5861_v31 = vld [vmem:[#allocation5 + $0x370] sm:$0xf0] }
 0x107   :  { %v8287_v35 = vld [vmem:[#allocation5 + $0x66c] sm:$0xf0]  ;;  %v8251_v32 = vld [vmem:[#allocation5 + $0x554] sm:$0xf] }
 0x108   :  { %2460 = vmatpush.bf16.msrb.mxu3 %v6308_v10  ;;  %v5443_v38 = vld [vmem:[#allocation5 + $0x10] sm:$0xf]  ;;  %2435 = vmatpush.bf16.msrb.mxu1 %v5764_v21  ;;  %v6244_v46 = vor.u32 %v8287_v35, %v6243_v33  ;;  %v6184_v10 = vor.u32 %v8267_v63, %v6181_v1  ;;  %v2207_v21 = vpop.f32.mrf.mxu3  ;;  %v6117_v33 = vld [vmem:[#allocation5 + $0x570] sm:$0xf0] }
 0x109   :  { %2422 = vmatpush.bf16.msrb.mxu0 %v5508_v16  ;;  %v8087_v39 = vld [vmem:[#allocation5 + $0x2c] sm:$0xf0]  ;;  %v2194_v16 = vpop.f32.mrf.mxu2  ;;  %v8243_v45 = vld [vmem:[#allocation5 + $0x514] sm:$0xf] }
 0x10a   :  { %2448 = vmatpush.bf16.msrb.mxu2 %v6020_v23  ;;  %v5699_v42 = vld [vmem:[#allocation5 + $0x210] sm:$0xf]  ;;  %v5444_v55 = vor.u32 %v8087_v39, %v5443_v38  ;;  %v5640_v23 = vor.u32 %v8131_v9, %v5637_v11  ;;  %v5541_v58 = vld [vmem:[#allocation5 + $0xf0] sm:$0xf0] }
 0x10b   :  { %v8151_v43 = vld [vmem:[#allocation5 + $0x22c] sm:$0xf0]  ;;  %v6053_v63 = vld [vmem:[#allocation5 + $0x4f0] sm:$0xf0] }
 0x10c   :  { %v5955_v44 = vld [vmem:[#allocation5 + $0x410] sm:$0xf]  ;;  %2461 = vmatpush.bf16.msrb.mxu3 %v6276_v29  ;;  %2436 = vmatpush.bf16.msrb.mxu1 %v5732_v40  ;;  %v5700_v61 = vor.u32 %v8151_v43, %v5699_v42  ;;  %v5605_v29 = vld [vmem:[#allocation5 + $0x170] sm:$0xf0] }
 0x10d   :  { %v8215_v47 = vld [vmem:[#allocation5 + $0x42c] sm:$0xf0]  ;;  %2423 = vmatpush.bf16.msrb.mxu0 %v5476_v37  ;;  %v5608_v36 = vor.u32 %v8123_v27, %v5605_v29  ;;  %v5864_v37 = vor.u32 %v8187_v30, %v5861_v31  ;;  %v8115_v40 = vld [vmem:[#allocation5 + $0x114] sm:$0xf] }
 0x10e   :  { %v6211_v48 = vld [vmem:[#allocation5 + $0x610] sm:$0xf]  ;;  %2449 = vmatpush.bf16.msrb.mxu2 %v5988_v41  ;;  %v5956_v62 = vor.u32 %v8215_v47, %v5955_v44  ;;  %v6120_v41 = vor.u32 %v8251_v32, %v6117_v33  ;;  %v5573_v42 = vld [vmem:[#allocation5 + $0x130] sm:$0xf0] }
 0x10f   :  { %v8279_v49 = vld [vmem:[#allocation5 + $0x62c] sm:$0xf0]  ;;  %v8179_v43 = vld [vmem:[#allocation5 + $0x314] sm:$0xf]  ;;  %v5576_v51 = vor.u32 %v8115_v40, %v5573_v42  ;;  %v2231_v56 = vpop.f32.mrf.mxu1 }
 0x110   :  { %v6691_v52 = vld [vmem:[#allocation5 + $0x9d0] sm:$0xf]  ;;  %2462 = vmatpush.bf16.msrb.mxu3 %v6244_v46  ;;  %v6212_v3 = vor.u32 %v8279_v49, %v6211_v48  ;;  %2437 = vmatpush.bf16.msrb.mxu1 %v5700_v61  ;;  %v5829_v44 = vld [vmem:[#allocation5 + $0x330] sm:$0xf0]  ;;  %v524_v48 = vperm.slane %v9245_v0, 1 }
 0x111   :  { %v8399_v53 = vld [vmem:[#allocation5 + $0x9ec] sm:$0xf0]  ;;  %2424 = vmatpush.bf16.msrb.mxu0 %v5444_v55  ;;  %v6085_v46 = vld [vmem:[#allocation5 + $0x530] sm:$0xf0]  ;;  %v2218_v47 = vpop.f32.mrf.mxu0 }
 0x112   :  { %v6692_v4 = vor.u32 %v8399_v53, %v6691_v52  ;;  %v6659_v7 = vld [vmem:[#allocation5 + $0x990] sm:$0xf]  ;;  %2450 = vmatpush.bf16.msrb.mxu2 %v5956_v62  ;;  %v9256_v50 = vadd.f32 %v2218_v47, %v9248_v59  ;;  %v5832_v52 = vor.u32 %v8179_v43, %v5829_v44  ;;  %v8107_v55 = vld [vmem:[#allocation5 + $0xd4] sm:$0xf]  ;;  %v6088_v57 = vor.u32 %v8243_v45, %v6085_v46 }
 0x113   :  { %v8391_v8 = vld [vmem:[#allocation5 + $0x9ac] sm:$0xf0]  ;;  %2438 = vmatmul.bf16.vlgmr.msrb.gmra.mxu1 %v9221_v22  ;;  %v5797_v61 = vld [vmem:[#allocation5 + $0x2f0] sm:$0xf0]  ;;  %v2232_v1 = vadd.f32 %v2231_v56, %v524_v48  ;;  %v5544_v59 = vor.u32 %v8107_v55, %v5541_v58  ;;  %v5675_v56 = vld [vmem:[#allocation5 + $0x1d8] sm:$0xf] }
 0x114   :  { %2463 = vmatpush.bf16.msrb.mxu3 %v6212_v3  ;;  %v6660_v17 = vor.u32 %v8391_v8, %v6659_v7  ;;  %2482 = vmatpush.bf16.msra.mxu1 %v5672_v5  ;;  %v6627_v25 = vld [vmem:[#allocation5 + $0x950] sm:$0xf]  ;;  %v8235_v62 = vld [vmem:[#allocation5 + $0x4d4] sm:$0xf]  ;;  %v5800_v3 = vor.u32 %v8171_v60, %v5797_v61  ;;  %v5931_v61 = vld [vmem:[#allocation5 + $0x3d8] sm:$0xf]  ;;  %8767 = vtanh.f32 %v9256_v50 }
 0x115   :  { %2469 = vmatpush.bf16.msra.mxu0 %v6692_v4  ;;  %v8383_v26 = vld [vmem:[#allocation5 + $0x96c] sm:$0xf0]  ;;  %2451 = vmatmul.bf16.vlgmr.msrb.gmra.mxu2 %v9215_v18  ;;  %v6056_v7 = vor.u32 %v8235_v62, %v6053_v63  ;;  %v5509_v8 = vld [vmem:[#allocation5 + $0xb0] sm:$0xf0]  ;;  %v8208_v62 = vld [vmem:[#allocation5 + $0x3f4] sm:$0xf0] }
 0x116   :  { %2495 = vmatpush.bf16.msra.mxu2 %v5928_v6  ;;  %2425 = vmatmul.bf16.vlgmr.msrb.gmra.mxu0 %v9217_v19  ;;  %v6628_v35 = vor.u32 %v8383_v26, %v6627_v25  ;;  %v6595_v38 = vld [vmem:[#allocation5 + $0x910] sm:$0xf]  ;;  %v8099_v6 = vld [vmem:[#allocation5 + $0x94] sm:$0xf] }
 0x117   :  { %2464 = vmatmul.bf16.vlgmr.msrb.gmra.mxu3 %v9219_v20  ;;  %v8375_v39 = vld [vmem:[#allocation5 + $0x92c] sm:$0xf0]  ;;  %v8163_v9 = vld [vmem:[#allocation5 + $0x294] sm:$0xf]  ;;  %v2244_v11 = vpop.f32.mrf.mxu2  ;;  %v5512_v21 = vor.u32 %v8099_v6, %v5509_v8  ;;  %v5932_v6 = vor.u32 %v8208_v62, %v5931_v61  ;;  %v5643_v8 = vld [vmem:[#allocation5 + $0x198] sm:$0xf] }
 0x118   :  { %2508 = vmatpush.bf16.msra.mxu3 %v6184_v10  ;;  %2483 = vmatpush.bf16.msra.mxu1 %v5640_v23  ;;  %v6596_v49 = vor.u32 %v8375_v39, %v6595_v38  ;;  %v6563_v53 = vld [vmem:[#allocation5 + $0x8d0] sm:$0xf]  ;;  %v5765_v10 = vld [vmem:[#allocation5 + $0x2b0] sm:$0xf0]  ;;  %v2245_v15 = vadd.f32 %v2244_v11, %v2232_v1  ;;  %v8200_v11 = vld [vmem:[#allocation5 + $0x3b4] sm:$0xf0] }
 0x119   :  { %2470 = vmatpush.bf16.msra.mxu0 %v6660_v17  ;;  %v8367_v54 = vld [vmem:[#allocation5 + $0x8ec] sm:$0xf0]  ;;  %v2257_v12 = vpop.f32.mrf.mxu3  ;;  %v8227_v13 = vld [vmem:[#allocation5 + $0x494] sm:$0xf]  ;;  %v2220_v16 = vpop.f32.mrf.mxu0  ;;  %v5768_v23 = vor.u32 %v8163_v9, %v5765_v10  ;;  %v8136_v9 = vld [vmem:[#allocation5 + $0x1b4] sm:$0xf0] }
 0x11a   :  { %2496 = vmatpush.bf16.msra.mxu2 %v5896_v24  ;;  %v6564_v2 = vor.u32 %v8367_v54, %v6563_v53  ;;  %v6531_v4 = vld [vmem:[#allocation5 + $0x890] sm:$0xf]  ;;  %v6021_v14 = vld [vmem:[#allocation5 + $0x4b0] sm:$0xf0]  ;;  %v9258_v27 = vadd.f32 %v2257_v12, %v2245_v15  ;;  %v5899_v10 = vld [vmem:[#allocation5 + $0x398] sm:$0xf] }
 0x11b   :  { %v8359_v5 = vld [vmem:[#allocation5 + $0x8ac] sm:$0xf0]  ;;  %v8091_v26 = vld [vmem:[#allocation5 + $0x54] sm:$0xf]  ;;  %v6024_v29 = vor.u32 %v8227_v13, %v6021_v14  ;;  %v5644_v14 = vor.u32 %v8136_v9, %v5643_v8  ;;  %v8168_v8 = vld [vmem:[#allocation5 + $0x2b4] sm:$0xf0] }
 0x11c   :  { %2509 = vmatpush.bf16.msra.mxu3 %v6152_v28  ;;  %2484 = vmatpush.bf16.msra.mxu1 %v5608_v36  ;;  %v6532_v17 = vor.u32 %v8359_v5, %v6531_v4  ;;  %v6499_v24 = vld [vmem:[#allocation5 + $0x850] sm:$0xf]  ;;  %v2233_v28 = vpop.f32.mrf.mxu1  ;;  %v5477_v30 = vld [vmem:[#allocation5 + $0x70] sm:$0xf0] }
 0x11d   :  { %2471 = vmatpush.bf16.msra.mxu0 %v6628_v35  ;;  %v8351_v25 = vld [vmem:[#allocation5 + $0x86c] sm:$0xf0]  ;;  %v8155_v31 = vld [vmem:[#allocation5 + $0x254] sm:$0xf]  ;;  %v5480_v39 = vor.u32 %v8091_v26, %v5477_v30  ;;  %v5867_v26 = vld [vmem:[#allocation5 + $0x358] sm:$0xf] }
 0x11e   :  { %2497 = vmatpush.bf16.msra.mxu2 %v5864_v37  ;;  %v5733_v32 = vld [vmem:[#allocation5 + $0x270] sm:$0xf0]  ;;  %v6500_v36 = vor.u32 %v8351_v25, %v6499_v24  ;;  %v6467_v37 = vld [vmem:[#allocation5 + $0x810] sm:$0xf]  ;;  %v5611_v24 = vld [vmem:[#allocation5 + $0x158] sm:$0xf] }
 0x11f   :  { %v8219_v33 = vld [vmem:[#allocation5 + $0x454] sm:$0xf]  ;;  %v8343_v38 = vld [vmem:[#allocation5 + $0x82c] sm:$0xf0]  ;;  %v5736_v40 = vor.u32 %v8155_v31, %v5733_v32  ;;  %v2246_v48 = vpop.f32.mrf.mxu2  ;;  %v8128_v25 = vld [vmem:[#allocation5 + $0x174] sm:$0xf0] }
 0x120   :  { %2510 = vmatpush.bf16.msra.mxu3 %v6120_v41  ;;  %2485 = vmatpush.bf16.msra.mxu1 %v5576_v51  ;;  %v5989_v35 = vld [vmem:[#allocation5 + $0x470] sm:$0xf0]  ;;  %v6468_v54 = vor.u32 %v8343_v38, %v6467_v37  ;;  %v8192_v28 = vld [vmem:[#allocation5 + $0x374] sm:$0xf0]  ;;  %v5612_v31 = vor.u32 %v8128_v25, %v5611_v24 }
 0x121   :  { %2472 = vmatpush.bf16.msra.mxu0 %v6596_v49  ;;  %v8083_v41 = vld [vmem:[#allocation5 + $0x14] sm:$0xf]  ;;  %v5992_v44 = vor.u32 %v8219_v33, %v5989_v35  ;;  %v2259_v49 = vpop.f32.mrf.mxu3  ;;  %v5579_v38 = vld [vmem:[#allocation5 + $0x118] sm:$0xf] }
 0x122   :  { %2498 = vmatpush.bf16.msra.mxu2 %v5832_v52  ;;  %v5445_v42 = vld [vmem:[#allocation5 + $0x30] sm:$0xf0]  ;;  %v5483_v25 = vld [vmem:[#allocation5 + $0x58] sm:$0xf] }
 0x123   :  { %v8147_v43 = vld [vmem:[#allocation5 + $0x214] sm:$0xf]  ;;  %v5448_v58 = vor.u32 %v8083_v41, %v5445_v42  ;;  %v8184_v41 = vld [vmem:[#allocation5 + $0x334] sm:$0xf0] }
 0x124   :  { %2511 = vmatpush.bf16.msra.mxu3 %v6088_v57  ;;  %2486 = vmatpush.bf16.msra.mxu1 %v5544_v59  ;;  %v5701_v45 = vld [vmem:[#allocation5 + $0x230] sm:$0xf0]  ;;  %v8144_v57 = vld [vmem:[#allocation5 + $0x1f4] sm:$0xf0] }
 0x125   :  { %2473 = vmatpush.bf16.msra.mxu0 %v6564_v2  ;;  %v8211_v46 = vld [vmem:[#allocation5 + $0x414] sm:$0xf]  ;;  %v5704_v60 = vor.u32 %v8147_v43, %v5701_v45  ;;  %v5676_v59 = vor.u32 %v8144_v57, %v5675_v56  ;;  %v5803_v57 = vld [vmem:[#allocation5 + $0x2d8] sm:$0xf] }
 0x126   :  { %2499 = vmatpush.bf16.msra.mxu2 %v5800_v3  ;;  %v5957_v47 = vld [vmem:[#allocation5 + $0x430] sm:$0xf0] }
 0x127   :  { %v8331_v51 = vld [vmem:[#allocation5 + $0x7d4] sm:$0xf]  ;;  %v5960_v63 = vor.u32 %v8211_v46, %v5957_v47 }
 0x128   :  { %2512 = vmatpush.bf16.msra.mxu3 %v6056_v7  ;;  %2487 = vmatpush.bf16.msra.mxu1 %v5512_v21  ;;  %v6437_v52 = vld [vmem:[#allocation5 + $0x7f0] sm:$0xf0]  ;;  %v5900_v21 = vor.u32 %v8200_v11, %v5899_v10 }
 0x129   :  { %2474 = vmatpush.bf16.msra.mxu0 %v6532_v17  ;;  %v8395_v53 = vld [vmem:[#allocation5 + $0x9d4] sm:$0xf]  ;;  %v6440_v1 = vor.u32 %v8331_v51, %v6437_v52 }
 0x12a   :  { %2500 = vmatpush.bf16.msra.mxu2 %v5768_v23  ;;  %v6693_v55 = vld [vmem:[#allocation5 + $0x9f0] sm:$0xf0] }
 0x12b   :  { %v6696_v2 = vor.u32 %v8395_v53, %v6693_v55  ;;  %v8323_v3 = vld [vmem:[#allocation5 + $0x794] sm:$0xf]  ;;  %v8112_v55 = vld [vmem:[#allocation5 + $0xf4] sm:$0xf0] }
 0x12c   :  { %2513 = vmatpush.bf16.msra.mxu3 %v6024_v29  ;;  %2488 = vmatpush.bf16.msra.mxu1 %v5480_v39  ;;  %v6405_v4 = vld [vmem:[#allocation5 + $0x7b0] sm:$0xf0]  ;;  %v8120_v39 = vld [vmem:[#allocation5 + $0x134] sm:$0xf0] }
 0x12d   :  { %2475 = vmatpush.bf16.msra.mxu0 %v6500_v36  ;;  %v8387_v5 = vld [vmem:[#allocation5 + $0x994] sm:$0xf]  ;;  %v6408_v12 = vor.u32 %v8323_v3, %v6405_v4  ;;  %v5868_v36 = vor.u32 %v8192_v28, %v5867_v26  ;;  %v5580_v47 = vor.u32 %v8120_v39, %v5579_v38  ;;  %v5515_v4 = vld [vmem:[#allocation5 + $0x98] sm:$0xf] }
 0x12e   :  { %2501 = vmatpush.bf16.msra.mxu2 %v5736_v40  ;;  %v6661_v7 = vld [vmem:[#allocation5 + $0x9b0] sm:$0xf0]  ;;  %v5835_v40 = vld [vmem:[#allocation5 + $0x318] sm:$0xf] }
 0x12f   :  { %v6664_v13 = vor.u32 %v8387_v5, %v6661_v7  ;;  %v8315_v15 = vld [vmem:[#allocation5 + $0x754] sm:$0xf]  ;;  %v2283_v45 = vpop.f32.mrf.mxu1  ;;  %v5836_v52 = vor.u32 %v8184_v41, %v5835_v40  ;;  %v8104_v5 = vld [vmem:[#allocation5 + $0xb4] sm:$0xf0] }
 0x130   :  { %2514 = vmatpush.bf16.msra.mxu3 %v5992_v44  ;;  %2489 = vmatpush.bf16.msra.mxu1 %v5448_v58  ;;  %v6373_v16 = vld [vmem:[#allocation5 + $0x770] sm:$0xf0]  ;;  %v8176_v58 = vld [vmem:[#allocation5 + $0x2f4] sm:$0xf0] }
 0x131   :  { %2476 = vmatpush.bf16.msra.mxu0 %v6468_v54  ;;  %v8379_v17 = vld [vmem:[#allocation5 + $0x954] sm:$0xf]  ;;  %v6376_v29 = vor.u32 %v8315_v15, %v6373_v16  ;;  %v2270_v42 = vpop.f32.mrf.mxu0  ;;  %v5547_v54 = vld [vmem:[#allocation5 + $0xd8] sm:$0xf] }
 0x132   :  { %2502 = vmatpush.bf16.msra.mxu2 %v5704_v60  ;;  %v6629_v23 = vld [vmem:[#allocation5 + $0x970] sm:$0xf0]  ;;  %v2271_v44 = vadd.f32 %v2270_v42, %v9258_v27  ;;  %v525_v60 = vperm.slane %v9245_v0, 2  ;;  %v5548_v62 = vor.u32 %v8112_v55, %v5547_v54  ;;  %v5771_v7 = vld [vmem:[#allocation5 + $0x298] sm:$0xf] }
 0x133   :  { %2490 = vmatmul.bf16.vlgmr.msra.gmra.mxu1 %v9217_v19  ;;  %v6632_v30 = vor.u32 %v8379_v17, %v6629_v23  ;;  %v8307_v32 = vld [vmem:[#allocation5 + $0x714] sm:$0xf]  ;;  %v5772_v23 = vor.u32 %v8168_v8, %v5771_v7  ;;  %v8096_v26 = vld [vmem:[#allocation5 + $0x74] sm:$0xf0]  ;;  %v8140_v55 = vld [vmem:[#allocation5 + $0x1dc] sm:$0xf] }
 0x134   :  { %2515 = vmatpush.bf16.msra.mxu3 %v5960_v63  ;;  %2534 = vmatpush.bf16.msrb.mxu1 %v6696_v2  ;;  %v6341_v33 = vld [vmem:[#allocation5 + $0x730] sm:$0xf0]  ;;  %v9265_v56 = vadd.f32 %v2283_v45, %v2271_v44  ;;  %v5739_v28 = vld [vmem:[#allocation5 + $0x258] sm:$0xf] }
 0x135   :  { %2521 = vmatpush.bf16.msrb.mxu0 %v6440_v1  ;;  %2503 = vmatmul.bf16.vlgmr.msra.gmra.mxu2 %v9221_v22  ;;  %v8371_v35 = vld [vmem:[#allocation5 + $0x914] sm:$0xf]  ;;  %v6344_v43 = vor.u32 %v8307_v32, %v6341_v33  ;;  %v5451_v38 = vld [vmem:[#allocation5 + $0x18] sm:$0xf] }
 0x136   :  { %2547 = vmatpush.bf16.msrb.mxu2 %v5676_v59  ;;  %2477 = vmatmul.bf16.vlgmr.msra.gmra.mxu0 %v9227_v34  ;;  %v6597_v37 = vld [vmem:[#allocation5 + $0x930] sm:$0xf0]  ;;  %v5804_v59 = vor.u32 %v8176_v58, %v5803_v57  ;;  %v8088_v40 = vld [vmem:[#allocation5 + $0x34] sm:$0xf0]  ;;  %v5677_v57 = vld [vmem:[#allocation5 + $0x1f8] sm:$0xf0]  ;;  %8769 = vtanh.f32 %v9265_v56 }
 0x137   :  { %2516 = vmatmul.bf16.vlgmr.msra.gmra.mxu3 %v9215_v18  ;;  %v6600_v46 = vor.u32 %v8371_v35, %v6597_v37  ;;  %v8299_v48 = vld [vmem:[#allocation5 + $0x6d4] sm:$0xf]  ;;  %v5484_v35 = vor.u32 %v8096_v26, %v5483_v25  ;;  %v5707_v41 = vld [vmem:[#allocation5 + $0x218] sm:$0xf]  ;;  %v5452_v54 = vor.u32 %v8088_v40, %v5451_v38 }
 0x138   :  { %2560 = vmatpush.bf16.msrb.mxu3 %v5932_v6  ;;  %2535 = vmatpush.bf16.msrb.mxu1 %v6664_v13  ;;  %v6309_v49 = vld [vmem:[#allocation5 + $0x6f0] sm:$0xf0]  ;;  %v2296_v6 = vpop.f32.mrf.mxu2  ;;  %v8152_v42 = vld [vmem:[#allocation5 + $0x234] sm:$0xf0] }
 0x139   :  { %2522 = vmatpush.bf16.msrb.mxu0 %v6408_v12  ;;  %v8363_v51 = vld [vmem:[#allocation5 + $0x8d4] sm:$0xf]  ;;  %v6312_v27 = vor.u32 %v8299_v48, %v6309_v49  ;;  %v2297_v9 = vadd.f32 %v2296_v6, %v525_v60  ;;  %v2309_v10 = vpop.f32.mrf.mxu3  ;;  %v2272_v0 = vpop.f32.mrf.mxu0  ;;  %v6187_v44 = vld [vmem:[#allocation5 + $0x5d8] sm:$0xf]  ;;  %v5708_v58 = vor.u32 %v8152_v42, %v5707_v41  ;;  %v5645_v6 = vld [vmem:[#allocation5 + $0x1b8] sm:$0xf0] }
 0x13a   :  { %2548 = vmatpush.bf16.msrb.mxu2 %v5644_v14  ;;  %v6565_v53 = vld [vmem:[#allocation5 + $0x8f0] sm:$0xf0]  ;;  %v2285_v12 = vpop.f32.mrf.mxu1  ;;  %v5516_v14 = vor.u32 %v8104_v5, %v5515_v4  ;;  %v8272_v45 = vld [vmem:[#allocation5 + $0x5f4] sm:$0xf0]  ;;  %v8132_v5 = vld [vmem:[#allocation5 + $0x19c] sm:$0xf] }
 0x13b   :  { %v6568_v61 = vor.u32 %v8363_v51, %v6565_v53  ;;  %v8291_v63 = vld [vmem:[#allocation5 + $0x694] sm:$0xf]  ;;  %v8336_v49 = vld [vmem:[#allocation5 + $0x7f4] sm:$0xf0]  ;;  %v6188_v60 = vor.u32 %v8272_v45, %v6187_v44  ;;  %v5648_v12 = vor.u32 %v8132_v5, %v5645_v6 }
 0x13c   :  { %2561 = vmatpush.bf16.msrb.mxu3 %v5900_v21  ;;  %2536 = vmatpush.bf16.msrb.mxu1 %v6632_v30  ;;  %v6277_v1 = vld [vmem:[#allocation5 + $0x6b0] sm:$0xf0]  ;;  %v9268_v21 = vadd.f32 %v2309_v10, %v2297_v9  ;;  %v6699_v51 = vld [vmem:[#allocation5 + $0x9d8] sm:$0xf] }
 0x13d   :  { %2523 = vmatpush.bf16.msrb.mxu0 %v6376_v29  ;;  %v8355_v2 = vld [vmem:[#allocation5 + $0x894] sm:$0xf]  ;;  %v6280_v11 = vor.u32 %v8291_v63, %v6277_v1  ;;  %v8160_v29 = vld [vmem:[#allocation5 + $0x274] sm:$0xf0] }
 0x13e   :  { %2549 = vmatpush.bf16.msrb.mxu2 %v5612_v31  ;;  %v6533_v3 = vld [vmem:[#allocation5 + $0x8b0] sm:$0xf0]  ;;  %v5740_v39 = vor.u32 %v8160_v29, %v5739_v28  ;;  %v8264_v63 = vld [vmem:[#allocation5 + $0x5b4] sm:$0xf0] }
 0x13f   :  { %v6536_v13 = vor.u32 %v8355_v2, %v6533_v3  ;;  %v8283_v15 = vld [vmem:[#allocation5 + $0x654] sm:$0xf]  ;;  %v6411_v1 = vld [vmem:[#allocation5 + $0x798] sm:$0xf]  ;;  %v5680_v2 = vor.u32 %v8140_v55, %v5677_v57 }
 0x140   :  { %2562 = vmatpush.bf16.msrb.mxu3 %v5868_v36  ;;  %2537 = vmatpush.bf16.msrb.mxu1 %v6600_v46  ;;  %v6245_v16 = vld [vmem:[#allocation5 + $0x670] sm:$0xf0]  ;;  %v6443_v46 = vld [vmem:[#allocation5 + $0x7d8] sm:$0xf] }
 0x141   :  { %2524 = vmatpush.bf16.msrb.mxu0 %v6344_v43  ;;  %v8347_v17 = vld [vmem:[#allocation5 + $0x854] sm:$0xf]  ;;  %v6248_v30 = vor.u32 %v8283_v15, %v6245_v16  ;;  %v2298_v43 = vpop.f32.mrf.mxu2  ;;  %v6667_v3 = vld [vmem:[#allocation5 + $0x998] sm:$0xf]  ;;  %v8124_v16 = vld [vmem:[#allocation5 + $0x15c] sm:$0xf] }
 0x142   :  { %2550 = vmatpush.bf16.msrb.mxu2 %v5580_v47  ;;  %v6501_v24 = vld [vmem:[#allocation5 + $0x870] sm:$0xf0]  ;;  %v2311_v47 = vpop.f32.mrf.mxu3  ;;  %v8392_v4 = vld [vmem:[#allocation5 + $0x9b4] sm:$0xf0] }
 0x143   :  { %v8275_v31 = vld [vmem:[#allocation5 + $0x614] sm:$0xf]  ;;  %v6504_v33 = vor.u32 %v8347_v17, %v6501_v24  ;;  %v6668_v9 = vor.u32 %v8392_v4, %v6667_v3  ;;  %v6123_v10 = vld [vmem:[#allocation5 + $0x558] sm:$0xf]  ;;  %v5613_v17 = vld [vmem:[#allocation5 + $0x178] sm:$0xf0] }
 0x144   :  { %2563 = vmatpush.bf16.msrb.mxu3 %v5836_v52  ;;  %2538 = vmatpush.bf16.msrb.mxu1 %v6568_v61  ;;  %v6213_v32 = vld [vmem:[#allocation5 + $0x630] sm:$0xf0]  ;;  %v8400_v52 = vld [vmem:[#allocation5 + $0x9f4] sm:$0xf0]  ;;  %v5517_v3 = vld [vmem:[#allocation5 + $0xb8] sm:$0xf0] }
 0x145   :  { %2525 = vmatpush.bf16.msrb.mxu0 %v6312_v27  ;;  %v8339_v36 = vld [vmem:[#allocation5 + $0x814] sm:$0xf]  ;;  %v6216_v48 = vor.u32 %v8275_v31, %v6213_v32  ;;  %v6444_v27 = vor.u32 %v8336_v49, %v6443_v46  ;;  %v6700_v61 = vor.u32 %v8400_v52, %v6699_v51  ;;  %v8256_v0 = vld [vmem:[#allocation5 + $0x574] sm:$0xf0]  ;;  %v8108_v51 = vld [vmem:[#allocation5 + $0xdc] sm:$0xf] }
 0x146   :  { %2551 = vmatpush.bf16.msrb.mxu2 %v5548_v62  ;;  %v6469_v37 = vld [vmem:[#allocation5 + $0x830] sm:$0xf0]  ;;  %v6155_v62 = vld [vmem:[#allocation5 + $0x598] sm:$0xf]  ;;  %v5549_v52 = vld [vmem:[#allocation5 + $0xf8] sm:$0xf0] }
 0x147   :  { %v6472_v53 = vor.u32 %v8339_v36, %v6469_v37  ;;  %v6156_v7 = vor.u32 %v8264_v63, %v6155_v62  ;;  %v8384_v15 = vld [vmem:[#allocation5 + $0x974] sm:$0xf0]  ;;  %v5581_v36 = vld [vmem:[#allocation5 + $0x138] sm:$0xf0] }
 0x148   :  { %2564 = vmatpush.bf16.msrb.mxu3 %v5804_v59  ;;  %2539 = vmatpush.bf16.msrb.mxu1 %v6536_v13  ;;  %v8328_v59 = vld [vmem:[#allocation5 + $0x7b4] sm:$0xf0] }
 0x149   :  { %2526 = vmatpush.bf16.msrb.mxu0 %v6280_v11  ;;  %v6412_v8 = vor.u32 %v8328_v59, %v6411_v1  ;;  %v6379_v11 = vld [vmem:[#allocation5 + $0x758] sm:$0xf]  ;;  %v8100_v59 = vld [vmem:[#allocation5 + $0x9c] sm:$0xf] }
 0x14a   :  { %2552 = vmatpush.bf16.msrb.mxu2 %v5516_v14  ;;  %v8320_v13 = vld [vmem:[#allocation5 + $0x774] sm:$0xf0] }
 0x14b   :  { %v6635_v14 = vld [vmem:[#allocation5 + $0x958] sm:$0xf]  ;;  %v6380_v24 = vor.u32 %v8320_v13, %v6379_v11 }
 0x14c   :  { %2565 = vmatpush.bf16.msrb.mxu3 %v5772_v23  ;;  %2540 = vmatpush.bf16.msrb.mxu1 %v6504_v33  ;;  %v6124_v23 = vor.u32 %v8256_v0, %v6123_v10  ;;  %v6636_v25 = vor.u32 %v8384_v15, %v6635_v14  ;;  %v6091_v26 = vld [vmem:[#allocation5 + $0x518] sm:$0xf] }
 0x14d   :  { %2527 = vmatpush.bf16.msrb.mxu0 %v6248_v30  ;;  %v8248_v28 = vld [vmem:[#allocation5 + $0x534] sm:$0xf0]  ;;  %v5616_v30 = vor.u32 %v8124_v16, %v5613_v17  ;;  %v8092_v16 = vld [vmem:[#allocation5 + $0x5c] sm:$0xf] }
 0x14e   :  { %2553 = vmatpush.bf16.msrb.mxu2 %v5484_v35  ;;  %v6347_v29 = vld [vmem:[#allocation5 + $0x718] sm:$0xf]  ;;  %v8116_v35 = vld [vmem:[#allocation5 + $0x11c] sm:$0xf]  ;;  %v6092_v37 = vor.u32 %v8248_v28, %v6091_v26 }
 0x14f   :  { %v8312_v31 = vld [vmem:[#allocation5 + $0x734] sm:$0xf0]  ;;  %v5584_v46 = vor.u32 %v8116_v35, %v5581_v36  ;;  %v5485_v17 = vld [vmem:[#allocation5 + $0x78] sm:$0xf0] }
 0x150   :  { %2566 = vmatpush.bf16.msrb.mxu3 %v5740_v39  ;;  %2541 = vmatpush.bf16.msrb.mxu1 %v6472_v53  ;;  %v6603_v32 = vld [vmem:[#allocation5 + $0x918] sm:$0xf]  ;;  %v2335_v39 = vpop.f32.mrf.mxu1  ;;  %v6348_v40 = vor.u32 %v8312_v31, %v6347_v29  ;;  %v8084_v36 = vld [vmem:[#allocation5 + $0x1c] sm:$0xf] }
 0x151   :  { %2528 = vmatpush.bf16.msrb.mxu0 %v6216_v48  ;;  %v8376_v33 = vld [vmem:[#allocation5 + $0x934] sm:$0xf0]  ;;  %v2322_v38 = vpop.f32.mrf.mxu0 }
 0x152   :  { %2554 = vmatpush.bf16.msrb.mxu2 %v5452_v54  ;;  %v6604_v41 = vor.u32 %v8376_v33, %v6603_v32  ;;  %v6059_v42 = vld [vmem:[#allocation5 + $0x4d8] sm:$0xf]  ;;  %v2323_v45 = vadd.f32 %v2322_v38, %v9268_v21  ;;  %v5552_v21 = vor.u32 %v8108_v51, %v5549_v52  ;;  %v5488_v33 = vor.u32 %v8092_v16, %v5485_v17  ;;  %v8204_v38 = vld [vmem:[#allocation5 + $0x3dc] sm:$0xf] }
 0x153   :  { %2542 = vmatmul.bf16.vlgmr.msrb.gmra.mxu1 %v9227_v34  ;;  %v8240_v43 = vld [vmem:[#allocation5 + $0x4f4] sm:$0xf0]  ;;  %v8180_v16 = vld [vmem:[#allocation5 + $0x31c] sm:$0xf] }
 0x154   :  { %2567 = vmatpush.bf16.msrb.mxu3 %v5708_v58  ;;  %2586 = vmatpush.bf16.msra.mxu1 %v6444_v27  ;;  %v6315_v44 = vld [vmem:[#allocation5 + $0x6d8] sm:$0xf]  ;;  %v2336_v53 = vadd.f32 %v2335_v39, %v2323_v45  ;;  %v6060_v54 = vor.u32 %v8240_v43, %v6059_v42  ;;  %v5933_v39 = vld [vmem:[#allocation5 + $0x3f8] sm:$0xf0] }
 0x155   :  { %2573 = vmatpush.bf16.msra.mxu0 %v6188_v60  ;;  %2555 = vmatmul.bf16.vlgmr.msrb.gmra.mxu2 %v9217_v19  ;;  %v8304_v47 = vld [vmem:[#allocation5 + $0x6f4] sm:$0xf0]  ;;  %v6189_v43 = vld [vmem:[#allocation5 + $0x5f8] sm:$0xf0]  ;;  %v5936_v52 = vor.u32 %v8204_v38, %v5933_v39 }
 0x156   :  { %2599 = vmatpush.bf16.msra.mxu2 %v6700_v61  ;;  %2529 = vmatmul.bf16.vlgmr.msrb.gmra.mxu0 %v9219_v20  ;;  %v6571_v48 = vld [vmem:[#allocation5 + $0x8d8] sm:$0xf]  ;;  %v6316_v55 = vor.u32 %v8304_v47, %v6315_v44  ;;  %v8332_v44 = vld [vmem:[#allocation5 + $0x7dc] sm:$0xf] }
 0x157   :  { %2568 = vmatmul.bf16.vlgmr.msrb.gmra.mxu3 %v9221_v22  ;;  %v8368_v49 = vld [vmem:[#allocation5 + $0x8f4] sm:$0xf0]  ;;  %v2348_v61 = vpop.f32.mrf.mxu2  ;;  %v6445_v45 = vld [vmem:[#allocation5 + $0x7f8] sm:$0xf0] }
 0x158   :  { %2612 = vmatpush.bf16.msra.mxu3 %v5680_v2  ;;  %2587 = vmatpush.bf16.msra.mxu1 %v6412_v8  ;;  %v6572_v57 = vor.u32 %v8368_v49, %v6571_v48  ;;  %v6027_v58 = vld [vmem:[#allocation5 + $0x498] sm:$0xf]  ;;  %v9275_v2 = vadd.f32 %v2348_v61, %v2336_v53  ;;  %v8396_v48 = vld [vmem:[#allocation5 + $0x9dc] sm:$0xf] }
 0x159   :  { %2574 = vmatpush.bf16.msra.mxu0 %v6156_v7  ;;  %v8232_v60 = vld [vmem:[#allocation5 + $0x4b4] sm:$0xf0]  ;;  %v9277_v4 = vpop.f32.mrf.mxu3  ;;  %v2324_v6 = vpop.f32.mrf.mxu0  ;;  %v6701_v49 = vld [vmem:[#allocation5 + $0x9f8] sm:$0xf0] }
 0x15a   :  { %2600 = vmatpush.bf16.msra.mxu2 %v6668_v9  ;;  %v6283_v27 = vld [vmem:[#allocation5 + $0x698] sm:$0xf]  ;;  %v6028_v5 = vor.u32 %v8232_v60, %v6027_v58  ;;  %v2337_v7 = vpop.f32.mrf.mxu1  ;;  %v8260_v58 = vld [vmem:[#allocation5 + $0x59c] sm:$0xf]  ;;  %v6704_v60 = vor.u32 %v8396_v48, %v6701_v49  ;;  %8771 = vtanh.f32 %v9275_v2 }
 0x15b   :  { %v8296_v62 = vld [vmem:[#allocation5 + $0x6b4] sm:$0xf0]  ;;  %v8324_v61 = vld [vmem:[#allocation5 + $0x79c] sm:$0xf] }
 0x15c   :  { %2613 = vmatpush.bf16.msra.mxu3 %v5648_v12  ;;  %2588 = vmatpush.bf16.msra.mxu1 %v6380_v24  ;;  %v6539_v63 = vld [vmem:[#allocation5 + $0x898] sm:$0xf]  ;;  %v6284_v8 = vor.u32 %v8296_v62, %v6283_v27  ;;  %v5520_v12 = vor.u32 %v8100_v59, %v5517_v3  ;;  %v6157_v27 = vld [vmem:[#allocation5 + $0x5b8] sm:$0xf0] }
 0x15d   :  { %2575 = vmatpush.bf16.msra.mxu0 %v6124_v23  ;;  %v8360_v1 = vld [vmem:[#allocation5 + $0x8b4] sm:$0xf0]  ;;  %v8388_v62 = vld [vmem:[#allocation5 + $0x99c] sm:$0xf]  ;;  %v6160_v59 = vor.u32 %v8260_v58, %v6157_v27 }
 0x15e   :  { %2601 = vmatpush.bf16.msra.mxu2 %v6636_v25  ;;  %v6540_v9 = vor.u32 %v8360_v1, %v6539_v63  ;;  %v5995_v10 = vld [vmem:[#allocation5 + $0x458] sm:$0xf]  ;;  %v6669_v63 = vld [vmem:[#allocation5 + $0x9b8] sm:$0xf0] }
 0x15f   :  { %v8224_v0 = vld [vmem:[#allocation5 + $0x474] sm:$0xf0]  ;;  %v2350_v32 = vpop.f32.mrf.mxu2  ;;  %v5869_v6 = vld [vmem:[#allocation5 + $0x378] sm:$0xf0] }
 0x160   :  { %2614 = vmatpush.bf16.msra.mxu3 %v5616_v30  ;;  %2589 = vmatpush.bf16.msra.mxu1 %v6348_v40  ;;  %v6251_v11 = vld [vmem:[#allocation5 + $0x658] sm:$0xf]  ;;  %v5996_v23 = vor.u32 %v8224_v0, %v5995_v10  ;;  %v8268_v40 = vld [vmem:[#allocation5 + $0x5dc] sm:$0xf] }
 0x161   :  { %2576 = vmatpush.bf16.msra.mxu0 %v6092_v37  ;;  %v8288_v13 = vld [vmem:[#allocation5 + $0x674] sm:$0xf0]  ;;  %v5453_v37 = vld [vmem:[#allocation5 + $0x38] sm:$0xf0]  ;;  %v6192_v53 = vor.u32 %v8268_v40, %v6189_v43 }
 0x162   :  { %2602 = vmatpush.bf16.msra.mxu2 %v6604_v41  ;;  %v6507_v14 = vld [vmem:[#allocation5 + $0x858] sm:$0xf]  ;;  %v6252_v26 = vor.u32 %v8288_v13, %v6251_v11  ;;  %v2363_v41 = vpop.f32.mrf.mxu3  ;;  %v5456_v51 = vor.u32 %v8084_v36, %v5453_v37  ;;  %v8252_v7 = vld [vmem:[#allocation5 + $0x55c] sm:$0xf] }
 0x163   :  { %v8352_v15 = vld [vmem:[#allocation5 + $0x874] sm:$0xf0]  ;;  %v8316_v10 = vld [vmem:[#allocation5 + $0x75c] sm:$0xf] }
 0x164   :  { %2615 = vmatpush.bf16.msra.mxu3 %v5584_v46  ;;  %2590 = vmatpush.bf16.msra.mxu1 %v6316_v55  ;;  %v5963_v24 = vld [vmem:[#allocation5 + $0x418] sm:$0xf]  ;;  %v6508_v28 = vor.u32 %v8352_v15, %v6507_v14  ;;  %v8196_v55 = vld [vmem:[#allocation5 + $0x39c] sm:$0xf] }
 0x165   :  { %2577 = vmatpush.bf16.msra.mxu0 %v6060_v54  ;;  %v8216_v25 = vld [vmem:[#allocation5 + $0x434] sm:$0xf0]  ;;  %v6448_v54 = vor.u32 %v8332_v44, %v6445_v45  ;;  %v6381_v0 = vld [vmem:[#allocation5 + $0x778] sm:$0xf0] }
 0x166   :  { %2603 = vmatpush.bf16.msra.mxu2 %v6572_v57  ;;  %v6219_v29 = vld [vmem:[#allocation5 + $0x618] sm:$0xf]  ;;  %v5964_v42 = vor.u32 %v8216_v25, %v5963_v24  ;;  %v5901_v57 = vld [vmem:[#allocation5 + $0x3b8] sm:$0xf0]  ;;  %v6384_v15 = vor.u32 %v8316_v10, %v6381_v0 }
 0x167   :  { %v8280_v30 = vld [vmem:[#allocation5 + $0x634] sm:$0xf0]  ;;  %v5904_v1 = vor.u32 %v8196_v55, %v5901_v57  ;;  %v8380_v11 = vld [vmem:[#allocation5 + $0x95c] sm:$0xf] }
 0x168   :  { %2616 = vmatpush.bf16.msra.mxu3 %v5552_v21  ;;  %2591 = vmatpush.bf16.msra.mxu1 %v6284_v8  ;;  %v6475_v31 = vld [vmem:[#allocation5 + $0x818] sm:$0xf]  ;;  %v6220_v46 = vor.u32 %v8280_v30, %v6219_v29  ;;  %v6413_v21 = vld [vmem:[#allocation5 + $0x7b8] sm:$0xf0]  ;;  %v6672_v8 = vor.u32 %v8388_v62, %v6669_v63 }
 0x169   :  { %2578 = vmatpush.bf16.msra.mxu0 %v6028_v5  ;;  %v8344_v35 = vld [vmem:[#allocation5 + $0x834] sm:$0xf0]  ;;  %v6416_v3 = vor.u32 %v8324_v61, %v6413_v21  ;;  %v8188_v5 = vld [vmem:[#allocation5 + $0x35c] sm:$0xf] }
 0x16a   :  { %2604 = vmatpush.bf16.msra.mxu2 %v6540_v9  ;;  %v6476_v47 = vor.u32 %v8344_v35, %v6475_v31  ;;  %v6125_v9 = vld [vmem:[#allocation5 + $0x578] sm:$0xf0]  ;;  %v5872_v13 = vor.u32 %v8188_v5, %v5869_v6 }
 0x16b   :  { %v6128_v14 = vor.u32 %v8252_v7, %v6125_v9  ;;  %v5837_v17 = vld [vmem:[#allocation5 + $0x338] sm:$0xf0] }
 0x16c   :  { %2617 = vmatpush.bf16.msra.mxu3 %v5520_v12  ;;  %2592 = vmatpush.bf16.msra.mxu1 %v6252_v26  ;;  %v6637_v12 = vld [vmem:[#allocation5 + $0x978] sm:$0xf0]  ;;  %v5840_v31 = vor.u32 %v8180_v16, %v5837_v17 }
 0x16d   :  { %2579 = vmatpush.bf16.msra.mxu0 %v5996_v23  ;;  %v8244_v23 = vld [vmem:[#allocation5 + $0x51c] sm:$0xf]  ;;  %v6640_v24 = vor.u32 %v8380_v11, %v6637_v12 }
 0x16e   :  { %2605 = vmatpush.bf16.msra.mxu2 %v6508_v28  ;;  %v6093_v25 = vld [vmem:[#allocation5 + $0x538] sm:$0xf0] }
 0x16f   :  { %v8308_v26 = vld [vmem:[#allocation5 + $0x71c] sm:$0xf] }
 0x170   :  { %2618 = vmatpush.bf16.msra.mxu3 %v5488_v33  ;;  %2593 = vmatpush.bf16.msra.mxu1 %v6220_v46  ;;  %v6349_v28 = vld [vmem:[#allocation5 + $0x738] sm:$0xf0]  ;;  %v9285_v38 = vpop.f32.mrf.mxu1 }
 0x171   :  { %2580 = vmatpush.bf16.msra.mxu0 %v5964_v42  ;;  %v8372_v29 = vld [vmem:[#allocation5 + $0x91c] sm:$0xf]  ;;  %v6352_v33 = vor.u32 %v8308_v26, %v6349_v28 }
 0x172   :  { %2606 = vmatpush.bf16.msra.mxu2 %v6476_v47  ;;  %v6605_v30 = vld [vmem:[#allocation5 + $0x938] sm:$0xf0] }
 0x173   :  { %2594 = vmatmul.bf16.vlgmr.msra.gmra.mxu1 %v9219_v20  ;;  %v9283_v32 = vpop.f32.mrf.mxu0  ;;  %v8172_v35 = vld [vmem:[#allocation5 + $0x2dc] sm:$0xf]  ;;  %v6608_v39 = vor.u32 %v8372_v29, %v6605_v30 }
 0x174   :  { %2619 = vmatpush.bf16.msra.mxu3 %v5456_v51  ;;  %2638 = vmatpush.bf16.msrb.mxu1 %v6192_v53  ;;  %v5805_v36 = vld [vmem:[#allocation5 + $0x2f8] sm:$0xf0] }
 0x175   :  { %2625 = vmatpush.bf16.msrb.mxu0 %v5936_v52  ;;  %2607 = vmatmul.bf16.vlgmr.msra.gmra.mxu2 %v9227_v34  ;;  %v8236_v37 = vld [vmem:[#allocation5 + $0x4dc] sm:$0xf]  ;;  %v5808_v45 = vor.u32 %v8172_v35, %v5805_v36  ;;  %v8463_v36 = vld [vmem:[#allocation8 + $0x1ec] sm:$0xf0] }
 0x176   :  { %2651 = vmatpush.bf16.msrb.mxu2 %v6448_v54  ;;  %2581 = vmatmul.bf16.vlgmr.msra.gmra.mxu0 %v9215_v18  ;;  %v6061_v40 = vld [vmem:[#allocation5 + $0x4f8] sm:$0xf0] }
 0x177   :  { %2620 = vmatmul.bf16.vlgmr.msra.gmra.mxu3 %v9217_v19  ;;  %v6096_v19 = vor.u32 %v8244_v23, %v6093_v25  ;;  %v8300_v41 = vld [vmem:[#allocation5 + $0x6dc] sm:$0xf]  ;;  %v6064_v46 = vor.u32 %v8236_v37, %v6061_v40  ;;  %v7075_v37 = vld [vmem:[#allocation8 + $0x2e0] sm:$0xf] }
 0x178   :  { %2664 = vmatpush.bf16.msrb.mxu3 %v6704_v60  ;;  %2639 = vmatpush.bf16.msrb.mxu1 %v6160_v59  ;;  %v6317_v42 = vld [vmem:[#allocation5 + $0x6f8] sm:$0xf0]  ;;  %v9287_v52 = vpop.f32.mrf.mxu2  ;;  %v2389_v5 = vpop.f32.mrf.mxu1 }
 0x179   :  { %2626 = vmatpush.bf16.msrb.mxu0 %v5904_v1  ;;  %v8364_v43 = vld [vmem:[#allocation5 + $0x8dc] sm:$0xf]  ;;  %v6320_v47 = vor.u32 %v8300_v41, %v6317_v42  ;;  %v7203_v42 = vld [vmem:[#allocation8 + $0x3e0] sm:$0xf] }
 0x17a   :  { %2652 = vmatpush.bf16.msrb.mxu2 %v6416_v3  ;;  %v6573_v44 = vld [vmem:[#allocation5 + $0x8f8] sm:$0xf0]  ;;  %v9289_v58 = vpop.f32.mrf.mxu3  ;;  %v6915_v5 = vld [vmem:[#allocation8 + $0x1a0] sm:$0xf] }
 0x17b   :  { %v8164_v48 = vld [vmem:[#allocation5 + $0x29c] sm:$0xf]  ;;  %v6576_v53 = vor.u32 %v8364_v43, %v6573_v44  ;;  %v2376_v21 = vpop.f32.mrf.mxu0  ;;  %v8527_v43 = vld [vmem:[#allocation8 + $0x3ec] sm:$0xf0]  ;;  %v9291_v44 = vld [vmem:[#allocation7] sm:$0xff] }
 0x17c   :  { %2665 = vmatpush.bf16.msrb.mxu3 %v6672_v8  ;;  %2640 = vmatpush.bf16.msrb.mxu1 %v6128_v14  ;;  %v5773_v49 = vld [vmem:[#allocation5 + $0x2b8] sm:$0xf0]  ;;  %v8523_v21 = vld [vmem:[#allocation8 + $0x3cc] sm:$0xf0] }
 0x17d   :  { %2627 = vmatpush.bf16.msrb.mxu0 %v5872_v13  ;;  %v8228_v51 = vld [vmem:[#allocation5 + $0x49c] sm:$0xf]  ;;  %v5776_v61 = vor.u32 %v8164_v48, %v5773_v49 }
 0x17e   :  { %2653 = vmatpush.bf16.msrb.mxu2 %v6384_v15  ;;  %v6029_v54 = vld [vmem:[#allocation5 + $0x4b8] sm:$0xf0] }
 0x17f   :  { %v8292_v55 = vld [vmem:[#allocation5 + $0x69c] sm:$0xf]  ;;  %v6032_v62 = vor.u32 %v8228_v51, %v6029_v54  ;;  %v6803_v51 = vld [vmem:[#allocation8 + $0xc0] sm:$0xf] }
 0x180   :  { %2666 = vmatpush.bf16.msrb.mxu3 %v6640_v24  ;;  %2641 = vmatpush.bf16.msrb.mxu1 %v6096_v19  ;;  %v6285_v57 = vld [vmem:[#allocation5 + $0x6b8] sm:$0xf0]  ;;  %v2402_v24 = vpop.f32.mrf.mxu2  ;;  %v8431_v19 = vld [vmem:[#allocation8 + $0xec] sm:$0xf0]  ;;  %v6931_v54 = vld [vmem:[#allocation8 + $0x1c0] sm:$0xf] }
 0x181   :  { %2628 = vmatpush.bf16.msrb.mxu0 %v5840_v31  ;;  %v8356_v60 = vld [vmem:[#allocation5 + $0x89c] sm:$0xf]  ;;  %v6288_v63 = vor.u32 %v8292_v55, %v6285_v57  ;;  %v6819_v31 = vld [vmem:[#allocation8 + $0xe0] sm:$0xf]  ;;  %v7204_v55 = vor.u32 %v8527_v43, %v7203_v42  ;;  %v8459_v57 = vld [vmem:[#allocation8 + $0x1cc] sm:$0xf0] }
 0x182   :  { %2654 = vmatpush.bf16.msrb.mxu2 %v6352_v33  ;;  %v6541_v27 = vld [vmem:[#allocation5 + $0x8b8] sm:$0xf0]  ;;  %v2415_v30 = vpop.f32.mrf.mxu3  ;;  %v6947_v33 = vld [vmem:[#allocation8 + $0x1e0] sm:$0xf] }
 0x183   :  { %v8156_v1 = vld [vmem:[#allocation5 + $0x25c] sm:$0xf]  ;;  %v6544_v6 = vor.u32 %v8356_v60, %v6541_v27  ;;  %v6948_v48 = vor.u32 %v8463_v36, %v6947_v33  ;;  %v7059_v60 = vld [vmem:[#allocation8 + $0x2c0] sm:$0xf]  ;;  %v8491_v27 = vld [vmem:[#allocation8 + $0x2cc] sm:$0xf0] }
 0x184   :  { %2667 = vmatpush.bf16.msrb.mxu3 %v6608_v39  ;;  %2642 = vmatpush.bf16.msrb.mxu1 %v6064_v46  ;;  %v5741_v59 = vld [vmem:[#allocation5 + $0x278] sm:$0xf0]  ;;  %v8495_v39 = vld [vmem:[#allocation8 + $0x2ec] sm:$0xf0]  ;;  %v7155_v24 = vld [vmem:[#allocation8 + $0x380] sm:$0xf] }
 0x185   :  { %2629 = vmatpush.bf16.msrb.mxu0 %v5808_v45  ;;  %v8220_v3 = vld [vmem:[#allocation5 + $0x45c] sm:$0xf]  ;;  %v5744_v11 = vor.u32 %v8156_v1, %v5741_v59  ;;  %v526_v45 = vperm.slane %v9291_v44, 3  ;;  %v7076_v49 = vor.u32 %v8495_v39, %v7075_v37  ;;  %v7060_v1 = vor.u32 %v8491_v27, %v7059_v60  ;;  %v6787_v59 = vld [vmem:[#allocation8 + $0xa0] sm:$0xf] }
 0x186   :  { %2655 = vmatpush.bf16.msrb.mxu2 %v6320_v47  ;;  %v5997_v7 = vld [vmem:[#allocation5 + $0x478] sm:$0xf0]  ;;  %v6820_v47 = vor.u32 %v8431_v19, %v6819_v31  ;;  %v6755_v30 = vld [vmem:[#allocation8 + $0x60] sm:$0xf]  ;;  %v8415_v31 = vld [vmem:[#allocation8 + $0x6c] sm:$0xf0] }
 0x187   :  { %v8284_v8 = vld [vmem:[#allocation5 + $0x65c] sm:$0xf]  ;;  %v6000_v14 = vor.u32 %v8220_v3, %v5997_v7  ;;  %v8423_v3 = vld [vmem:[#allocation8 + $0xac] sm:$0xf0]  ;;  %v6883_v19 = vld [vmem:[#allocation8 + $0x160] sm:$0xf]  ;;  %v6756_v42 = vor.u32 %v8415_v31, %v6755_v30 }
 0x188   :  { %2668 = vmatpush.bf16.msrb.mxu3 %v6576_v53  ;;  %v6253_v9 = vld [vmem:[#allocation5 + $0x678] sm:$0xf0]  ;;  %2643 = vmatpush.bf16.msrb.mxu1 %v6032_v62  ;;  %v8427_v53 = vld [vmem:[#allocation8 + $0xcc] sm:$0xf0]  ;;  %v7011_v37 = vld [vmem:[#allocation8 + $0x260] sm:$0xf] }
 0x189   :  { %v8348_v10 = vld [vmem:[#allocation5 + $0x85c] sm:$0xf]  ;;  %2630 = vmatpush.bf16.msrb.mxu0 %v5776_v61  ;;  %v6256_v15 = vor.u32 %v8284_v8, %v6253_v9  ;;  %v7187_v61 = vld [vmem:[#allocation8 + $0x3c0] sm:$0xf]  ;;  %v6804_v62 = vor.u32 %v8427_v53, %v6803_v51  ;;  %v8455_v8 = vld [vmem:[#allocation8 + $0x1ac] sm:$0xf0] }
 0x18a   :  { %v6509_v0 = vld [vmem:[#allocation5 + $0x878] sm:$0xf0]  ;;  %2656 = vmatpush.bf16.msrb.mxu2 %v6288_v63  ;;  %v6932_v63 = vor.u32 %v8459_v57, %v6931_v54  ;;  %v7188_v7 = vor.u32 %v8523_v21, %v7187_v61  ;;  %v7043_v9 = vld [vmem:[#allocation8 + $0x2a0] sm:$0xf]  ;;  %v8447_v36 = vld [vmem:[#allocation8 + $0x16c] sm:$0xf0] }
 0x18b   :  { %v8148_v12 = vld [vmem:[#allocation5 + $0x21c] sm:$0xf]  ;;  %v6512_v25 = vor.u32 %v8348_v10, %v6509_v0  ;;  %v8487_v10 = vld [vmem:[#allocation8 + $0x2ac] sm:$0xf0]  ;;  %v7171_v0 = vld [vmem:[#allocation8 + $0x3a0] sm:$0xf]  ;;  %v6884_v43 = vor.u32 %v8447_v36, %v6883_v19 }
 0x18c   :  { %v5709_v13 = vld [vmem:[#allocation5 + $0x238] sm:$0xf0]  ;;  %2669 = vmatpush.bf16.msrb.mxu3 %v6544_v6  ;;  %2644 = vmatpush.bf16.msrb.mxu1 %v6000_v14  ;;  %v2362_v6 = vadd.f32 %v9277_v4, %v526_v45  ;;  %v6916_v4 = vor.u32 %v8455_v8, %v6915_v5  ;;  %v6771_v14 = vld [vmem:[#allocation8 + $0x80] sm:$0xf]  ;;  %v8479_v39 = vld [vmem:[#allocation8 + $0x26c] sm:$0xf0] }
 0x18d   :  { %v8212_v16 = vld [vmem:[#allocation5 + $0x41c] sm:$0xf]  ;;  %2631 = vmatpush.bf16.msrb.mxu0 %v5744_v11  ;;  %v5712_v35 = vor.u32 %v8148_v12, %v5709_v13  ;;  %v8519_v11 = vld [vmem:[#allocation8 + $0x3ac] sm:$0xf0]  ;;  %v6788_v12 = vor.u32 %v8423_v3, %v6787_v59  ;;  %v7044_v13 = vor.u32 %v8487_v10, %v7043_v9  ;;  %v7012_v45 = vor.u32 %v8479_v39, %v7011_v37  ;;  %v6995_v54 = vld [vmem:[#allocation8 + $0x240] sm:$0xf] }
 0x18e   :  { %v5965_v17 = vld [vmem:[#allocation5 + $0x438] sm:$0xf0]  ;;  %2657 = vmatpush.bf16.msrb.mxu2 %v6256_v15  ;;  %v6899_v15 = vld [vmem:[#allocation8 + $0x180] sm:$0xf]  ;;  %v8443_v53 = vld [vmem:[#allocation8 + $0x14c] sm:$0xf0] }
 0x18f   :  { %v8276_v23 = vld [vmem:[#allocation5 + $0x61c] sm:$0xf]  ;;  %v5968_v40 = vor.u32 %v8212_v16, %v5965_v17  ;;  %v2375_v16 = vadd.f32 %v9283_v32, %v2362_v6  ;;  %v7172_v17 = vor.u32 %v8519_v11, %v7171_v0  ;;  %v7123_v60 = vld [vmem:[#allocation8 + $0x340] sm:$0xf]  ;;  %v8507_v27 = vld [vmem:[#allocation8 + $0x34c] sm:$0xf0] }
 0x190   :  { %v6221_v26 = vld [vmem:[#allocation5 + $0x638] sm:$0xf0]  ;;  %2670 = vmatpush.bf16.msrb.mxu3 %v6512_v25  ;;  %v8515_v25 = vld [vmem:[#allocation8 + $0x38c] sm:$0xf0]  ;;  %v9302_v33 = vpop.f32.mrf.mxu1  ;;  %v6851_v3 = vld [vmem:[#allocation8 + $0x120] sm:$0xf]  ;;  %v7124_v6 = vor.u32 %v8507_v27, %v7123_v60 }
 0x191   :  { %v8340_v28 = vld [vmem:[#allocation5 + $0x81c] sm:$0xf]  ;;  %v6224_v41 = vor.u32 %v8276_v23, %v6221_v26  ;;  %2632 = vmatpush.bf16.msrb.mxu0 %v5712_v35  ;;  %2645 = vmatpush.bf16.msrb.mxu1 %v5968_v40  ;;  %v7027_v23 = vld [vmem:[#allocation8 + $0x280] sm:$0xf]  ;;  %v2388_v32 = vadd.f32 %v9285_v38, %v2375_v16  ;;  %v7156_v35 = vor.u32 %v8515_v25, %v7155_v24  ;;  %v8407_v59 = vld [vmem:[#allocation8 + $0x2c] sm:$0xf0] }
 0x192   :  { %v6477_v29 = vld [vmem:[#allocation5 + $0x838] sm:$0xf0]  ;;  %v7139_v40 = vld [vmem:[#allocation8 + $0x360] sm:$0xf]  ;;  %v8471_v9 = vld [vmem:[#allocation8 + $0x22c] sm:$0xf0] }
 0x193   :  { %v6480_v46 = vor.u32 %v8340_v28, %v6477_v29  ;;  %2658 = vmatpush.bf16.msrb.mxu2 %v6224_v41  ;;  %v9300_v26 = vpop.f32.mrf.mxu0  ;;  %v8511_v41 = vld [vmem:[#allocation8 + $0x36c] sm:$0xf0]  ;;  %v2401_v38 = vadd.f32 %v9287_v52, %v2388_v32  ;;  %v6979_v8 = vld [vmem:[#allocation8 + $0x220] sm:$0xf] }
 0x194   :  { %2633 = vmatmul.bf16.vlgmr.msrb.gmra.mxu0 %v9221_v22  ;;  %2646 = vmatmul.bf16.vlgmr.msrb.gmra.mxu1 %v9215_v18  ;;  %v8419_v22 = vld [vmem:[#allocation8 + $0x8c] sm:$0xf0]  ;;  %v7140_v51 = vor.u32 %v8511_v41, %v7139_v40  ;;  %v7107_v10 = vld [vmem:[#allocation8 + $0x320] sm:$0xf] }
 0x195   :  { %2671 = vmatpush.bf16.msrb.mxu3 %v6480_v46  ;;  %4239 = vmatpush.bf16.msra.mxu0 %v6820_v47  ;;  %v8451_v18 = vld [vmem:[#allocation8 + $0x18c] sm:$0xf0]  ;;  %v6739_v46 = vld [vmem:[#allocation8 + $0x40] sm:$0xf]  ;;  %v2414_v5 = vadd.f32 %v9289_v58, %v2401_v38  ;;  %v6980_v58 = vor.u32 %v8471_v9, %v6979_v8 }
 0x196   :  { %4252 = vmatpush.bf16.msra.mxu1 %v6948_v48  ;;  %2659 = vmatmul.bf16.vlgmr.msrb.gmra.mxu2 %v9219_v20  ;;  %v8483_v20 = vld [vmem:[#allocation8 + $0x28c] sm:$0xf0]  ;;  %v6900_v28 = vor.u32 %v8451_v18, %v6899_v15  ;;  %v6867_v48 = vld [vmem:[#allocation8 + $0x140] sm:$0xf] }
 0x197   :  { %4265 = vmatpush.bf16.msra.mxu2 %v7076_v49  ;;  %v7028_v29 = vor.u32 %v8483_v20, %v7027_v23  ;;  %v8411_v47 = vld [vmem:[#allocation8 + $0x4c] sm:$0xf0]  ;;  %8773 = vtanh.f32 %v2414_v5  ;;  %v6963_v16 = vld [vmem:[#allocation8 + $0x200] sm:$0xf] }
 0x198   :  { %2672 = vmatmul.bf16.vlgmr.msrb.gmra.mxu3 %v9227_v34  ;;  %v6772_v34 = vor.u32 %v8419_v22, %v6771_v14  ;;  %v9305_v49 = vpop.f32.mrf.mxu2  ;;  %v6740_v61 = vor.u32 %v8411_v47, %v6739_v46  ;;  %v2441_v52 = vpop.f32.mrf.mxu1  ;;  %v8503_v0 = vld [vmem:[#allocation8 + $0x32c] sm:$0xf0]  ;;  %v6835_v14 = vld [vmem:[#allocation8 + $0x100] sm:$0xf] }
 0x199   :  { %4278 = vmatpush.bf16.msra.mxu3 %v7204_v55  ;;  %4240 = vmatpush.bf16.msra.mxu0 %v6804_v62  ;;  %v8475_v55 = vld [vmem:[#allocation8 + $0x24c] sm:$0xf0]  ;;  %v6868_v62 = vor.u32 %v8443_v53, %v6867_v48  ;;  %v7108_v50 = vor.u32 %v8503_v0, %v7107_v10  ;;  %v7091_v18 = vld [vmem:[#allocation8 + $0x300] sm:$0xf] }
 0x19a   :  { %4253 = vmatpush.bf16.msra.mxu1 %v6932_v63  ;;  %v9308_v57 = vpop.f32.mrf.mxu3  ;;  %v6996_v63 = vor.u32 %v8475_v55, %v6995_v54  ;;  %v8435_v22 = vld [vmem:[#allocation8 + $0x10c] sm:$0xf0]  ;;  %v7331_v20 = vld [vmem:[#allocation8 + $0x4e0] sm:$0xf] }
 0x19b   :  { %4266 = vmatpush.bf16.msra.mxu2 %v7060_v1  ;;  %v2428_v21 = vpop.f32.mrf.mxu0  ;;  %v6723_v1 = vld [vmem:[#allocation8 + $0x20] sm:$0xf]  ;;  %v8499_v23 = vld [vmem:[#allocation8 + $0x30c] sm:$0xf0]  ;;  %v6836_v30 = vor.u32 %v8435_v22, %v6835_v14 }
 0x19c   :  { %v6724_v11 = vor.u32 %v8407_v59, %v6723_v1  ;;  %v8559_v24 = vld [vmem:[#allocation8 + $0x4ec] sm:$0xf0]  ;;  %v7459_v25 = vld [vmem:[#allocation8 + $0x5e0] sm:$0xf]  ;;  %v7092_v32 = vor.u32 %v8499_v23, %v7091_v18 }
 0x19d   :  { %4279 = vmatpush.bf16.msra.mxu3 %v7188_v7  ;;  %4241 = vmatpush.bf16.msra.mxu0 %v6788_v12  ;;  %v8439_v7 = vld [vmem:[#allocation8 + $0x12c] sm:$0xf0]  ;;  %v6707_v12 = vld [vmem:[#allocation8] sm:$0xf] }
 0x19e   :  { %4254 = vmatpush.bf16.msra.mxu1 %v6916_v4  ;;  %v6852_v4 = vor.u32 %v8439_v7, %v6851_v3  ;;  %v7587_v36 = vld [vmem:[#allocation8 + $0x6e0] sm:$0xf]  ;;  %v8623_v37 = vld [vmem:[#allocation8 + $0x6ec] sm:$0xf0] }
 0x19f   :  { %4267 = vmatpush.bf16.msra.mxu2 %v7044_v13  ;;  %v8403_v13 = vld [vmem:[#allocation8 + $0xc] sm:$0xf0]  ;;  %v7315_v41 = vld [vmem:[#allocation8 + $0x4c0] sm:$0xf]  ;;  %v7588_v38 = vor.u32 %v8623_v37, %v7587_v36 }
 0x1a0   :  { %v2454_v15 = vpop.f32.mrf.mxu2  ;;  %v6708_v2 = vor.u32 %v8403_v13, %v6707_v12  ;;  %v7443_v46 = vld [vmem:[#allocation8 + $0x5c0] sm:$0xf]  ;;  %v8587_v47 = vld [vmem:[#allocation8 + $0x5cc] sm:$0xf0] }
 0x1a1   :  { %4280 = vmatpush.bf16.msra.mxu3 %v7172_v17  ;;  %4242 = vmatpush.bf16.msra.mxu0 %v6772_v34  ;;  %v8467_v17 = vld [vmem:[#allocation8 + $0x20c] sm:$0xf0]  ;;  %v7571_v55 = vld [vmem:[#allocation8 + $0x6c0] sm:$0xf] }
 0x1a2   :  { %4255 = vmatpush.bf16.msra.mxu1 %v6900_v28  ;;  %v2467_v56 = vpop.f32.mrf.mxu3  ;;  %v8591_v34 = vld [vmem:[#allocation8 + $0x5ec] sm:$0xf0]  ;;  %v527_v28 = vperm.slane %v9291_v44, 4  ;;  %v6964_v31 = vor.u32 %v8467_v17, %v6963_v16  ;;  %v7555_v52 = vld [vmem:[#allocation8 + $0x6a0] sm:$0xf] }
 0x1a3   :  { %4268 = vmatpush.bf16.msra.mxu2 %v7028_v29  ;;  %v8768_v29 = vpop.eup %8767  ;;  %v7460_v40 = vor.u32 %v8591_v34, %v7459_v25  ;;  %v8619_v60 = vld [vmem:[#allocation8 + $0x6cc] sm:$0xf0]  ;;  %v7283_v7 = vld [vmem:[#allocation8 + $0x480] sm:$0xf] }
 0x1a4   :  { %v8770_v19 = vpop.eup %8769  ;;  %v9316_v48 = vpack.c.bf16 %v8768_v29, %v8768_v29  ;;  %v8551_v21 = vld [vmem:[#allocation8 + $0x4ac] sm:$0xf0]  ;;  %v7572_v59 = vor.u32 %v8619_v60, %v7571_v55  ;;  %v7411_v10 = vld [vmem:[#allocation8 + $0x580] sm:$0xf] }
 0x1a5   :  { %4281 = vmatpush.bf16.msra.mxu3 %v7156_v35  ;;  %4243 = vmatpush.bf16.msra.mxu0 %v6756_v42  ;;  %v7332_v35 = vor.u32 %v8559_v24, %v7331_v20  ;;  %v8772_v39 = vpop.eup %8771  ;;  %v8555_v42 = vld [vmem:[#allocation8 + $0x4cc] sm:$0xf0]  ;;  %v7267_v22 = vld [vmem:[#allocation8 + $0x460] sm:$0xf] }
 0x1a6   :  { %4256 = vmatpush.bf16.msra.mxu1 %v6884_v43  ;;  %v8774_v43 = vpop.eup %8773  ;;  %v9320_v53 = vpack.c.bf16 %v8772_v39, %v8772_v39  ;;  %v7316_v54 = vor.u32 %v8555_v42, %v7315_v41  ;;  %v8583_v1 = vld [vmem:[#allocation8 + $0x5ac] sm:$0xf0]  ;;  %v7395_v16 = vld [vmem:[#allocation8 + $0x560] sm:$0xf] }
 0x1a7   :  { %4269 = vmatpush.bf16.msra.mxu2 %v7012_v45  ;;  %v2427_v45 = vadd.f32 %v9300_v26, %v527_v28  ;;  %v9322_v27 = vpack.c.bf16 %v8774_v43, %v8774_v43  ;;  %v7444_v26 = vor.u32 %v8587_v47, %v7443_v46  ;;  %v8615_v5 = vld [vmem:[#allocation8 + $0x6ac] sm:$0xf0]  ;;  %v7523_v56 = vld [vmem:[#allocation8 + $0x660] sm:$0xf]  ;;  %v528_v46 = vperm.slane %v9291_v44, 5 }
 0x1a8   :  { %v8547_v8 = vld [vmem:[#allocation8 + $0x48c] sm:$0xf0]  ;;  %v7251_v24 = vld [vmem:[#allocation8 + $0x440] sm:$0xf] }
 0x1a9   :  { %4282 = vmatpush.bf16.msra.mxu3 %v7140_v51  ;;  %4244 = vmatpush.bf16.msra.mxu0 %v6740_v61  ;;  %v9318_v51 = vpack.c.bf16 %v8770_v19, %v8770_v19  ;;  %v7299_v61 = vld [vmem:[#allocation8 + $0x4a0] sm:$0xf]  ;;  %v8579_v0 = vld [vmem:[#allocation8 + $0x58c] sm:$0xf0]  ;;  %v7284_v12 = vor.u32 %v8547_v8, %v7283_v7 }
 0x1aa   :  { %4257 = vmatpush.bf16.msra.mxu1 %v6868_v62  ;;  %v2440_v62 = vadd.f32 %v9302_v33, %v2427_v45  ;;  %v7300_v3 = vor.u32 %v8551_v21, %v7299_v61  ;;  %v7556_v33 = vor.u32 %v8615_v5, %v7555_v52  ;;  %v8611_v13 = vld [vmem:[#allocation8 + $0x68c] sm:$0xf0]  ;;  %v7412_v14 = vor.u32 %v8579_v0, %v7411_v10  ;;  %v7379_v34 = vld [vmem:[#allocation8 + $0x540] sm:$0xf]  ;;  %v8429_v21 = vld [vmem:[#allocation8 + $0xe4] sm:$0xf] }
 0x1ab   :  { %4270 = vmatpush.bf16.msra.mxu2 %v6996_v63  ;;  %v7427_v63 = vld [vmem:[#allocation8 + $0x5a0] sm:$0xf]  ;;  %v8543_v15 = vld [vmem:[#allocation8 + $0x46c] sm:$0xf0]  ;;  %v8425_v0 = vld [vmem:[#allocation8 + $0xc4] sm:$0xf] }
 0x1ac   :  { %v2453_v9 = vadd.f32 %v9305_v49, %v2440_v62  ;;  %v8575_v17 = vld [vmem:[#allocation8 + $0x56c] sm:$0xf0]  ;;  %v7268_v18 = vor.u32 %v8543_v15, %v7267_v22  ;;  %v7235_v39 = vld [vmem:[#allocation8 + $0x420] sm:$0xf]  ;;  %v6821_v62 = vld [vmem:[#allocation8 + $0xf0] sm:$0xf0] }
 0x1ad   :  { %4283 = vmatpush.bf16.msra.mxu3 %v7124_v6  ;;  %4245 = vmatpush.bf16.msra.mxu0 %v6724_v11  ;;  %v7428_v6 = vor.u32 %v8583_v1, %v7427_v63  ;;  %v8607_v23 = vld [vmem:[#allocation8 + $0x66c] sm:$0xf0]  ;;  %v7396_v20 = vor.u32 %v8575_v17, %v7395_v16  ;;  %v7363_v41 = vld [vmem:[#allocation8 + $0x520] sm:$0xf]  ;;  %v8461_v1 = vld [vmem:[#allocation8 + $0x1e4] sm:$0xf]  ;;  %v6824_v10 = vor.u32 %v8429_v21, %v6821_v62 }
 0x1ae   :  { %4258 = vmatpush.bf16.msra.mxu1 %v6852_v4  ;;  %v8571_v28 = vld [vmem:[#allocation8 + $0x54c] sm:$0xf0]  ;;  %v7491_v47 = vld [vmem:[#allocation8 + $0x620] sm:$0xf]  ;;  %v6933_v16 = vld [vmem:[#allocation8 + $0x1d0] sm:$0xf0] }
 0x1af   :  { %4271 = vmatpush.bf16.msra.mxu2 %v6980_v58  ;;  %v7539_v58 = vld [vmem:[#allocation8 + $0x680] sm:$0xf]  ;;  %v8603_v36 = vld [vmem:[#allocation8 + $0x64c] sm:$0xf0]  ;;  %v7380_v37 = vor.u32 %v8571_v28, %v7379_v34 }
 0x1b0   :  { %v9330_v4 = vpop.f32.mrf.mxu1  ;;  %v7540_v49 = vor.u32 %v8611_v13, %v7539_v58  ;;  %v8567_v42 = vld [vmem:[#allocation8 + $0x52c] sm:$0xf0]  ;;  %v7219_v55 = vld [vmem:[#allocation8 + $0x400] sm:$0xf]  ;;  %v6805_v13 = vld [vmem:[#allocation8 + $0xd0] sm:$0xf0] }
 0x1b1   :  { %4284 = vmatpush.bf16.msra.mxu3 %v7108_v50  ;;  %4246 = vmatpush.bf16.msra.mxu0 %v6708_v2  ;;  %v2466_v50 = vadd.f32 %v9308_v57, %v2453_v9  ;;  %v8539_v2 = vld [vmem:[#allocation8 + $0x44c] sm:$0xf0]  ;;  %v7524_v57 = vor.u32 %v8607_v23, %v7523_v56  ;;  %v7475_v7 = vld [vmem:[#allocation8 + $0x600] sm:$0xf]  ;;  %v6808_v56 = vor.u32 %v8425_v0, %v6805_v13  ;;  %v8421_v23 = vld [vmem:[#allocation8 + $0xa4] sm:$0xf] }
 0x1b2   :  { %4259 = vmatpush.bf16.msra.mxu1 %v6836_v30  ;;  %v7252_v19 = vor.u32 %v8539_v2, %v7251_v24  ;;  %v8531_v60 = vld [vmem:[#allocation8 + $0x40c] sm:$0xf0]  ;;  %v7061_v24 = vld [vmem:[#allocation8 + $0x2d0] sm:$0xf0]  ;;  %v7699_v34 = vld [vmem:[#allocation8 + $0x7c0] sm:$0xf] }
 0x1b3   :  { %4272 = vmatpush.bf16.msra.mxu2 %v6964_v31  ;;  %v2478_v11 = vpop.f32.mrf.mxu0  ;;  %v8563_v61 = vld [vmem:[#allocation8 + $0x50c] sm:$0xf0]  ;;  %v7013_v0 = vld [vmem:[#allocation8 + $0x270] sm:$0xf0]  ;;  %v8441_v13 = vld [vmem:[#allocation8 + $0x144] sm:$0xf] }
 0x1b4   :  { %4247 = vmatmul.bf16.vlgmr.msra.gmra.mxu0 %v9316_v48  ;;  %v2479_v25 = vadd.f32 %v2478_v11, %v2466_v50  ;;  %v8595_v8 = vld [vmem:[#allocation8 + $0x60c] sm:$0xf0]  ;;  %v8493_v11 = vld [vmem:[#allocation8 + $0x2e4] sm:$0xf] }
 0x1b5   :  { %4285 = vmatpush.bf16.msra.mxu3 %v7092_v32  ;;  %4291 = vmatpush.bf16.msrb.mxu0 %v7332_v35  ;;  %v7507_v35 = vld [vmem:[#allocation8 + $0x640] sm:$0xf]  ;;  %v8655_v22 = vld [vmem:[#allocation8 + $0x7ec] sm:$0xf0]  ;;  %v8457_v50 = vld [vmem:[#allocation8 + $0x1c4] sm:$0xf]  ;;  %v7476_v17 = vor.u32 %v8595_v8, %v7475_v7 }
 0x1b6   :  { %4304 = vmatpush.bf16.msrb.mxu1 %v7460_v40  ;;  %4273 = vmatmul.bf16.vlgmr.msra.gmra.mxu2 %v9320_v53  ;;  %v8535_v40 = vld [vmem:[#allocation8 + $0x42c] sm:$0xf0]  ;;  %8775 = vtanh.f32 %v2479_v25  ;;  %v7508_v43 = vor.u32 %v8603_v36, %v7507_v35  ;;  %v6789_v25 = vld [vmem:[#allocation8 + $0xb0] sm:$0xf0]  ;;  %v8417_v36 = vld [vmem:[#allocation8 + $0x84] sm:$0xf] }
 0x1b7   :  { %4260 = vmatmul.bf16.vlgmr.msra.gmra.mxu1 %v9318_v51  ;;  %4317 = vmatpush.bf16.msrb.mxu2 %v7588_v38  ;;  %v7236_v45 = vor.u32 %v8535_v40, %v7235_v39  ;;  %v8599_v38 = vld [vmem:[#allocation8 + $0x62c] sm:$0xf0]  ;;  %v6792_v35 = vor.u32 %v8421_v23, %v6789_v25  ;;  %v7045_v39 = vld [vmem:[#allocation8 + $0x2b0] sm:$0xf0]  ;;  %v8473_v23 = vld [vmem:[#allocation8 + $0x244] sm:$0xf] }
 0x1b8   :  { %4286 = vmatmul.bf16.vlgmr.msra.gmra.mxu3 %v9322_v27  ;;  %v9333_v29 = vpop.f32.mrf.mxu2  ;;  %v2493_v32 = vpop.f32.mrf.mxu1  ;;  %v7492_v52 = vor.u32 %v8599_v38, %v7491_v47  ;;  %v8651_v28 = vld [vmem:[#allocation8 + $0x7cc] sm:$0xf0]  ;;  %v7635_v25 = vld [vmem:[#allocation8 + $0x740] sm:$0xf] }
 0x1b9   :  { %4292 = vmatpush.bf16.msrb.mxu0 %v7316_v54  ;;  %v7364_v54 = vor.u32 %v8567_v42, %v7363_v41  ;;  %v6773_v41 = vld [vmem:[#allocation8 + $0x90] sm:$0xf0]  ;;  %v7683_v42 = vld [vmem:[#allocation8 + $0x7a0] sm:$0xf] }
 0x1ba   :  { %4305 = vmatpush.bf16.msrb.mxu1 %v7444_v26  ;;  %v9335_v31 = vpop.f32.mrf.mxu3  ;;  %v7347_v26 = vld [vmem:[#allocation8 + $0x500] sm:$0xf] }
 0x1bb   :  { %4318 = vmatpush.bf16.msrb.mxu2 %v7572_v59  ;;  %v2480_v30 = vpop.f32.mrf.mxu0  ;;  %v6949_v59 = vld [vmem:[#allocation8 + $0x1f0] sm:$0xf0]  ;;  %v7348_v9 = vor.u32 %v8563_v61, %v7347_v26  ;;  %v8481_v26 = vld [vmem:[#allocation8 + $0x284] sm:$0xf] }
 0x1bc   :  { %v8776_v5 = vpop.eup %8775  ;;  %v6952_v58 = vor.u32 %v8461_v1, %v6949_v59  ;;  %v8453_v30 = vld [vmem:[#allocation8 + $0x1a4] sm:$0xf]  ;;  %v7029_v61 = vld [vmem:[#allocation8 + $0x290] sm:$0xf0]  ;;  %v7667_v1 = vld [vmem:[#allocation8 + $0x780] sm:$0xf] }
 0x1bd   :  { %4293 = vmatpush.bf16.msrb.mxu0 %v7300_v3  ;;  %v9339_v15 = vpack.c.bf16 %v8776_v5, %v8776_v5  ;;  %v8643_v59 = vld [vmem:[#allocation8 + $0x78c] sm:$0xf0]  ;;  %v7032_v7 = vor.u32 %v8481_v26, %v7029_v61 }
 0x1be   :  { %4306 = vmatpush.bf16.msrb.mxu1 %v7428_v6  ;;  %v7220_v6 = vor.u32 %v8531_v60, %v7219_v55  ;;  %v6776_v55 = vor.u32 %v8417_v36, %v6773_v41  ;;  %v8413_v60 = vld [vmem:[#allocation8 + $0x64] sm:$0xf]  ;;  %v7668_v5 = vor.u32 %v8643_v59, %v7667_v1 }
 0x1bf   :  { %4319 = vmatpush.bf16.msrb.mxu2 %v7556_v33  ;;  %v7077_v33 = vld [vmem:[#allocation8 + $0x2f0] sm:$0xf0] }
 0x1c0   :  { %v2506_v63 = vpop.f32.mrf.mxu2 }
 0x1c1   :  { %4294 = vmatpush.bf16.msrb.mxu0 %v7284_v12  ;;  %v2492_v12 = vadd.f32 %v9330_v4, %v528_v46  ;;  %v6936_v4 = vor.u32 %v8457_v50, %v6933_v16  ;;  %v6901_v46 = vld [vmem:[#allocation8 + $0x190] sm:$0xf0] }
 0x1c2   :  { %4307 = vmatpush.bf16.msrb.mxu1 %v7412_v14  ;;  %v2519_v3 = vpop.f32.mrf.mxu3  ;;  %v7715_v14 = vld [vmem:[#allocation8 + $0x7e0] sm:$0xf] }
 0x1c3   :  { %4320 = vmatpush.bf16.msrb.mxu2 %v7540_v49  ;;  %v7716_v49 = vor.u32 %v8655_v22, %v7715_v14  ;;  %v2505_v2 = vadd.f32 %v9333_v29, %v2492_v12  ;;  %v8445_v3 = vld [vmem:[#allocation8 + $0x164] sm:$0xf]  ;;  %v7651_v12 = vld [vmem:[#allocation8 + $0x760] sm:$0xf]  ;;  %v6869_v14 = vld [vmem:[#allocation8 + $0x150] sm:$0xf0] }
 0x1c5   :  { %4295 = vmatpush.bf16.msrb.mxu0 %v7268_v18  ;;  %v7080_v18 = vor.u32 %v8493_v11, %v7077_v33  ;;  %4330 = vmatpush.bf16.msrb.mxu3 %v7716_v49  ;;  %v2518_v29 = vadd.f32 %v9335_v31, %v2505_v2  ;;  %v6757_v31 = vld [vmem:[#allocation8 + $0x70] sm:$0xf0]  ;;  %v8405_v49 = vld [vmem:[#allocation8 + $0x24] sm:$0xf] }
 0x1c6   :  { %4308 = vmatpush.bf16.msrb.mxu1 %v7396_v20  ;;  %v8489_v20 = vld [vmem:[#allocation8 + $0x2c4] sm:$0xf]  ;;  %v6760_v8 = vor.u32 %v8413_v60, %v6757_v31  ;;  %v6741_v33 = vld [vmem:[#allocation8 + $0x50] sm:$0xf0] }
 0x1c7   :  { %4321 = vmatpush.bf16.msrb.mxu2 %v7524_v57  ;;  %v6917_v57 = vld [vmem:[#allocation8 + $0x1b0] sm:$0xf0]  ;;  %v7064_v32 = vor.u32 %v8489_v20, %v7061_v24  ;;  %v6872_v24 = vor.u32 %v8441_v13, %v6869_v14  ;;  %v8549_v14 = vld [vmem:[#allocation8 + $0x4a4] sm:$0xf] }
 0x1c8   :  { %v6920_v40 = vor.u32 %v8453_v30, %v6917_v57  ;;  %v6997_v20 = vld [vmem:[#allocation8 + $0x250] sm:$0xf0] }
 0x1c9   :  { %4296 = vmatpush.bf16.msrb.mxu0 %v7252_v19  ;;  %v7700_v19 = vor.u32 %v8651_v28, %v7699_v34  ;;  %v8635_v34 = vld [vmem:[#allocation8 + $0x74c] sm:$0xf0]  ;;  %v8437_v28 = vld [vmem:[#allocation8 + $0x124] sm:$0xf]  ;;  %v6853_v30 = vld [vmem:[#allocation8 + $0x130] sm:$0xf0] }
 0x1ca   :  { %4309 = vmatpush.bf16.msrb.mxu1 %v7380_v37  ;;  %v8485_v37 = vld [vmem:[#allocation8 + $0x2a4] sm:$0xf]  ;;  %v7636_v57 = vor.u32 %v8635_v34, %v7635_v25  ;;  %v6856_v41 = vor.u32 %v8437_v28, %v6853_v30  ;;  %v7461_v60 = vld [vmem:[#allocation8 + $0x5f0] sm:$0xf0] }
 0x1cb   :  { %4322 = vmatpush.bf16.msrb.mxu2 %v7508_v43  ;;  %4331 = vmatpush.bf16.msrb.mxu3 %v7700_v19  ;;  %v8647_v43 = vld [vmem:[#allocation8 + $0x7ac] sm:$0xf0]  ;;  %v7048_v38 = vor.u32 %v8485_v37, %v7045_v39  ;;  %v6709_v39 = vld [vmem:[#allocation8 + $0x10] sm:$0xf0]  ;;  %v8517_v34 = vld [vmem:[#allocation8 + $0x3a4] sm:$0xf] }
 0x1cc   :  { %v7684_v47 = vor.u32 %v8647_v43, %v7683_v42  ;;  %v8433_v42 = vld [vmem:[#allocation8 + $0x104] sm:$0xf]  ;;  %v7619_v43 = vld [vmem:[#allocation8 + $0x720] sm:$0xf]  ;;  %v6965_v31 = vld [vmem:[#allocation8 + $0x210] sm:$0xf0] }
 0x1cd   :  { %4297 = vmatpush.bf16.msrb.mxu0 %v7236_v45  ;;  %v8449_v45 = vld [vmem:[#allocation8 + $0x184] sm:$0xf]  ;;  %v7285_v25 = vld [vmem:[#allocation8 + $0x490] sm:$0xf0] }
 0x1ce   :  { %4310 = vmatpush.bf16.msrb.mxu1 %v7364_v54  ;;  %v6904_v62 = vor.u32 %v8449_v45, %v6901_v46  ;;  %v8631_v45 = vld [vmem:[#allocation8 + $0x72c] sm:$0xf0]  ;;  %v6837_v46 = vld [vmem:[#allocation8 + $0x110] sm:$0xf0]  ;;  %v8577_v30 = vld [vmem:[#allocation8 + $0x584] sm:$0xf] }
 0x1cf   :  { %4323 = vmatpush.bf16.msrb.mxu2 %v7492_v52  ;;  %4332 = vmatpush.bf16.msrb.mxu3 %v7684_v47  ;;  %v6885_v52 = vld [vmem:[#allocation8 + $0x170] sm:$0xf0]  ;;  %v8557_v47 = vld [vmem:[#allocation8 + $0x4e4] sm:$0xf]  ;;  %v6840_v1 = vor.u32 %v8433_v42, %v6837_v46 }
 0x1d0   :  { %v2543_v63 = vpop.f32.mrf.mxu1  ;;  %v6888_v11 = vor.u32 %v8445_v3, %v6885_v52  ;;  %v8553_v3 = vld [vmem:[#allocation8 + $0x4c4] sm:$0xf]  ;;  %v7317_v52 = vld [vmem:[#allocation8 + $0x4d0] sm:$0xf0] }
 0x1d1   :  { %4298 = vmatpush.bf16.msrb.mxu0 %v7220_v6  ;;  %v7320_v13 = vor.u32 %v8553_v3, %v7317_v52  ;;  %v7173_v28 = vld [vmem:[#allocation8 + $0x3b0] sm:$0xf0]  ;;  %v8533_v3 = vld [vmem:[#allocation8 + $0x424] sm:$0xf] }
 0x1d2   :  { %4311 = vmatpush.bf16.msrb.mxu1 %v7348_v9  ;;  %v8409_v9 = vld [vmem:[#allocation8 + $0x44] sm:$0xf] }
 0x1d3   :  { %4324 = vmatpush.bf16.msrb.mxu2 %v7476_v17  ;;  %v2530_v54 = vpop.f32.mrf.mxu0  ;;  %4333 = vmatpush.bf16.msrb.mxu3 %v7668_v5  ;;  %v6744_v17 = vor.u32 %v8409_v9, %v6741_v33  ;;  %v7445_v9 = vld [vmem:[#allocation8 + $0x5d0] sm:$0xf0] }
 0x1d4   :  { %4299 = vmatmul.bf16.vlgmr.msrb.gmra.mxu0 %v9339_v15  ;;  %v2531_v21 = vadd.f32 %v2530_v54, %v2518_v29  ;;  %v6981_v29 = vld [vmem:[#allocation8 + $0x230] sm:$0xf0]  ;;  %v7620_v54 = vor.u32 %v8631_v45, %v7619_v43  ;;  %v8573_v43 = vld [vmem:[#allocation8 + $0x564] sm:$0xf] }
 0x1d5   :  { %4343 = vmatpush.bf16.msra.mxu0 %v6824_v10  ;;  %v8477_v10 = vld [vmem:[#allocation8 + $0x264] sm:$0xf]  ;;  %v7205_v33 = vld [vmem:[#allocation8 + $0x3f0] sm:$0xf0] }
 0x1d6   :  { %4356 = vmatpush.bf16.msra.mxu1 %v6952_v58  ;;  %v2544_v6 = vadd.f32 %v2543_v63, %v2531_v21  ;;  %v8639_v58 = vld [vmem:[#allocation8 + $0x76c] sm:$0xf0]  ;;  %v7016_v16 = vor.u32 %v8477_v10, %v7013_v0  ;;  %v8465_v63 = vld [vmem:[#allocation8 + $0x204] sm:$0xf]  ;;  %v7397_v45 = vld [vmem:[#allocation8 + $0x570] sm:$0xf0] }
 0x1d7   :  { %4369 = vmatpush.bf16.msra.mxu2 %v7080_v18  ;;  %v7652_v22 = vor.u32 %v8639_v58, %v7651_v12  ;;  %v6968_v10 = vor.u32 %v8465_v63, %v6965_v31  ;;  %v529_v12 = vperm.slane %v9291_v44, 6 }
 0x1d8   :  { %8777 = vtanh.f32 %v2544_v6  ;;  %v9344_v50 = vpop.f32.mrf.mxu2  ;;  %v2545_v2 = vpop.f32.mrf.mxu1  ;;  %v8585_v6 = vld [vmem:[#allocation8 + $0x5c4] sm:$0xf] }
 0x1d9   :  { %4344 = vmatpush.bf16.msra.mxu0 %v6808_v56  ;;  %4334 = vmatpush.bf16.msrb.mxu3 %v7652_v22  ;;  %v7448_v22 = vor.u32 %v8585_v6, %v7445_v9  ;;  %v7237_v6 = vld [vmem:[#allocation8 + $0x430] sm:$0xf0]  ;;  %v8565_v9 = vld [vmem:[#allocation8 + $0x524] sm:$0xf] }
 0x1da   :  { %4357 = vmatpush.bf16.msra.mxu1 %v6936_v4  ;;  %v9346_v56 = vpop.f32.mrf.mxu3  ;;  %v6725_v4 = vld [vmem:[#allocation8 + $0x30] sm:$0xf0] }
 0x1db   :  { %4370 = vmatpush.bf16.msra.mxu2 %v7064_v32  ;;  %v2532_v18 = vpop.f32.mrf.mxu0  ;;  %v8401_v32 = vld [vmem:[#allocation8 + $0x4] sm:$0xf]  ;;  %v6728_v37 = vor.u32 %v8405_v49, %v6725_v4  ;;  %v7189_v49 = vld [vmem:[#allocation8 + $0x3d0] sm:$0xf0] }
 0x1dc   :  { %v6712_v21 = vor.u32 %v8401_v32, %v6709_v39  ;;  %v8581_v18 = vld [vmem:[#allocation8 + $0x5a4] sm:$0xf]  ;;  %v7176_v32 = vor.u32 %v8517_v34, %v7173_v28  ;;  %v7269_v39 = vld [vmem:[#allocation8 + $0x470] sm:$0xf0] }
 0x1dd   :  { %4345 = vmatpush.bf16.msra.mxu0 %v6792_v35  ;;  %v7000_v35 = vor.u32 %v8473_v23, %v6997_v20  ;;  %4335 = vmatpush.bf16.msrb.mxu3 %v7636_v57  ;;  %v7429_v23 = vld [vmem:[#allocation8 + $0x5b0] sm:$0xf0]  ;;  %v2557_v20 = vadd.f32 %v9344_v50, %v529_v12  ;;  %v8545_v4 = vld [vmem:[#allocation8 + $0x484] sm:$0xf] }
 0x1de   :  { %4358 = vmatpush.bf16.msra.mxu1 %v6920_v40  ;;  %v8778_v19 = vpop.eup %8777  ;;  %v8469_v40 = vld [vmem:[#allocation8 + $0x224] sm:$0xf]  ;;  %v7432_v2 = vor.u32 %v8581_v18, %v7429_v23  ;;  %v7413_v57 = vld [vmem:[#allocation8 + $0x590] sm:$0xf0] }
 0x1df   :  { %4371 = vmatpush.bf16.msra.mxu2 %v7048_v38  ;;  %v9348_v36 = vpack.c.bf16 %v8778_v19, %v8778_v19  ;;  %v7333_v38 = vld [vmem:[#allocation8 + $0x4f0] sm:$0xf0]  ;;  %v6984_v61 = vor.u32 %v8469_v40, %v6981_v29  ;;  %v2570_v19 = vadd.f32 %v9346_v56, %v2557_v20  ;;  %v7416_v50 = vor.u32 %v8577_v30, %v7413_v57  ;;  %v8513_v40 = vld [vmem:[#allocation8 + $0x384] sm:$0xf]  ;;  %v6827_v20 = vld [vmem:[#allocation8 + $0xe8] sm:$0xf] }
 0x1e0   :  { %v2558_v26 = vpop.f32.mrf.mxu2  ;;  %v7336_v59 = vor.u32 %v8557_v47, %v7333_v38  ;;  %v7157_v29 = vld [vmem:[#allocation8 + $0x390] sm:$0xf0]  ;;  %v8537_v38 = vld [vmem:[#allocation8 + $0x444] sm:$0xf] }
 0x1e1   :  { %4346 = vmatpush.bf16.msra.mxu0 %v6776_v55  ;;  %4312 = vmatmul.bf16.vlgmr.msrb.gmra.mxu1 %v9348_v36  ;;  %v8589_v55 = vld [vmem:[#allocation8 + $0x5e4] sm:$0xf]  ;;  %v7160_v47 = vor.u32 %v8513_v40, %v7157_v29  ;;  %v7109_v18 = vld [vmem:[#allocation8 + $0x330] sm:$0xf0]  ;;  %v6811_v40 = vld [vmem:[#allocation8 + $0xc8] sm:$0xf] }
 0x1e2   :  { %4359 = vmatpush.bf16.msra.mxu1 %v6904_v62  ;;  %v2571_v62 = vpop.f32.mrf.mxu3  ;;  %4336 = vmatpush.bf16.msrb.mxu3 %v7620_v54  ;;  %v7464_v5 = vor.u32 %v8589_v55, %v7461_v60  ;;  %v7400_v55 = vor.u32 %v8573_v43, %v7397_v45  ;;  %v7253_v60 = vld [vmem:[#allocation8 + $0x450] sm:$0xf0]  ;;  %v8509_v26 = vld [vmem:[#allocation8 + $0x364] sm:$0xf]  ;;  %v8428_v29 = vld [vmem:[#allocation8 + $0xd4] sm:$0xf0] }
 0x1e3   :  { %4372 = vmatpush.bf16.msra.mxu2 %v7032_v7  ;;  %v7603_v7 = vld [vmem:[#allocation8 + $0x700] sm:$0xf]  ;;  %v7381_v62 = vld [vmem:[#allocation8 + $0x550] sm:$0xf0]  ;;  %v8497_v43 = vld [vmem:[#allocation8 + $0x304] sm:$0xf] }
 0x1e4   :  { %v7349_v23 = vld [vmem:[#allocation8 + $0x510] sm:$0xf0] }
 0x1e5   :  { %4347 = vmatpush.bf16.msra.mxu0 %v6760_v8  ;;  %v8627_v8 = vld [vmem:[#allocation8 + $0x70c] sm:$0xf0]  ;;  %v7093_v45 = vld [vmem:[#allocation8 + $0x310] sm:$0xf0] }
 0x1e6   :  { %4360 = vmatpush.bf16.msra.mxu1 %v6888_v11  ;;  %v7604_v0 = vor.u32 %v8627_v8, %v7603_v7  ;;  %v8525_v11 = vld [vmem:[#allocation8 + $0x3e4] sm:$0xf]  ;;  %v7125_v8 = vld [vmem:[#allocation8 + $0x350] sm:$0xf0] }
 0x1e7   :  { %4373 = vmatpush.bf16.msra.mxu2 %v7016_v16  ;;  %v7208_v58 = vor.u32 %v8525_v11, %v7205_v33  ;;  %v7301_v16 = vld [vmem:[#allocation8 + $0x4b0] sm:$0xf0]  ;;  %v8505_v7 = vld [vmem:[#allocation8 + $0x344] sm:$0xf] }
 0x1e8   :  { %4337 = vmatpush.bf16.msrb.mxu3 %v7604_v0  ;;  %v8529_v33 = vld [vmem:[#allocation8 + $0x404] sm:$0xf]  ;;  %v7128_v12 = vor.u32 %v8505_v7, %v7125_v8  ;;  %v6907_v8 = vld [vmem:[#allocation8 + $0x188] sm:$0xf] }
 0x1e9   :  { %4348 = vmatpush.bf16.msra.mxu0 %v6744_v17  ;;  %v8521_v17 = vld [vmem:[#allocation8 + $0x3c4] sm:$0xf] }
 0x1ea   :  { %4361 = vmatpush.bf16.msra.mxu1 %v6872_v24  ;;  %v7192_v44 = vor.u32 %v8521_v17, %v7189_v49  ;;  %v7304_v24 = vor.u32 %v8549_v14, %v7301_v16  ;;  %v8561_v14 = vld [vmem:[#allocation8 + $0x504] sm:$0xf]  ;;  %v7589_v17 = vld [vmem:[#allocation8 + $0x6f0] sm:$0xf0] }
 0x1eb   :  { %4374 = vmatpush.bf16.msra.mxu2 %v7000_v35  ;;  %v7288_v35 = vor.u32 %v8545_v4, %v7285_v25  ;;  %v8501_v49 = vld [vmem:[#allocation8 + $0x324] sm:$0xf]  ;;  %v8464_v4 = vld [vmem:[#allocation8 + $0x1f4] sm:$0xf0] }
 0x1ec   :  { %4382 = vmatpush.bf16.msra.mxu3 %v7208_v58  ;;  %v7240_v58 = vor.u32 %v8533_v3, %v7237_v6  ;;  %v7112_v25 = vor.u32 %v8501_v49, %v7109_v18  ;;  %v6779_v3 = vld [vmem:[#allocation8 + $0x88] sm:$0xf]  ;;  %v8798_v6 = vld [vmem:[#allocation7] sm:$0xff] }
 0x1ed   :  { %4349 = vmatpush.bf16.msra.mxu0 %v6728_v37  ;;  %v8541_v37 = vld [vmem:[#allocation8 + $0x464] sm:$0xf]  ;;  %v530_v7 = vperm.slane %v8798_v6, 7  ;;  %v8592_v6 = vld [vmem:[#allocation8 + $0x5f4] sm:$0xf0] }
 0x1ee   :  { %4362 = vmatpush.bf16.msra.mxu1 %v6856_v41  ;;  %v7272_v56 = vor.u32 %v8541_v37, %v7269_v39  ;;  %v8617_v37 = vld [vmem:[#allocation8 + $0x6c4] sm:$0xf] }
 0x1ef   :  { %4375 = vmatpush.bf16.msra.mxu2 %v6984_v61  ;;  %v7141_v61 = vld [vmem:[#allocation8 + $0x370] sm:$0xf0] }
 0x1f0   :  { %4383 = vmatpush.bf16.msra.mxu3 %v7192_v44  ;;  %v2595_v42 = vpop.f32.mrf.mxu1  ;;  %v7144_v31 = vor.u32 %v8509_v26, %v7141_v61  ;;  %v8432_v44 = vld [vmem:[#allocation8 + $0xf4] sm:$0xf0]  ;;  %v6923_v61 = vld [vmem:[#allocation8 + $0x1a8] sm:$0xf] }
 0x1f1   :  { %4350 = vmatpush.bf16.msra.mxu0 %v6712_v21  ;;  %v8569_v21 = vld [vmem:[#allocation8 + $0x544] sm:$0xf]  ;;  %v8424_v26 = vld [vmem:[#allocation8 + $0xb4] sm:$0xf0] }
 0x1f2   :  { %4363 = vmatpush.bf16.msra.mxu1 %v6840_v1  ;;  %v7384_v52 = vor.u32 %v8569_v21, %v7381_v62  ;;  %v8456_v21 = vld [vmem:[#allocation8 + $0x1b4] sm:$0xf0] }
 0x1f3   :  { %4376 = vmatpush.bf16.msra.mxu2 %v6968_v10  ;;  %v2582_v41 = vpop.f32.mrf.mxu0  ;;  %v7365_v10 = vld [vmem:[#allocation8 + $0x530] sm:$0xf0] }
 0x1f4   :  { %4351 = vmatmul.bf16.vlgmr.msra.gmra.mxu0 %v9316_v48  ;;  %v2583_v46 = vadd.f32 %v2582_v41, %v2570_v19  ;;  %4384 = vmatpush.bf16.msra.mxu3 %v7176_v32  ;;  %v7368_v16 = vor.u32 %v8565_v9, %v7365_v10  ;;  %v7352_v19 = vor.u32 %v8561_v14, %v7349_v23  ;;  %v6939_v41 = vld [vmem:[#allocation8 + $0x1c8] sm:$0xf]  ;;  %v8452_v9 = vld [vmem:[#allocation8 + $0x194] sm:$0xf0] }
 0x1f5   :  { %4395 = vmatpush.bf16.msrb.mxu0 %v7336_v59  ;;  %4364 = vmatmul.bf16.vlgmr.msra.gmra.mxu1 %v9318_v51  ;;  %v7256_v59 = vor.u32 %v8537_v38, %v7253_v60  ;;  %v6828_v32 = vor.u32 %v8432_v44, %v6827_v20  ;;  %v8613_v38 = vld [vmem:[#allocation8 + $0x6a4] sm:$0xf]  ;;  %v6795_v60 = vld [vmem:[#allocation8 + $0xa8] sm:$0xf] }
 0x1f6   :  { %4408 = vmatpush.bf16.msrb.mxu1 %v7464_v5  ;;  %v2596_v54 = vadd.f32 %v2595_v42, %v2583_v46  ;;  %v8460_v42 = vld [vmem:[#allocation8 + $0x1d4] sm:$0xf0]  ;;  %v8601_v44 = vld [vmem:[#allocation8 + $0x644] sm:$0xf] }
 0x1f8   :  { %v2608_v63 = vpop.f32.mrf.mxu2  ;;  %4385 = vmatpush.bf16.msra.mxu3 %v7160_v47  ;;  %v2597_v11 = vpop.f32.mrf.mxu1  ;;  %v7096_v47 = vor.u32 %v8497_v43, %v7093_v45  ;;  %v6859_v43 = vld [vmem:[#allocation8 + $0x128] sm:$0xf]  ;;  %v8440_v45 = vld [vmem:[#allocation8 + $0x134] sm:$0xf0] }
 0x1f9   :  { %4396 = vmatpush.bf16.msrb.mxu0 %v7320_v13  ;;  %v2609_v1 = vadd.f32 %v2608_v63, %v2596_v54  ;;  %v7221_v13 = vld [vmem:[#allocation8 + $0x410] sm:$0xf0]  ;;  %v6796_v63 = vor.u32 %v8424_v26, %v6795_v60  ;;  %v8605_v11 = vld [vmem:[#allocation8 + $0x664] sm:$0xf]  ;;  %v6715_v60 = vld [vmem:[#allocation8 + $0x8] sm:$0xf] }
 0x1fa   :  { %4409 = vmatpush.bf16.msrb.mxu1 %v7448_v22  ;;  %v9356_v5 = vpop.f32.mrf.mxu3  ;;  %v8621_v22 = vld [vmem:[#allocation8 + $0x6e4] sm:$0xf]  ;;  %v7224_v28 = vor.u32 %v8529_v33, %v7221_v13  ;;  %v7557_v54 = vld [vmem:[#allocation8 + $0x6b0] sm:$0xf0]  ;;  %v8416_v13 = vld [vmem:[#allocation8 + $0x74] sm:$0xf0] }
 0x1fb   :  { %8779 = vtanh.f32 %v2609_v1  ;;  %v2584_v0 = vpop.f32.mrf.mxu0  ;;  %v7592_v30 = vor.u32 %v8621_v22, %v7589_v17  ;;  %v7560_v62 = vor.u32 %v8613_v38, %v7557_v54  ;;  %v7541_v1 = vld [vmem:[#allocation8 + $0x690] sm:$0xf0]  ;;  %v2622_v14 = vadd.f32 %v9356_v5, %v530_v7  ;;  %v8448_v17 = vld [vmem:[#allocation8 + $0x174] sm:$0xf0] }
 0x1fc   :  { %4386 = vmatpush.bf16.msra.mxu3 %v7144_v31  ;;  %v8609_v31 = vld [vmem:[#allocation8 + $0x684] sm:$0xf]  ;;  %v7525_v33 = vld [vmem:[#allocation8 + $0x670] sm:$0xf0]  ;;  %v8404_v26 = vld [vmem:[#allocation8 + $0x14] sm:$0xf0] }
 0x1fd   :  { %4397 = vmatpush.bf16.msrb.mxu0 %v7304_v24  ;;  %v6955_v24 = vld [vmem:[#allocation8 + $0x1e8] sm:$0xf]  ;;  %v7544_v10 = vor.u32 %v8609_v31, %v7541_v1  ;;  %v7528_v18 = vor.u32 %v8605_v11, %v7525_v33  ;;  %v8436_v31 = vld [vmem:[#allocation8 + $0x114] sm:$0xf0]  ;;  %v6716_v7 = vor.u32 %v8404_v26, %v6715_v60  ;;  %v8653_v11 = vld [vmem:[#allocation8 + $0x7e4] sm:$0xf] }
 0x1fe   :  { %4410 = vmatpush.bf16.msrb.mxu1 %v7432_v2  ;;  %v6956_v39 = vor.u32 %v8464_v4, %v6955_v24  ;;  %v7509_v24 = vld [vmem:[#allocation8 + $0x650] sm:$0xf0]  ;;  %v7339_v1 = vld [vmem:[#allocation8 + $0x4e8] sm:$0xf]  ;;  %v8641_v26 = vld [vmem:[#allocation8 + $0x784] sm:$0xf] }
 0x1ff   :  { %v7512_v5 = vor.u32 %v8601_v44, %v7509_v24  ;;  %v7717_v33 = vld [vmem:[#allocation8 + $0x7f0] sm:$0xf0] }
 0x200   :  { %v2610_v2 = vpop.f32.mrf.mxu2  ;;  %4387 = vmatpush.bf16.msra.mxu3 %v7128_v12  ;;  %v6908_v12 = vor.u32 %v8452_v9, %v6907_v8 }
 0x201   :  { %4398 = vmatpush.bf16.msrb.mxu0 %v7288_v35  ;;  %v8780_v34 = vpop.eup %8779  ;;  %v6747_v2 = vld [vmem:[#allocation8 + $0x48] sm:$0xf] }
 0x202   :  { %4411 = vmatpush.bf16.msrb.mxu1 %v7416_v50  ;;  %v9358_v57 = vpack.c.bf16 %v8780_v34, %v8780_v34  ;;  %v2623_v35 = vpop.f32.mrf.mxu3  ;;  %v7573_v50 = vld [vmem:[#allocation8 + $0x6d0] sm:$0xf0]  ;;  %v6875_v34 = vld [vmem:[#allocation8 + $0x148] sm:$0xf] }
 0x203   :  { %v7576_v46 = vor.u32 %v8617_v37, %v7573_v50  ;;  %v7493_v35 = vld [vmem:[#allocation8 + $0x630] sm:$0xf0] }
 0x204   :  { %4325 = vmatmul.bf16.vlgmr.msrb.gmra.mxu2 %v9358_v57  ;;  %4388 = vmatpush.bf16.msra.mxu3 %v7112_v25  ;;  %v8412_v25 = vld [vmem:[#allocation8 + $0x54] sm:$0xf0] }
 0x205   :  { %4399 = vmatpush.bf16.msrb.mxu0 %v7272_v56  ;;  %4421 = vmatpush.bf16.msrb.mxu2 %v7592_v30  ;;  %v6812_v56 = vor.u32 %v8428_v29, %v6811_v40  ;;  %v8408_v40 = vld [vmem:[#allocation8 + $0x34] sm:$0xf0] }
 0x206   :  { %4412 = vmatpush.bf16.msrb.mxu1 %v7400_v55  ;;  %v6940_v55 = vor.u32 %v8460_v42, %v6939_v41 }
 0x208   :  { %4389 = vmatpush.bf16.msra.mxu3 %v7096_v47 }
 0x209   :  { %4400 = vmatpush.bf16.msrb.mxu0 %v7256_v59  ;;  %4422 = vmatpush.bf16.msrb.mxu2 %v7576_v46  ;;  %v6924_v59 = vor.u32 %v8456_v21, %v6923_v61  ;;  %v6860_v61 = vor.u32 %v8440_v45, %v6859_v43  ;;  %v6843_v21 = vld [vmem:[#allocation8 + $0x108] sm:$0xf]  ;;  %v8484_v43 = vld [vmem:[#allocation8 + $0x294] sm:$0xf0] }
 0x20a   :  { %4413 = vmatpush.bf16.msrb.mxu1 %v7384_v52  ;;  %v8420_v52 = vld [vmem:[#allocation8 + $0x94] sm:$0xf0]  ;;  %v7291_v45 = vld [vmem:[#allocation8 + $0x488] sm:$0xf] }
 0x20b   :  { %v6780_v0 = vor.u32 %v8420_v52, %v6779_v3  ;;  %v7467_v52 = vld [vmem:[#allocation8 + $0x5e8] sm:$0xf] }
 0x20d   :  { %4401 = vmatpush.bf16.msrb.mxu0 %v7240_v58  ;;  %4423 = vmatpush.bf16.msrb.mxu2 %v7560_v62  ;;  %v6763_v58 = vld [vmem:[#allocation8 + $0x68] sm:$0xf] }
 0x20e   :  { %4414 = vmatpush.bf16.msrb.mxu1 %v7368_v16  ;;  %v6891_v16 = vld [vmem:[#allocation8 + $0x168] sm:$0xf]  ;;  %v6764_v20 = vor.u32 %v8416_v13, %v6763_v58  ;;  %v7468_v13 = vor.u32 %v8592_v6, %v7467_v52  ;;  %v8576_v52 = vld [vmem:[#allocation8 + $0x574] sm:$0xf0] }
 0x20f   :  { %v6892_v4 = vor.u32 %v8448_v17, %v6891_v16  ;;  %v7083_v62 = vld [vmem:[#allocation8 + $0x2e8] sm:$0xf]  ;;  %v8556_v16 = vld [vmem:[#allocation8 + $0x4d4] sm:$0xf0] }
 0x210   :  { %v7451_v17 = vld [vmem:[#allocation8 + $0x5c8] sm:$0xf] }
 0x211   :  { %4402 = vmatpush.bf16.msrb.mxu0 %v7224_v28  ;;  %v2634_v22 = vpop.f32.mrf.mxu0  ;;  %v2647_v49 = vpop.f32.mrf.mxu1  ;;  %4424 = vmatpush.bf16.msrb.mxu2 %v7544_v10  ;;  %v8444_v28 = vld [vmem:[#allocation8 + $0x154] sm:$0xf0]  ;;  %v6844_v10 = vor.u32 %v8436_v31, %v6843_v21  ;;  %v7019_v21 = vld [vmem:[#allocation8 + $0x268] sm:$0xf] }
 0x212   :  { %4415 = vmatpush.bf16.msrb.mxu1 %v7352_v19  ;;  %v2635_v23 = vadd.f32 %v2634_v22, %v2622_v14  ;;  %v6748_v19 = vor.u32 %v8412_v25, %v6747_v2  ;;  %v6876_v50 = vor.u32 %v8444_v28, %v6875_v34  ;;  %v8492_v14 = vld [vmem:[#allocation8 + $0x2d4] sm:$0xf0]  ;;  %v7323_v22 = vld [vmem:[#allocation8 + $0x4c8] sm:$0xf]  ;;  %v7701_v2 = vld [vmem:[#allocation8 + $0x7d0] sm:$0xf0] }
 0x213   :  { %v7324_v24 = vor.u32 %v8556_v16, %v7323_v22  ;;  %v7051_v25 = vld [vmem:[#allocation8 + $0x2a8] sm:$0xf]  ;;  %v8488_v28 = vld [vmem:[#allocation8 + $0x2b4] sm:$0xf0] }
 0x214   :  { %4403 = vmatmul.bf16.vlgmr.msrb.gmra.mxu0 %v9339_v15  ;;  %4377 = vmatmul.bf16.vlgmr.msra.gmra.mxu2 %v9320_v53  ;;  %v2648_v30 = vadd.f32 %v2647_v49, %v2635_v23  ;;  %v8588_v49 = vld [vmem:[#allocation8 + $0x5d4] sm:$0xf0]  ;;  %v7720_v23 = vor.u32 %v8653_v11, %v7717_v33  ;;  %v7275_v31 = vld [vmem:[#allocation8 + $0x468] sm:$0xf]  ;;  %v7653_v11 = vld [vmem:[#allocation8 + $0x770] sm:$0xf0] }
 0x215   :  { %4447 = vmatpush.bf16.msra.mxu0 %v6828_v32  ;;  %4416 = vmatmul.bf16.vlgmr.msrb.gmra.mxu1 %v9348_v36  ;;  %v8597_v32 = vld [vmem:[#allocation8 + $0x624] sm:$0xf]  ;;  %v7452_v34 = vor.u32 %v8588_v49, %v7451_v17  ;;  %v7003_v33 = vld [vmem:[#allocation8 + $0x248] sm:$0xf]  ;;  %v8540_v22 = vld [vmem:[#allocation8 + $0x454] sm:$0xf0] }
 0x216   :  { %4460 = vmatpush.bf16.msra.mxu1 %v6956_v39  ;;  %4425 = vmatpush.bf16.msrb.mxu2 %v7528_v18  ;;  %v6731_v39 = vld [vmem:[#allocation8 + $0x28] sm:$0xf]  ;;  %v7496_v47 = vor.u32 %v8597_v32, %v7493_v35  ;;  %v8584_v32 = vld [vmem:[#allocation8 + $0x5b4] sm:$0xf0] }
 0x217   :  { %v6732_v54 = vor.u32 %v8408_v40, %v6731_v39  ;;  %v7685_v40 = vld [vmem:[#allocation8 + $0x7b0] sm:$0xf0]  ;;  %v7387_v16 = vld [vmem:[#allocation8 + $0x548] sm:$0xf]  ;;  %v8572_v17 = vld [vmem:[#allocation8 + $0x554] sm:$0xf0] }
 0x219   :  { %4448 = vmatpush.bf16.msra.mxu0 %v6812_v56  ;;  %v2660_v37 = vpop.f32.mrf.mxu2  ;;  %v2636_v42 = vpop.f32.mrf.mxu0  ;;  %v8593_v56 = vld [vmem:[#allocation8 + $0x604] sm:$0xf] }
 0x21a   :  { %4461 = vmatpush.bf16.msra.mxu1 %v6940_v55  ;;  %v2661_v29 = vadd.f32 %v2660_v37, %v2648_v30  ;;  %v2649_v46 = vpop.f32.mrf.mxu1  ;;  %4426 = vmatpush.bf16.msrb.mxu2 %v7512_v5  ;;  %v7477_v55 = vld [vmem:[#allocation8 + $0x610] sm:$0xf0]  ;;  %v7307_v5 = vld [vmem:[#allocation8 + $0x4a8] sm:$0xf]  ;;  %v8552_v30 = vld [vmem:[#allocation8 + $0x4b4] sm:$0xf0] }
 0x21b   :  { %v2673_v41 = vpop.f32.mrf.mxu3  ;;  %v7480_v3 = vor.u32 %v8593_v56, %v7477_v55  ;;  %v8645_v37 = vld [vmem:[#allocation8 + $0x7a4] sm:$0xf]  ;;  %v7308_v39 = vor.u32 %v8552_v30, %v7307_v5  ;;  %v8548_v46 = vld [vmem:[#allocation8 + $0x494] sm:$0xf0] }
 0x21c   :  { %v2674_v38 = vadd.f32 %v2673_v41, %v2661_v29  ;;  %v9371_v29 = vld [vmem:[#allocation10] sm:$0xf]  ;;  %v7035_v41 = vld [vmem:[#allocation8 + $0x288] sm:$0xf]  ;;  %v8580_v56 = vld [vmem:[#allocation8 + $0x594] sm:$0xf0]  ;;  %v7292_v60 = vor.u32 %v8548_v46, %v7291_v45 }
 0x21d   :  { %4449 = vmatpush.bf16.msra.mxu0 %v6796_v63  ;;  %v8496_v63 = vld [vmem:[#allocation8 + $0x2f4] sm:$0xf0]  ;;  %v7036_v55 = vor.u32 %v8484_v43, %v7035_v41  ;;  %v7621_v41 = vld [vmem:[#allocation8 + $0x730] sm:$0xf0]  ;;  %v6971_v46 = vld [vmem:[#allocation8 + $0x208] sm:$0xf] }
 0x21e   :  { %4462 = vmatpush.bf16.msra.mxu1 %v6924_v59  ;;  %8781 = vtanh.f32 %v2674_v38  ;;  %v8560_v59 = vld [vmem:[#allocation8 + $0x4f4] sm:$0xf0]  ;;  %4427 = vmatpush.bf16.msrb.mxu2 %v7496_v47  ;;  %v7084_v8 = vor.u32 %v8496_v63, %v7083_v62  ;;  %v7419_v47 = vld [vmem:[#allocation8 + $0x588] sm:$0xf]  ;;  %v7688_v38 = vor.u32 %v8645_v37, %v7685_v40  ;;  %v8629_v40 = vld [vmem:[#allocation8 + $0x724] sm:$0xf] }
 0x21f   :  { %v7420_v62 = vor.u32 %v8580_v56, %v7419_v47  ;;  %v8480_v63 = vld [vmem:[#allocation8 + $0x274] sm:$0xf0]  ;;  %v7227_v56 = vld [vmem:[#allocation8 + $0x408] sm:$0xf] }
 0x220   :  { %v8536_v5 = vld [vmem:[#allocation8 + $0x434] sm:$0xf0] }
 0x221   :  { %4450 = vmatpush.bf16.msra.mxu0 %v6780_v0  ;;  %v2662_v9 = vpop.f32.mrf.mxu2  ;;  %v7340_v0 = vor.u32 %v8560_v59, %v7339_v1  ;;  %v8544_v1 = vld [vmem:[#allocation8 + $0x474] sm:$0xf0] }
 0x222   :  { %4463 = vmatpush.bf16.msra.mxu1 %v6908_v12  ;;  %v7067_v12 = vld [vmem:[#allocation8 + $0x2c8] sm:$0xf]  ;;  %4428 = vmatpush.bf16.msrb.mxu2 %v7480_v3  ;;  %v7020_v9 = vor.u32 %v8480_v63, %v7019_v21  ;;  %v8568_v37 = vld [vmem:[#allocation8 + $0x534] sm:$0xf0]  ;;  %v8430_v21 = vld [vmem:[#allocation8 + $0xec] sm:$0xf] }
 0x223   :  { %v2675_v58 = vpop.f32.mrf.mxu3  ;;  %v7068_v44 = vor.u32 %v8492_v14, %v7067_v12  ;;  %v7403_v3 = vld [vmem:[#allocation8 + $0x568] sm:$0xf]  ;;  %v8468_v47 = vld [vmem:[#allocation8 + $0x214] sm:$0xf0]  ;;  %v6829_v63 = vld [vmem:[#allocation8 + $0xf8] sm:$0xf0] }
 0x224   :  { %v8782_v18 = vpop.eup %8781  ;;  %v7404_v58 = vor.u32 %v8576_v52, %v7403_v3  ;;  %v7259_v14 = vld [vmem:[#allocation8 + $0x448] sm:$0xf]  ;;  %v8625_v52 = vld [vmem:[#allocation8 + $0x704] sm:$0xf] }
 0x225   :  { %4451 = vmatpush.bf16.msra.mxu0 %v6764_v20  ;;  %v9365_v20 = vpack.c.bf16 %v8782_v18, %v8782_v18  ;;  %4429 = vmatmul.bf16.vlgmr.msrb.gmra.mxu2 %v9358_v57 }
 0x226   :  { %4464 = vmatpush.bf16.msra.mxu1 %v6892_v4  ;;  %4473 = vmatpush.bf16.msra.mxu2 %v7084_v8  ;;  %v8649_v4 = vld [vmem:[#allocation8 + $0x7c4] sm:$0xf] }
 0x227   :  { %4338 = vmatmul.bf16.vlgmr.msrb.gmra.mxu3 %v9365_v20  ;;  %v7704_v35 = vor.u32 %v8649_v4, %v7701_v2  ;;  %v6987_v4 = vld [vmem:[#allocation8 + $0x228] sm:$0xf] }
 0x228   :  { %4434 = vmatpush.bf16.msrb.mxu3 %v7720_v23  ;;  %v7260_v23 = vor.u32 %v8540_v22, %v7259_v14  ;;  %v8426_v14 = vld [vmem:[#allocation8 + $0xcc] sm:$0xf] }
 0x229   :  { %4452 = vmatpush.bf16.msra.mxu0 %v6748_v19  ;;  %v7435_v19 = vld [vmem:[#allocation8 + $0x5a8] sm:$0xf] }
 0x22a   :  { %4465 = vmatpush.bf16.msra.mxu1 %v6876_v50  ;;  %4474 = vmatpush.bf16.msra.mxu2 %v7068_v44  ;;  %v7052_v50 = vor.u32 %v8488_v28, %v7051_v25  ;;  %v7436_v42 = vor.u32 %v8584_v32, %v7435_v19  ;;  %v8633_v44 = vld [vmem:[#allocation8 + $0x744] sm:$0xf]  ;;  %v7388_v25 = vor.u32 %v8572_v17, %v7387_v16  ;;  %v7243_v28 = vld [vmem:[#allocation8 + $0x428] sm:$0xf]  ;;  %v6813_v16 = vld [vmem:[#allocation8 + $0xd8] sm:$0xf0] }
 0x22b   :  { %v7244_v45 = vor.u32 %v8536_v5, %v7243_v28  ;;  %v8458_v17 = vld [vmem:[#allocation8 + $0x1cc] sm:$0xf]  ;;  %v6797_v5 = vld [vmem:[#allocation8 + $0xb8] sm:$0xf0] }
 0x22c   :  { %4435 = vmatpush.bf16.msrb.mxu3 %v7704_v35  ;;  %v7371_v35 = vld [vmem:[#allocation8 + $0x528] sm:$0xf]  ;;  %v8422_v28 = vld [vmem:[#allocation8 + $0xac] sm:$0xf] }
 0x22d   :  { %4453 = vmatpush.bf16.msra.mxu0 %v6732_v54  ;;  %v2951_v54 = vperm.slane %v9371_v29, 0 }
 0x22e   :  { %4466 = vmatpush.bf16.msra.mxu1 %v6860_v61  ;;  %4475 = vmatpush.bf16.msra.mxu2 %v7052_v50  ;;  %v7669_v61 = vld [vmem:[#allocation8 + $0x790] sm:$0xf0] }
 0x22f   :  { %v7672_v8 = vor.u32 %v8641_v26, %v7669_v61  ;;  %v7595_v26 = vld [vmem:[#allocation8 + $0x6e8] sm:$0xf]  ;;  %v8624_v61 = vld [vmem:[#allocation8 + $0x6f4] sm:$0xf0] }
 0x230   :  { %4436 = vmatpush.bf16.msrb.mxu3 %v7688_v38  ;;  %v7372_v38 = vor.u32 %v8568_v37, %v7371_v35  ;;  %v7179_v37 = vld [vmem:[#allocation8 + $0x3a8] sm:$0xf] }
 0x231   :  { %4454 = vmatpush.bf16.msra.mxu0 %v6716_v7  ;;  %v4248_v59 = vpop.f32.mrf.mxu0 }
 0x232   :  { %4467 = vmatpush.bf16.msra.mxu1 %v6844_v10  ;;  %v4249_v6 = vadd.f32 %v4248_v59, %v2951_v54  ;;  %4476 = vmatpush.bf16.msra.mxu2 %v7036_v55  ;;  %v7276_v10 = vor.u32 %v8544_v1, %v7275_v31  ;;  %v8532_v54 = vld [vmem:[#allocation8 + $0x414] sm:$0xf0]  ;;  %v7355_v55 = vld [vmem:[#allocation8 + $0x508] sm:$0xf]  ;;  %v8462_v31 = vld [vmem:[#allocation8 + $0x1ec] sm:$0xf]  ;;  %v6972_v59 = vor.u32 %v8468_v47, %v6971_v46 }
 0x233   :  { %v6957_v1 = vld [vmem:[#allocation8 + $0x1f8] sm:$0xf0]  ;;  %v7228_v3 = vor.u32 %v8532_v54, %v7227_v56  ;;  %v8450_v47 = vld [vmem:[#allocation8 + $0x18c] sm:$0xf] }
 0x234   :  { %4455 = vmatmul.bf16.vlgmr.msra.gmra.mxu0 %v9316_v48  ;;  %v4261_v7 = vpop.f32.mrf.mxu1  ;;  %4437 = vmatpush.bf16.msrb.mxu3 %v7672_v8  ;;  %v6781_v46 = vld [vmem:[#allocation8 + $0x98] sm:$0xf0] }
 0x235   :  { %4499 = vmatpush.bf16.msrb.mxu0 %v7340_v0  ;;  %4468 = vmatmul.bf16.vlgmr.msra.gmra.mxu1 %v9318_v51  ;;  %v8637_v0 = vld [vmem:[#allocation8 + $0x764] sm:$0xf]  ;;  %v4262_v12 = vadd.f32 %v4261_v7, %v4249_v6  ;;  %v7605_v6 = vld [vmem:[#allocation8 + $0x710] sm:$0xf0]  ;;  %v6909_v56 = vld [vmem:[#allocation8 + $0x198] sm:$0xf0] }
 0x236   :  { %4512 = vmatpush.bf16.msrb.mxu1 %v7468_v13  ;;  %v8476_v13 = vld [vmem:[#allocation8 + $0x254] sm:$0xf0]  ;;  %v7656_v49 = vor.u32 %v8637_v0, %v7653_v11  ;;  %4477 = vmatpush.bf16.msra.mxu2 %v7020_v9  ;;  %v7596_v9 = vor.u32 %v8624_v61, %v7595_v26  ;;  %v7608_v22 = vor.u32 %v8625_v52, %v7605_v6 }
 0x237   :  { %v7004_v18 = vor.u32 %v8476_v13, %v7003_v33  ;;  %4390 = vmatmul.bf16.vlgmr.msra.gmra.mxu3 %v9322_v27  ;;  %v8528_v0 = vld [vmem:[#allocation8 + $0x3f4] sm:$0xf0]  ;;  %v6832_v33 = vor.u32 %v8430_v21, %v6829_v63  ;;  %v6912_v61 = vor.u32 %v8450_v47, %v6909_v56  ;;  %v7531_v21 = vld [vmem:[#allocation8 + $0x668] sm:$0xf]  ;;  %v8414_v63 = vld [vmem:[#allocation8 + $0x6c] sm:$0xf] }
 0x238   :  { %4438 = vmatpush.bf16.msrb.mxu3 %v7656_v49  ;;  %v8620_v13 = vld [vmem:[#allocation8 + $0x6d4] sm:$0xf0]  ;;  %v6941_v49 = vld [vmem:[#allocation8 + $0x1d8] sm:$0xf0]  ;;  %v8558_v56 = vld [vmem:[#allocation8 + $0x4ec] sm:$0xf] }
 0x239   :  { %4500 = vmatpush.bf16.msrb.mxu0 %v7324_v24  ;;  %v7637_v24 = vld [vmem:[#allocation8 + $0x750] sm:$0xf0]  ;;  %v4274_v2 = vpop.f32.mrf.mxu2  ;;  %v4250_v32 = vpop.f32.mrf.mxu0 }
 0x23a   :  { %4513 = vmatpush.bf16.msrb.mxu1 %v7452_v34  ;;  %v8472_v34 = vld [vmem:[#allocation8 + $0x234] sm:$0xf0]  ;;  %v4275_v30 = vadd.f32 %v4274_v2, %v4262_v12  ;;  %4478 = vmatpush.bf16.msra.mxu2 %v7004_v18  ;;  %v6960_v12 = vor.u32 %v8462_v31, %v6957_v1  ;;  %v6944_v2 = vor.u32 %v8458_v17, %v6941_v49  ;;  %v6765_v31 = vld [vmem:[#allocation8 + $0x78] sm:$0xf0]  ;;  %v8446_v1 = vld [vmem:[#allocation8 + $0x16c] sm:$0xf] }
 0x23b   :  { %v4287_v19 = vpop.f32.mrf.mxu3  ;;  %v6988_v43 = vor.u32 %v8472_v34, %v6987_v4  ;;  %v6816_v4 = vor.u32 %v8426_v14, %v6813_v16  ;;  %v8616_v34 = vld [vmem:[#allocation8 + $0x6b4] sm:$0xf0]  ;;  %v6877_v14 = vld [vmem:[#allocation8 + $0x158] sm:$0xf0] }
 0x23c   :  { %v4263_v50 = vpop.f32.mrf.mxu1  ;;  %v8508_v17 = vld [vmem:[#allocation8 + $0x354] sm:$0xf0] }
 0x23d   :  { %4501 = vmatpush.bf16.msrb.mxu0 %v7308_v39  ;;  %v7640_v39 = vor.u32 %v8633_v44, %v7637_v24  ;;  %v7195_v44 = vld [vmem:[#allocation8 + $0x3c8] sm:$0xf]  ;;  %v8524_v24 = vld [vmem:[#allocation8 + $0x3d4] sm:$0xf0] }
 0x23e   :  { %4514 = vmatpush.bf16.msrb.mxu1 %v7436_v42  ;;  %v9375_v42 = vadd.f32 %v4287_v19, %v4275_v30  ;;  %4479 = vmatpush.bf16.msra.mxu2 %v6988_v43  ;;  %v8454_v30 = vld [vmem:[#allocation8 + $0x1ac] sm:$0xf]  ;;  %v6925_v19 = vld [vmem:[#allocation8 + $0x1b8] sm:$0xf0]  ;;  %v7196_v32 = vor.u32 %v8524_v24, %v7195_v44  ;;  %v8520_v50 = vld [vmem:[#allocation8 + $0x3b4] sm:$0xf0] }
 0x23f   :  { %4439 = vmatpush.bf16.msrb.mxu3 %v7640_v39  ;;  %v6800_v39 = vor.u32 %v8422_v28, %v6797_v5  ;;  %v8612_v43 = vld [vmem:[#allocation8 + $0x694] sm:$0xf0]  ;;  %v8406_v24 = vld [vmem:[#allocation8 + $0x2c] sm:$0xf]  ;;  %v7115_v5 = vld [vmem:[#allocation8 + $0x328] sm:$0xf] }
 0x240   :  { %v8600_v44 = vld [vmem:[#allocation8 + $0x634] sm:$0xf0] }
 0x241   :  { %4502 = vmatpush.bf16.msrb.mxu0 %v7292_v60  ;;  %v8564_v60 = vld [vmem:[#allocation8 + $0x514] sm:$0xf0]  ;;  %v4276_v7 = vpop.f32.mrf.mxu2 }
 0x242   :  { %4515 = vmatpush.bf16.msrb.mxu1 %v7420_v62  ;;  %v7624_v62 = vor.u32 %v8629_v40, %v7621_v41  ;;  %v7356_v8 = vor.u32 %v8564_v60, %v7355_v55  ;;  %4480 = vmatpush.bf16.msra.mxu2 %v6972_v59  ;;  %v6928_v40 = vor.u32 %v8454_v30, %v6925_v19  ;;  %v7547_v41 = vld [vmem:[#allocation8 + $0x688] sm:$0xf]  ;;  %v8516_v60 = vld [vmem:[#allocation8 + $0x394] sm:$0xf0]  ;;  %v6893_v59 = vld [vmem:[#allocation8 + $0x178] sm:$0xf0] }
 0x243   :  { %v4289_v11 = vpop.f32.mrf.mxu3  ;;  %v7548_v54 = vor.u32 %v8612_v43, %v7547_v41  ;;  %v7163_v55 = vld [vmem:[#allocation8 + $0x388] sm:$0xf]  ;;  %v8504_v19 = vld [vmem:[#allocation8 + $0x334] sm:$0xf0]  ;;  %v8434_v41 = vld [vmem:[#allocation8 + $0x10c] sm:$0xf] }
 0x244   :  { %4440 = vmatpush.bf16.msrb.mxu3 %v7624_v62  ;;  %v8608_v62 = vld [vmem:[#allocation8 + $0x674] sm:$0xf0]  ;;  %v7164_v52 = vor.u32 %v8516_v60, %v7163_v55  ;;  %v7515_v11 = vld [vmem:[#allocation8 + $0x648] sm:$0xf]  ;;  %v6845_v43 = vld [vmem:[#allocation8 + $0x118] sm:$0xf0]  ;;  %v7116_v47 = vor.u32 %v8504_v19, %v7115_v5 }
 0x245   :  { %4503 = vmatpush.bf16.msrb.mxu0 %v7276_v10  ;;  %v7211_v10 = vld [vmem:[#allocation8 + $0x3e8] sm:$0xf]  ;;  %4481 = vmatmul.bf16.vlgmr.msra.gmra.mxu2 %v9320_v53  ;;  %v7532_v7 = vor.u32 %v8608_v62, %v7531_v21  ;;  %v7469_v60 = vld [vmem:[#allocation8 + $0x5f8] sm:$0xf0]  ;;  %v6848_v62 = vor.u32 %v8434_v41, %v6845_v43  ;;  %v8546_v19 = vld [vmem:[#allocation8 + $0x48c] sm:$0xf] }
 0x246   :  { %4516 = vmatpush.bf16.msrb.mxu1 %v7404_v58  ;;  %v7579_v58 = vld [vmem:[#allocation8 + $0x6c8] sm:$0xf]  ;;  %v7212_v18 = vor.u32 %v8528_v0, %v7211_v10  ;;  %4525 = vmatpush.bf16.msrb.mxu2 %v7596_v9  ;;  %v8512_v9 = vld [vmem:[#allocation8 + $0x374] sm:$0xf0]  ;;  %v6768_v10 = vor.u32 %v8414_v63, %v6765_v31  ;;  %v6896_v0 = vor.u32 %v8446_v1, %v6893_v59 }
 0x247   :  { %v7723_v63 = vld [vmem:[#allocation8 + $0x7e8] sm:$0xf]  ;;  %v8656_v31 = vld [vmem:[#allocation8 + $0x7f4] sm:$0xf0] }
 0x248   :  { %4441 = vmatpush.bf16.msrb.mxu3 %v7608_v22 }
 0x249   :  { %4504 = vmatpush.bf16.msrb.mxu0 %v7260_v23  ;;  %v7580_v23 = vor.u32 %v8620_v13, %v7579_v58  ;;  %v6749_v58 = vld [vmem:[#allocation8 + $0x58] sm:$0xf0]  ;;  %v8442_v13 = vld [vmem:[#allocation8 + $0x14c] sm:$0xf] }
 0x24a   :  { %4517 = vmatpush.bf16.msrb.mxu1 %v7388_v25  ;;  %v7563_v25 = vld [vmem:[#allocation8 + $0x6a8] sm:$0xf] }
 0x24b   :  { %4526 = vmatpush.bf16.msrb.mxu2 %v7580_v23  ;;  %v7564_v35 = vor.u32 %v8616_v34, %v7563_v25  ;;  %4442 = vmatmul.bf16.vlgmr.msrb.gmra.mxu3 %v9365_v20  ;;  %v7499_v23 = vld [vmem:[#allocation8 + $0x628] sm:$0xf]  ;;  %v6861_v25 = vld [vmem:[#allocation8 + $0x138] sm:$0xf0] }
 0x24c   :  { %4486 = vmatpush.bf16.msra.mxu3 %v7212_v18  ;;  %v6880_v18 = vor.u32 %v8442_v13, %v6877_v14  ;;  %v7500_v30 = vor.u32 %v8600_v44, %v7499_v23  ;;  %v7309_v44 = vld [vmem:[#allocation8 + $0x4b8] sm:$0xf0] }
 0x24d   :  { %4505 = vmatpush.bf16.msrb.mxu0 %v7244_v45  ;;  %v8418_v45 = vld [vmem:[#allocation8 + $0x8c] sm:$0xf] }
 0x24e   :  { %4518 = vmatpush.bf16.msrb.mxu1 %v7372_v38  ;;  %v7180_v38 = vor.u32 %v8520_v50, %v7179_v37  ;;  %v6784_v26 = vor.u32 %v8418_v45, %v6781_v46  ;;  %v8494_v45 = vld [vmem:[#allocation8 + $0x2ec] sm:$0xf]  ;;  %v7085_v46 = vld [vmem:[#allocation8 + $0x2f8] sm:$0xf0] }
 0x24f   :  { %4527 = vmatpush.bf16.msrb.mxu2 %v7564_v35  ;;  %v8596_v35 = vld [vmem:[#allocation8 + $0x614] sm:$0xf0]  ;;  %v7088_v1 = vor.u32 %v8494_v45, %v7085_v46  ;;  %v8478_v45 = vld [vmem:[#allocation8 + $0x26c] sm:$0xf]  ;;  %v7021_v46 = vld [vmem:[#allocation8 + $0x278] sm:$0xf0] }
 0x250   :  { %4487 = vmatpush.bf16.msra.mxu3 %v7196_v32  ;;  %v7483_v32 = vld [vmem:[#allocation8 + $0x608] sm:$0xf] }
 0x251   :  { %4506 = vmatpush.bf16.msrb.mxu0 %v7228_v3  ;;  %v4300_v3 = vpop.f32.mrf.mxu0  ;;  %v7484_v55 = vor.u32 %v8596_v35, %v7483_v32  ;;  %v7293_v35 = vld [vmem:[#allocation8 + $0x498] sm:$0xf0] }
 0x252   :  { %4519 = vmatpush.bf16.msrb.mxu1 %v7356_v8  ;;  %v9382_v6 = vadd.f32 %v4300_v3, %v9375_v42  ;;  %v7147_v8 = vld [vmem:[#allocation8 + $0x368] sm:$0xf] }
 0x253   :  { %4528 = vmatpush.bf16.msrb.mxu2 %v7548_v54  ;;  %v7148_v22 = vor.u32 %v8512_v9, %v7147_v8  ;;  %v7131_v42 = vld [vmem:[#allocation8 + $0x348] sm:$0xf]  ;;  %v8590_v54 = vld [vmem:[#allocation8 + $0x5ec] sm:$0xf]  ;;  %v7069_v8 = vld [vmem:[#allocation8 + $0x2d8] sm:$0xf0] }
 0x254   :  { %4507 = vmatmul.bf16.vlgmr.msrb.gmra.mxu0 %v9339_v15  ;;  %4488 = vmatpush.bf16.msra.mxu3 %v7180_v38  ;;  %v7132_v28 = vor.u32 %v8508_v17, %v7131_v42  ;;  %v7341_v38 = vld [vmem:[#allocation8 + $0x4f8] sm:$0xf0]  ;;  %v7472_v3 = vor.u32 %v8590_v54, %v7469_v60  ;;  %v8554_v9 = vld [vmem:[#allocation8 + $0x4cc] sm:$0xf] }
 0x255   :  { %4551 = vmatpush.bf16.msra.mxu0 %v6832_v33  ;;  %4520 = vmatmul.bf16.vlgmr.msrb.gmra.mxu1 %v9348_v36  ;;  %v8604_v33 = vld [vmem:[#allocation8 + $0x654] sm:$0xf0]  ;;  %v7344_v59 = vor.u32 %v8558_v56, %v7341_v38  ;;  %v8486_v42 = vld [vmem:[#allocation8 + $0x2ac] sm:$0xf]  ;;  %v7053_v17 = vld [vmem:[#allocation8 + $0x2b8] sm:$0xf0] }
 0x256   :  { %4564 = vmatpush.bf16.msra.mxu1 %v6960_v12  ;;  %v8410_v12 = vld [vmem:[#allocation8 + $0x4c] sm:$0xf]  ;;  %v7516_v16 = vor.u32 %v8604_v33, %v7515_v11  ;;  %v7453_v33 = vld [vmem:[#allocation8 + $0x5d8] sm:$0xf0] }
 0x257   :  { %4529 = vmatpush.bf16.msrb.mxu2 %v7532_v7  ;;  %v6752_v49 = vor.u32 %v8410_v12, %v6749_v58  ;;  %v8490_v7 = vld [vmem:[#allocation8 + $0x2cc] sm:$0xf]  ;;  %v7707_v12 = vld [vmem:[#allocation8 + $0x7c8] sm:$0xf]  ;;  %v8652_v58 = vld [vmem:[#allocation8 + $0x7d4] sm:$0xf0] }
 0x258   :  { %4489 = vmatpush.bf16.msra.mxu3 %v7164_v52  ;;  %v8586_v11 = vld [vmem:[#allocation8 + $0x5cc] sm:$0xf]  ;;  %v7072_v13 = vor.u32 %v8490_v7, %v7069_v8  ;;  %v7708_v23 = vor.u32 %v8652_v58, %v7707_v12  ;;  %v7277_v54 = vld [vmem:[#allocation8 + $0x478] sm:$0xf0] }
 0x259   :  { %4552 = vmatpush.bf16.msra.mxu0 %v6816_v4  ;;  %v6733_v4 = vld [vmem:[#allocation8 + $0x38] sm:$0xf0]  ;;  %v4302_v34 = vpop.f32.mrf.mxu0  ;;  %v8570_v8 = vld [vmem:[#allocation8 + $0x54c] sm:$0xf] }
 0x25a   :  { %4565 = vmatpush.bf16.msra.mxu1 %v6944_v2  ;;  %v8438_v2 = vld [vmem:[#allocation8 + $0x12c] sm:$0xf]  ;;  %v6736_v37 = vor.u32 %v8406_v24, %v6733_v4  ;;  %v7437_v4 = vld [vmem:[#allocation8 + $0x5b8] sm:$0xf0]  ;;  %v7056_v34 = vor.u32 %v8486_v42, %v7053_v17 }
 0x25b   :  { %4530 = vmatpush.bf16.msrb.mxu2 %v7516_v16  ;;  %v6864_v50 = vor.u32 %v8438_v2, %v6861_v25  ;;  %v8582_v24 = vld [vmem:[#allocation8 + $0x5ac] sm:$0xf]  ;;  %v7691_v2 = vld [vmem:[#allocation8 + $0x7a8] sm:$0xf]  ;;  %v8648_v25 = vld [vmem:[#allocation8 + $0x7b4] sm:$0xf0] }
 0x25c   :  { %4490 = vmatpush.bf16.msra.mxu3 %v7148_v22  ;;  %v7456_v22 = vor.u32 %v8586_v11, %v7453_v33  ;;  %v7440_v5 = vor.u32 %v8582_v24, %v7437_v4  ;;  %v7692_v32 = vor.u32 %v8648_v25, %v7691_v2  ;;  %v7405_v60 = vld [vmem:[#allocation8 + $0x578] sm:$0xf0]  ;;  %v8470_v58 = vld [vmem:[#allocation8 + $0x22c] sm:$0xf]  ;;  %v7627_v24 = vld [vmem:[#allocation8 + $0x728] sm:$0xf] }
 0x25d   :  { %4553 = vmatpush.bf16.msra.mxu0 %v6800_v39  ;;  %v8402_v39 = vld [vmem:[#allocation8 + $0xc] sm:$0xf]  ;;  %v7261_v7 = vld [vmem:[#allocation8 + $0x458] sm:$0xf0]  ;;  %v8632_v4 = vld [vmem:[#allocation8 + $0x734] sm:$0xf0] }
 0x25e   :  { %4566 = vmatpush.bf16.msra.mxu1 %v6928_v40  ;;  %v6717_v40 = vld [vmem:[#allocation8 + $0x18] sm:$0xf0]  ;;  %v4313_v16 = vpop.f32.mrf.mxu1  ;;  %v8466_v25 = vld [vmem:[#allocation8 + $0x20c] sm:$0xf] }
 0x25f   :  { %4531 = vmatpush.bf16.msrb.mxu2 %v7500_v30  ;;  %v6720_v21 = vor.u32 %v8402_v39, %v6717_v40  ;;  %v7037_v30 = vld [vmem:[#allocation8 + $0x298] sm:$0xf0]  ;;  %v7296_v40 = vor.u32 %v8546_v19, %v7293_v35  ;;  %v7628_v19 = vor.u32 %v8632_v4, %v7627_v24 }
 0x260   :  { %4491 = vmatpush.bf16.msra.mxu3 %v7132_v28  ;;  %v7245_v17 = vld [vmem:[#allocation8 + $0x438] sm:$0xf0] }
 0x261   :  { %4554 = vmatpush.bf16.msra.mxu0 %v6784_v26  ;;  %v7099_v26 = vld [vmem:[#allocation8 + $0x308] sm:$0xf]  ;;  %v7357_v35 = vld [vmem:[#allocation8 + $0x518] sm:$0xf0] }
 0x262   :  { %4567 = vmatpush.bf16.msra.mxu1 %v6912_v61  ;;  %v8500_v61 = vld [vmem:[#allocation8 + $0x314] sm:$0xf0]  ;;  %v7149_v24 = vld [vmem:[#allocation8 + $0x378] sm:$0xf0] }
 0x263   :  { %v7100_v52 = vor.u32 %v8500_v61, %v7099_v26  ;;  %4532 = vmatpush.bf16.msrb.mxu2 %v7484_v55  ;;  %v8574_v55 = vld [vmem:[#allocation8 + $0x56c] sm:$0xf]  ;;  %v7659_v26 = vld [vmem:[#allocation8 + $0x768] sm:$0xf]  ;;  %v8640_v61 = vld [vmem:[#allocation8 + $0x774] sm:$0xf0] }
 0x264   :  { %4492 = vmatpush.bf16.msra.mxu3 %v7116_v47  ;;  %v8542_v47 = vld [vmem:[#allocation8 + $0x46c] sm:$0xf] }
 0x265   :  { %4555 = vmatpush.bf16.msra.mxu0 %v6768_v10  ;;  %v7724_v10 = vor.u32 %v8656_v31, %v7723_v63  ;;  %v7280_v63 = vor.u32 %v8542_v47, %v7277_v54  ;;  %v7408_v31 = vor.u32 %v8574_v55, %v7405_v60  ;;  %v8672_v54 = vld [vmem:[#allocation11 + $0x74] sm:$0xf0]  ;;  %v8618_v60 = vld [vmem:[#allocation8 + $0x6cc] sm:$0xf] }
 0x266   :  { %4568 = vmatpush.bf16.msra.mxu1 %v6896_v0  ;;  %v7325_v0 = vld [vmem:[#allocation8 + $0x4d8] sm:$0xf0]  ;;  %4533 = vmatmul.bf16.vlgmr.msrb.gmra.mxu2 %v9358_v57  ;;  %v4315_v43 = vpop.f32.mrf.mxu1 }
 0x267   :  { %4577 = vmatpush.bf16.msra.mxu2 %v7088_v1  ;;  %v7328_v14 = vor.u32 %v8554_v9, %v7325_v0  ;;  %v8474_v1 = vld [vmem:[#allocation8 + $0x24c] sm:$0xf]  ;;  %v7389_v9 = vld [vmem:[#allocation8 + $0x558] sm:$0xf0]  ;;  %v8636_v0 = vld [vmem:[#allocation8 + $0x754] sm:$0xf0] }
 0x268   :  { %4493 = vmatpush.bf16.msra.mxu3 %v7100_v52  ;;  %v7660_v52 = vor.u32 %v8640_v61, %v7659_v26  ;;  %v7392_v12 = vor.u32 %v8570_v8, %v7389_v9  ;;  %v7581_v26 = vld [vmem:[#allocation8 + $0x6d8] sm:$0xf0]  ;;  %v8522_v61 = vld [vmem:[#allocation8 + $0x3cc] sm:$0xf] }
 0x269   :  { %4556 = vmatpush.bf16.msra.mxu0 %v6752_v49  ;;  %v8550_v49 = vld [vmem:[#allocation8 + $0x4ac] sm:$0xf]  ;;  %v7181_v8 = vld [vmem:[#allocation8 + $0x3b8] sm:$0xf0] }
 0x26a   :  { %4569 = vmatpush.bf16.msra.mxu1 %v6880_v18  ;;  %v9386_v18 = vadd.f32 %v4313_v16, %v9382_v6  ;;  %v7312_v28 = vor.u32 %v8550_v49, %v7309_v44  ;;  %v8482_v6 = vld [vmem:[#allocation8 + $0x28c] sm:$0xf] }
 0x26b   :  { %4494 = vmatmul.bf16.vlgmr.msra.gmra.mxu3 %v9322_v27  ;;  %4578 = vmatpush.bf16.msra.mxu2 %v7072_v13  ;;  %v7040_v39 = vor.u32 %v8482_v6, %v7037_v30  ;;  %v6989_v13 = vld [vmem:[#allocation8 + $0x238] sm:$0xf0]  ;;  %v8566_v49 = vld [vmem:[#allocation8 + $0x52c] sm:$0xf] }
 0x26c   :  { %4538 = vmatpush.bf16.msrb.mxu3 %v7724_v10  ;;  %v7643_v10 = vld [vmem:[#allocation8 + $0x748] sm:$0xf]  ;;  %v6992_v2 = vor.u32 %v8470_v58, %v6989_v13  ;;  %v8530_v6 = vld [vmem:[#allocation8 + $0x40c] sm:$0xf]  ;;  %v7229_v30 = vld [vmem:[#allocation8 + $0x418] sm:$0xf0] }
 0x26d   :  { %4557 = vmatpush.bf16.msra.mxu0 %v6736_v37  ;;  %v8578_v37 = vld [vmem:[#allocation8 + $0x58c] sm:$0xf]  ;;  %v7644_v42 = vor.u32 %v8636_v0, %v7643_v10  ;;  %v7232_v43 = vor.u32 %v8530_v6, %v7229_v30  ;;  %v7771_v0 = vld [vmem:[#allocation11 + $0x50] sm:$0xf]  ;;  %v7165_v58 = vld [vmem:[#allocation8 + $0x398] sm:$0xf0] }
 0x26e   :  { %4570 = vmatpush.bf16.msra.mxu1 %v6864_v50  ;;  %v7675_v50 = vld [vmem:[#allocation8 + $0x788] sm:$0xf]  ;;  %v7763_v13 = vld [vmem:[#allocation11 + $0x40] sm:$0xf]  ;;  %v8664_v6 = vld [vmem:[#allocation11 + $0x34] sm:$0xf0] }
 0x26f   :  { %4579 = vmatpush.bf16.msra.mxu2 %v7056_v34 }
 0x270   :  { %4539 = vmatpush.bf16.msrb.mxu3 %v7708_v23  ;;  %v7373_v23 = vld [vmem:[#allocation8 + $0x538] sm:$0xf0] }
 0x271   :  { %4558 = vmatpush.bf16.msra.mxu0 %v6720_v21  ;;  %v4352_v56 = vpop.f32.mrf.mxu0  ;;  %v2952_v21 = vperm.slane %v9371_v29, 1 }
 0x272   :  { %4571 = vmatpush.bf16.msra.mxu1 %v6848_v62  ;;  %v7024_v62 = vor.u32 %v8478_v45, %v7021_v46  ;;  %v4365_v16 = vpop.f32.mrf.mxu1 }
 0x273   :  { %4580 = vmatpush.bf16.msra.mxu2 %v7040_v39  ;;  %v4353_v33 = vadd.f32 %v4352_v56, %v2952_v21  ;;  %v7197_v21 = vld [vmem:[#allocation8 + $0x3d8] sm:$0xf0] }
 0x274   :  { %4559 = vmatmul.bf16.vlgmr.msra.gmra.mxu0 %v9316_v48  ;;  %v7421_v48 = vld [vmem:[#allocation8 + $0x598] sm:$0xf0]  ;;  %4540 = vmatpush.bf16.msrb.mxu3 %v7692_v32  ;;  %v8562_v32 = vld [vmem:[#allocation8 + $0x50c] sm:$0xf] }
 0x275   :  { %4603 = vmatpush.bf16.msrb.mxu0 %v7344_v59  ;;  %4572 = vmatmul.bf16.vlgmr.msra.gmra.mxu1 %v9318_v51  ;;  %v8644_v51 = vld [vmem:[#allocation8 + $0x794] sm:$0xf0]  ;;  %v7424_v41 = vor.u32 %v8578_v37, %v7421_v48  ;;  %v7005_v59 = vld [vmem:[#allocation8 + $0x258] sm:$0xf0]  ;;  %v9392_v44 = vadd.f32 %v4365_v16, %v4353_v33  ;;  %v8622_v37 = vld [vmem:[#allocation8 + $0x6ec] sm:$0xf]  ;;  %v7360_v45 = vor.u32 %v8562_v32, %v7357_v35 }
 0x276   :  { %4616 = vmatpush.bf16.msrb.mxu1 %v7472_v3  ;;  %v7676_v38 = vor.u32 %v8644_v51, %v7675_v50  ;;  %v8538_v3 = vld [vmem:[#allocation8 + $0x44c] sm:$0xf]  ;;  %v7008_v11 = vor.u32 %v8474_v1, %v7005_v59  ;;  %v7597_v48 = vld [vmem:[#allocation8 + $0x6f8] sm:$0xf0]  ;;  %v7611_v50 = vld [vmem:[#allocation8 + $0x708] sm:$0xf]  ;;  %v7200_v59 = vor.u32 %v8522_v61, %v7197_v21 }
 0x277   :  { %4581 = vmatpush.bf16.msra.mxu2 %v7024_v62  ;;  %v7264_v29 = vor.u32 %v8538_v3, %v7261_v7  ;;  %v8628_v51 = vld [vmem:[#allocation8 + $0x714] sm:$0xf0]  ;;  %v7600_v47 = vor.u32 %v8622_v37, %v7597_v48  ;;  %v8670_v1 = vld [vmem:[#allocation11 + $0x64] sm:$0xf0]  ;;  %v7517_v35 = vld [vmem:[#allocation8 + $0x658] sm:$0xf0] }
 0x278   :  { %4541 = vmatpush.bf16.msrb.mxu3 %v7676_v38  ;;  %v7612_v56 = vor.u32 %v8628_v51, %v7611_v50  ;;  %v7787_v38 = vld [vmem:[#allocation11 + $0x70] sm:$0xf]  ;;  %v8614_v3 = vld [vmem:[#allocation8 + $0x6ac] sm:$0xf]  ;;  %v7133_v48 = vld [vmem:[#allocation8 + $0x358] sm:$0xf0] }
 0x279   :  { %4604 = vmatpush.bf16.msrb.mxu0 %v7328_v14  ;;  %v8534_v14 = vld [vmem:[#allocation8 + $0x42c] sm:$0xf]  ;;  %v7788_v62 = vor.u32 %v8672_v54, %v7787_v38  ;;  %v7843_v51 = vld [vmem:[#allocation11 + $0xe0] sm:$0xf]  ;;  %v7501_v38 = vld [vmem:[#allocation8 + $0x638] sm:$0xf0] }
 0x27a   :  { %4617 = vmatpush.bf16.msrb.mxu1 %v7456_v22  ;;  %v4354_v22 = vpop.f32.mrf.mxu0  ;;  %v7248_v34 = vor.u32 %v8534_v14, %v7245_v17  ;;  %v4367_v46 = vpop.f32.mrf.mxu1  ;;  %v8518_v7 = vld [vmem:[#allocation8 + $0x3ac] sm:$0xf]  ;;  %v7533_v17 = vld [vmem:[#allocation8 + $0x678] sm:$0xf0]  ;;  %v7835_v21 = vld [vmem:[#allocation11 + $0xd0] sm:$0xf] }
 0x27b   :  { %4582 = vmatpush.bf16.msra.mxu2 %v7008_v11  ;;  %v8668_v11 = vld [vmem:[#allocation11 + $0x54] sm:$0xf0]  ;;  %v8610_v33 = vld [vmem:[#allocation8 + $0x68c] sm:$0xf] }
 0x27c   :  { %4542 = vmatpush.bf16.msrb.mxu3 %v7660_v52  ;;  %v7565_v52 = vld [vmem:[#allocation8 + $0x6b8] sm:$0xf0]  ;;  %v8666_v14 = vld [vmem:[#allocation11 + $0x44] sm:$0xf0] }
 0x27d   :  { %4605 = vmatpush.bf16.msrb.mxu0 %v7312_v28  ;;  %v7376_v28 = vor.u32 %v8566_v49, %v7373_v23  ;;  %v7568_v10 = vor.u32 %v8614_v3, %v7565_v52  ;;  %v8510_v23 = vld [vmem:[#allocation8 + $0x36c] sm:$0xf] }
 0x27e   :  { %4618 = vmatpush.bf16.msrb.mxu1 %v7440_v5  ;;  %v6973_v5 = vld [vmem:[#allocation8 + $0x218] sm:$0xf0]  ;;  %v8602_v32 = vld [vmem:[#allocation8 + $0x64c] sm:$0xf] }
 0x27f   :  { %4583 = vmatpush.bf16.msra.mxu2 %v6992_v2  ;;  %v6976_v39 = vor.u32 %v8466_v25, %v6973_v5  ;;  %v7764_v2 = vor.u32 %v8666_v14, %v7763_v13  ;;  %v7851_v25 = vld [vmem:[#allocation11 + $0xf0] sm:$0xf]  ;;  %v8506_v37 = vld [vmem:[#allocation8 + $0x34c] sm:$0xf]  ;;  %v8671_v13 = vld [vmem:[#allocation11 + $0x74] sm:$0xf] }
 0x280   :  { %4543 = vmatpush.bf16.msrb.mxu3 %v7644_v42  ;;  %v8606_v42 = vld [vmem:[#allocation8 + $0x66c] sm:$0xf]  ;;  %v7755_v5 = vld [vmem:[#allocation11 + $0x30] sm:$0xf]  ;;  %v7789_v14 = vld [vmem:[#allocation11 + $0x78] sm:$0xf0] }
 0x281   :  { %4606 = vmatpush.bf16.msrb.mxu0 %v7296_v40  ;;  %v8526_v40 = vld [vmem:[#allocation8 + $0x3ec] sm:$0xf]  ;;  %v7756_v50 = vor.u32 %v8664_v6, %v7755_v5  ;;  %v8669_v5 = vld [vmem:[#allocation11 + $0x64] sm:$0xf]  ;;  %v7781_v6 = vld [vmem:[#allocation11 + $0x68] sm:$0xf0] }
 0x282   :  { %4619 = vmatpush.bf16.msrb.mxu1 %v7424_v41  ;;  %v7213_v41 = vld [vmem:[#allocation8 + $0x3f8] sm:$0xf0]  ;;  %v8594_v52 = vld [vmem:[#allocation8 + $0x60c] sm:$0xf] }
 0x283   :  { %v7216_v55 = vor.u32 %v8526_v40, %v7213_v41  ;;  %4584 = vmatpush.bf16.msra.mxu2 %v6976_v39  ;;  %v8686_v39 = vld [vmem:[#allocation11 + $0xe4] sm:$0xf0]  ;;  %v7520_v40 = vor.u32 %v8602_v32, %v7517_v35  ;;  %v7747_v41 = vld [vmem:[#allocation11 + $0x20] sm:$0xf]  ;;  %v7693_v32 = vld [vmem:[#allocation8 + $0x7b8] sm:$0xf0] }
 0x284   :  { %4544 = vmatpush.bf16.msrb.mxu3 %v7628_v19  ;;  %v7152_v19 = vor.u32 %v8510_v23, %v7149_v24  ;;  %v7709_v23 = vld [vmem:[#allocation8 + $0x7d8] sm:$0xf0]  ;;  %v7811_v35 = vld [vmem:[#allocation11 + $0xa0] sm:$0xf] }
 0x285   :  { %4607 = vmatpush.bf16.msrb.mxu0 %v7280_v63  ;;  %v7584_v63 = vor.u32 %v8618_v60, %v7581_v26  ;;  %v7117_v60 = vld [vmem:[#allocation8 + $0x338] sm:$0xf0] }
 0x286   :  { %4620 = vmatpush.bf16.msrb.mxu1 %v7408_v31  ;;  %v7779_v31 = vld [vmem:[#allocation11 + $0x60] sm:$0xf]  ;;  %4585 = vmatmul.bf16.vlgmr.msra.gmra.mxu2 %v9320_v53  ;;  %v7184_v53 = vor.u32 %v8518_v7, %v7181_v8  ;;  %v7485_v7 = vld [vmem:[#allocation8 + $0x618] sm:$0xf0]  ;;  %v8498_v8 = vld [vmem:[#allocation8 + $0x30c] sm:$0xf] }
 0x287   :  { %4629 = vmatpush.bf16.msrb.mxu2 %v7600_v47  ;;  %v7780_v9 = vor.u32 %v8670_v1, %v7779_v31  ;;  %v9402_v4 = vpop.f32.mrf.mxu2  ;;  %v7136_v47 = vor.u32 %v8506_v37, %v7133_v48  ;;  %v7739_v31 = vld [vmem:[#allocation11 + $0x10] sm:$0xf]  ;;  %v8660_v1 = vld [vmem:[#allocation11 + $0x14] sm:$0xf0]  ;;  %v8678_v37 = vld [vmem:[#allocation11 + $0xa4] sm:$0xf0]  ;;  %v7784_v48 = vor.u32 %v8669_v5, %v7781_v6 }
 0x288   :  { %4545 = vmatpush.bf16.msrb.mxu3 %v7612_v56  ;;  %v8598_v56 = vld [vmem:[#allocation8 + $0x62c] sm:$0xf]  ;;  %v7837_v5 = vld [vmem:[#allocation11 + $0xd8] sm:$0xf0] }
 0x289   :  { %4608 = vmatpush.bf16.msrb.mxu0 %v7264_v29  ;;  %v7549_v29 = vld [vmem:[#allocation8 + $0x698] sm:$0xf0] }
 0x28a   :  { %4621 = vmatpush.bf16.msrb.mxu1 %v7392_v12  ;;  %v8514_v12 = vld [vmem:[#allocation8 + $0x38c] sm:$0xf] }
 0x28b   :  { %4546 = vmatmul.bf16.vlgmr.msrb.gmra.mxu3 %v9365_v20  ;;  %4630 = vmatpush.bf16.msrb.mxu2 %v7584_v63  ;;  %v7168_v16 = vor.u32 %v8514_v12, %v7165_v58  ;;  %v7504_v63 = vor.u32 %v8598_v56, %v7501_v38  ;;  %v7731_v12 = vld [vmem:[#allocation11] sm:$0xf]  ;;  %v8658_v58 = vld [vmem:[#allocation11 + $0x4] sm:$0xf0]  ;;  %v8676_v56 = vld [vmem:[#allocation11 + $0x94] sm:$0xf0] }
 0x28c   :  { %4590 = vmatpush.bf16.msra.mxu3 %v7216_v55  ;;  %v8502_v55 = vld [vmem:[#allocation8 + $0x32c] sm:$0xf]  ;;  %v7732_v24 = vor.u32 %v8658_v58, %v7731_v12  ;;  %v7645_v12 = vld [vmem:[#allocation8 + $0x758] sm:$0xf0] }
 0x28d   :  { %4609 = vmatpush.bf16.msrb.mxu0 %v7248_v34  ;;  %v8688_v34 = vld [vmem:[#allocation11 + $0xf4] sm:$0xf0]  ;;  %v7120_v3 = vor.u32 %v8502_v55, %v7117_v60  ;;  %v7765_v55 = vld [vmem:[#allocation11 + $0x48] sm:$0xf0]  ;;  %v7795_v60 = vld [vmem:[#allocation11 + $0x80] sm:$0xf] }
 0x28e   :  { %4622 = vmatpush.bf16.msrb.mxu1 %v7376_v28  ;;  %v7536_v28 = vor.u32 %v8606_v42, %v7533_v17  ;;  %v7852_v30 = vor.u32 %v8688_v34, %v7851_v25  ;;  %v8650_v42 = vld [vmem:[#allocation8 + $0x7cc] sm:$0xf]  ;;  %v8680_v25 = vld [vmem:[#allocation11 + $0xb4] sm:$0xf0]  ;;  %v7792_v34 = vor.u32 %v8671_v13, %v7789_v14  ;;  %v7845_v13 = vld [vmem:[#allocation11 + $0xe8] sm:$0xf0] }
 0x28f   :  { %4631 = vmatpush.bf16.msrb.mxu2 %v7568_v10  ;;  %v4328_v26 = vpop.f32.mrf.mxu2  ;;  %v8654_v10 = vld [vmem:[#allocation8 + $0x7ec] sm:$0xf] }
 0x290   :  { %4591 = vmatpush.bf16.msra.mxu3 %v7200_v59  ;;  %v8674_v26 = vld [vmem:[#allocation11 + $0x84] sm:$0xf0] }
 0x291   :  { %4610 = vmatpush.bf16.msrb.mxu0 %v7232_v43  ;;  %v9398_v22 = vpop.f32.mrf.mxu0  ;;  %v8662_v43 = vld [vmem:[#allocation11 + $0x24] sm:$0xf0] }
 0x292   :  { %4623 = vmatpush.bf16.msrb.mxu1 %v7360_v45  ;;  %v9400_v49 = vpop.f32.mrf.mxu1  ;;  %v7844_v45 = vor.u32 %v8686_v39, %v7843_v51  ;;  %v7748_v61 = vor.u32 %v8662_v43, %v7747_v41  ;;  %v8667_v51 = vld [vmem:[#allocation11 + $0x54] sm:$0xf]  ;;  %v7773_v39 = vld [vmem:[#allocation11 + $0x58] sm:$0xf0] }
 0x293   :  { %v9408_v41 = vld [vmem:[#allocation10] sm:$0xf]  ;;  %v7776_v38 = vor.u32 %v8667_v51, %v7773_v39  ;;  %v8681_v51 = vld [vmem:[#allocation11 + $0xc4] sm:$0xf]  ;;  %v7829_v39 = vld [vmem:[#allocation11 + $0xc8] sm:$0xf0] }
 0x294   :  { %4611 = vmatmul.bf16.vlgmr.msrb.gmra.mxu0 %v9339_v15  ;;  %v7772_v15 = vor.u32 %v8668_v11, %v7771_v0  ;;  %4592 = vmatpush.bf16.msra.mxu3 %v7184_v53  ;;  %v7725_v0 = vld [vmem:[#allocation8 + $0x7f8] sm:$0xf0]  ;;  %v7740_v11 = vor.u32 %v8660_v1, %v7739_v31  ;;  %v7827_v53 = vld [vmem:[#allocation11 + $0xc0] sm:$0xf]  ;;  %v2953_v43 = vperm.slane %v9408_v41, 2 }
 0x295   :  { %4624 = vmatmul.bf16.vlgmr.msrb.gmra.mxu1 %v9348_v36  ;;  %5053 = vmatpush.bf16.msra.mxu0 %v7788_v62  ;;  %v7552_v36 = vor.u32 %v8610_v33, %v7549_v29  ;;  %v8684_v62 = vld [vmem:[#allocation11 + $0xd4] sm:$0xf0]  ;;  %v8682_v33 = vld [vmem:[#allocation11 + $0xc4] sm:$0xf0]  ;;  %v7488_v29 = vor.u32 %v8594_v52, %v7485_v7  ;;  %v8687_v52 = vld [vmem:[#allocation11 + $0xf4] sm:$0xf] }
 0x296   :  { %5066 = vmatpush.bf16.msra.mxu1 %v7852_v30  ;;  %v7836_v59 = vor.u32 %v8684_v62, %v7835_v21  ;;  %v7712_v30 = vor.u32 %v8650_v42, %v7709_v23  ;;  %v7796_v62 = vor.u32 %v8674_v26, %v7795_v60  ;;  %v8638_v1 = vld [vmem:[#allocation8 + $0x76c] sm:$0xf]  ;;  %v7853_v7 = vld [vmem:[#allocation11 + $0xf8] sm:$0xf0]  ;;  %v7749_v42 = vld [vmem:[#allocation11 + $0x28] sm:$0xf0] }
 0x297   :  { %4632 = vmatpush.bf16.msrb.mxu2 %v7552_v36  ;;  %v9404_v17 = vpop.f32.mrf.mxu2  ;;  %v8677_v60 = vld [vmem:[#allocation11 + $0xa4] sm:$0xf]  ;;  %v7813_v26 = vld [vmem:[#allocation11 + $0xa8] sm:$0xf0] }
 0x298   :  { %4593 = vmatpush.bf16.msra.mxu3 %v7168_v16  ;;  %v7728_v16 = vor.u32 %v8654_v10, %v7725_v0  ;;  %v7757_v10 = vld [vmem:[#allocation11 + $0x38] sm:$0xf0]  ;;  %v7856_v0 = vor.u32 %v8687_v52, %v7853_v7 }
 0x299   :  { %5054 = vmatpush.bf16.msra.mxu0 %v7780_v9  ;;  %v4406_v46 = vpop.f32.mrf.mxu0  ;;  %v7101_v9 = vld [vmem:[#allocation8 + $0x318] sm:$0xf0] }
 0x29a   :  { %v4419_v54 = vpop.f32.mrf.mxu1  ;;  %5067 = vmatpush.bf16.msra.mxu1 %v7844_v45  ;;  %v7104_v36 = vor.u32 %v8498_v8, %v7101_v9  ;;  %v8642_v45 = vld [vmem:[#allocation8 + $0x78c] sm:$0xf]  ;;  %v7677_v46 = vld [vmem:[#allocation8 + $0x798] sm:$0xf0]  ;;  %v8663_v9 = vld [vmem:[#allocation11 + $0x34] sm:$0xf] }
 0x29b   :  { %4633 = vmatpush.bf16.msrb.mxu2 %v7536_v28  ;;  %v7680_v21 = vor.u32 %v8642_v45, %v7677_v46  ;;  %v7832_v45 = vor.u32 %v8681_v51, %v7829_v39  ;;  %v7859_v51 = vld [vmem:[#allocation11 + $0x100] sm:$0xf]  ;;  %v8690_v39 = vld [vmem:[#allocation11 + $0x104] sm:$0xf0] }
 0x29c   :  { %4594 = vmatpush.bf16.msra.mxu3 %v7152_v19  ;;  %v8646_v19 = vld [vmem:[#allocation8 + $0x7ac] sm:$0xf] }
 0x29d   :  { %5055 = vmatpush.bf16.msra.mxu0 %v7772_v15  ;;  %v7828_v15 = vor.u32 %v8682_v33, %v7827_v53  ;;  %v4327_v53 = vadd.f32 %v9402_v4, %v9386_v18  ;;  %v8630_v18 = vld [vmem:[#allocation8 + $0x72c] sm:$0xf]  ;;  %v7629_v4 = vld [vmem:[#allocation8 + $0x738] sm:$0xf0] }
 0x29e   :  { %5068 = vmatpush.bf16.msra.mxu1 %v7836_v59  ;;  %v7661_v59 = vld [vmem:[#allocation8 + $0x778] sm:$0xf0] }
 0x29f   :  { %4634 = vmatpush.bf16.msrb.mxu2 %v7520_v40  ;;  %v7696_v40 = vor.u32 %v8646_v19, %v7693_v32  ;;  %v8659_v19 = vld [vmem:[#allocation11 + $0x14] sm:$0xf]  ;;  %v7741_v32 = vld [vmem:[#allocation11 + $0x18] sm:$0xf0] }
 0x2a0   :  { %4595 = vmatpush.bf16.msra.mxu3 %v7136_v47  ;;  %v7803_v47 = vld [vmem:[#allocation11 + $0x90] sm:$0xf] }
 0x2a1   :  { %5056 = vmatpush.bf16.msra.mxu0 %v7764_v2  ;;  %v7819_v2 = vld [vmem:[#allocation11 + $0xb0] sm:$0xf]  ;;  %v7804_v54 = vor.u32 %v8676_v56, %v7803_v47  ;;  %v8657_v47 = vld [vmem:[#allocation11 + $0x4] sm:$0xf]  ;;  %v7733_v56 = vld [vmem:[#allocation11 + $0x8] sm:$0xf0] }
 0x2a2   :  { %5069 = vmatpush.bf16.msra.mxu1 %v7828_v15  ;;  %v7820_v28 = vor.u32 %v8680_v25, %v7819_v2  ;;  %v7760_v15 = vor.u32 %v8663_v9, %v7757_v10  ;;  %v7915_v9 = vld [vmem:[#allocation11 + $0x170] sm:$0xf]  ;;  %v8704_v10 = vld [vmem:[#allocation11 + $0x174] sm:$0xf0] }
 0x2a3   :  { %4635 = vmatpush.bf16.msrb.mxu2 %v7504_v63 }
 0x2a4   :  { %4596 = vmatpush.bf16.msra.mxu3 %v7120_v3 }
 0x2a5   :  { %5057 = vmatpush.bf16.msra.mxu0 %v7756_v50  ;;  %v7812_v50 = vor.u32 %v8678_v37, %v7811_v35  ;;  %v8626_v37 = vld [vmem:[#allocation8 + $0x70c] sm:$0xf] }
 0x2a6   :  { %5070 = vmatpush.bf16.msra.mxu1 %v7820_v28  ;;  %v8683_v28 = vld [vmem:[#allocation11 + $0xd4] sm:$0xf] }
 0x2a7   :  { %4636 = vmatpush.bf16.msrb.mxu2 %v7488_v29  ;;  %v8634_v29 = vld [vmem:[#allocation8 + $0x74c] sm:$0xf]  ;;  %v7840_v6 = vor.u32 %v8683_v28, %v7837_v5  ;;  %v7875_v5 = vld [vmem:[#allocation11 + $0x120] sm:$0xf] }
 0x2a8   :  { %4597 = vmatpush.bf16.msra.mxu3 %v7104_v36  ;;  %v8685_v36 = vld [vmem:[#allocation11 + $0xe4] sm:$0xf]  ;;  %v7648_v2 = vor.u32 %v8634_v29, %v7645_v12  ;;  %v8702_v12 = vld [vmem:[#allocation11 + $0x164] sm:$0xf0] }
 0x2a9   :  { %5058 = vmatpush.bf16.msra.mxu0 %v7748_v61  ;;  %v7848_v23 = vor.u32 %v8685_v36, %v7845_v13  ;;  %v7899_v13 = vld [vmem:[#allocation11 + $0x150] sm:$0xf] }
 0x2aa   :  { %4637 = vmatmul.bf16.vlgmr.msrb.gmra.mxu2 %v9358_v57  ;;  %5071 = vmatpush.bf16.msra.mxu1 %v7812_v50  ;;  %v4380_v57 = vpop.f32.mrf.mxu2  ;;  %v4339_v58 = vpop.f32.mrf.mxu3 }
 0x2ab   :  { %4598 = vmatmul.bf16.vlgmr.msra.gmra.mxu3 %v9322_v27  ;;  %v8665_v27 = vld [vmem:[#allocation11 + $0x44] sm:$0xf]  ;;  %v4340_v14 = vadd.f32 %v4339_v58, %v4327_v53  ;;  %v7797_v53 = vld [vmem:[#allocation11 + $0x88] sm:$0xf0] }
 0x2ac   :  { %4642 = vmatpush.bf16.msrb.mxu3 %v7728_v16  ;;  %v7768_v3 = vor.u32 %v8665_v27, %v7765_v55  ;;  %v8661_v16 = vld [vmem:[#allocation11 + $0x24] sm:$0xf]  ;;  %v7821_v27 = vld [vmem:[#allocation11 + $0xb8] sm:$0xf0] }
 0x2ad   :  { %5059 = vmatpush.bf16.msra.mxu0 %v7740_v11  ;;  %v7664_v11 = vor.u32 %v8638_v1, %v7661_v59  ;;  %8783 = vtanh.f32 %v4340_v14  ;;  %v7805_v1 = vld [vmem:[#allocation11 + $0x98] sm:$0xf0]  ;;  %v8700_v14 = vld [vmem:[#allocation11 + $0x154] sm:$0xf0] }
 0x2ae   :  { %5072 = vmatpush.bf16.msra.mxu1 %v7804_v54  ;;  %v7736_v54 = vor.u32 %v8657_v47, %v7733_v56 }
 0x2b0   :  { %4643 = vmatpush.bf16.msrb.mxu3 %v7712_v30  ;;  %v7632_v30 = vor.u32 %v8630_v18, %v7629_v4  ;;  %v7883_v4 = vld [vmem:[#allocation11 + $0x130] sm:$0xf] }
 0x2b1   :  { %5060 = vmatpush.bf16.msra.mxu0 %v7732_v24  ;;  %v4456_v61 = vpop.f32.mrf.mxu0 }
 0x2b2   :  { %v4457_v63 = vadd.f32 %v4456_v61, %v2953_v43  ;;  %v4469_v31 = vpop.f32.mrf.mxu1  ;;  %5073 = vmatpush.bf16.msra.mxu1 %v7796_v62  ;;  %v9415_v33 = vpop.f32.mrf.mxu2  ;;  %v7744_v43 = vor.u32 %v8659_v19, %v7741_v32  ;;  %v7816_v61 = vor.u32 %v8677_v60, %v7813_v26  ;;  %v4379_v62 = vadd.f32 %v9404_v17, %v9392_v44  ;;  %v7907_v17 = vld [vmem:[#allocation11 + $0x160] sm:$0xf]  ;;  %v8699_v26 = vld [vmem:[#allocation11 + $0x154] sm:$0xf] }
 0x2b3   :  { %v4341_v50 = vpop.f32.mrf.mxu3 }
 0x2b4   :  { %4644 = vmatpush.bf16.msrb.mxu3 %v7696_v40  ;;  %v9411_v8 = vadd.f32 %v4469_v31, %v4457_v63  ;;  %v8784_v40 = vpop.eup %8783  ;;  %v8675_v31 = vld [vmem:[#allocation11 + $0x94] sm:$0xf]  ;;  %v2954_v50 = vperm.slane %v9408_v41, 3 }
 0x2b5   :  { %5105 = vmatpush.bf16.msrb.mxu0 %v7792_v34  ;;  %v7752_v34 = vor.u32 %v8661_v16, %v7749_v42  ;;  %v4659_v57 = vpack.c.bf16 %v8784_v40, %v8784_v40  ;;  %v7808_v59 = vor.u32 %v8675_v31, %v7805_v1  ;;  %v8703_v40 = vld [vmem:[#allocation11 + $0x174] sm:$0xf]  ;;  %v8697_v31 = vld [vmem:[#allocation11 + $0x144] sm:$0xf]  ;;  %v7893_v1 = vld [vmem:[#allocation11 + $0x148] sm:$0xf0] }
 0x2b6   :  { %5118 = vmatpush.bf16.msrb.mxu1 %v7856_v0  ;;  %v8673_v0 = vld [vmem:[#allocation11 + $0x84] sm:$0xf] }
 0x2b7   :  { %5061 = vmatmul.bf16.vlgmr.msra.gmra.mxu0 %v4659_v57  ;;  %v7800_v29 = vor.u32 %v8673_v0, %v7797_v53  ;;  %v7877_v53 = vld [vmem:[#allocation11 + $0x128] sm:$0xf0] }
 0x2b8   :  { %4645 = vmatpush.bf16.msrb.mxu3 %v7680_v21 }
 0x2b9   :  { %5106 = vmatpush.bf16.msrb.mxu0 %v7784_v48  ;;  %v4458_v24 = vpop.f32.mrf.mxu0  ;;  %v7613_v48 = vld [vmem:[#allocation8 + $0x718] sm:$0xf0] }
 0x2ba   :  { %v4471_v25 = vpop.f32.mrf.mxu1  ;;  %5119 = vmatpush.bf16.msrb.mxu1 %v7848_v23  ;;  %v4432_v35 = vpop.f32.mrf.mxu2  ;;  %v7616_v46 = vor.u32 %v8626_v37, %v7613_v48  ;;  %v7900_v23 = vor.u32 %v8700_v14, %v7899_v13  ;;  %v8692_v37 = vld [vmem:[#allocation11 + $0x114] sm:$0xf0] }
 0x2bb   :  { %v4391_v21 = vpop.f32.mrf.mxu3  ;;  %v7867_v35 = vld [vmem:[#allocation11 + $0x110] sm:$0xf] }
 0x2bc   :  { %4646 = vmatpush.bf16.msrb.mxu3 %v7664_v11  ;;  %v4392_v63 = vadd.f32 %v4391_v21, %v4379_v62  ;;  %v7868_v48 = vor.u32 %v8692_v37, %v7867_v35  ;;  %v8714_v35 = vld [vmem:[#allocation11 + $0x1c4] sm:$0xf0] }
 0x2bd   :  { %5107 = vmatpush.bf16.msrb.mxu0 %v7776_v38  ;;  %v8679_v38 = vld [vmem:[#allocation11 + $0xb4] sm:$0xf] }
 0x2be   :  { %5120 = vmatpush.bf16.msrb.mxu1 %v7840_v6  ;;  %v7824_v55 = vor.u32 %v8679_v38, %v7821_v27  ;;  %v8694_v6 = vld [vmem:[#allocation11 + $0x124] sm:$0xf0]  ;;  %v8701_v27 = vld [vmem:[#allocation11 + $0x164] sm:$0xf] }
 0x2bf   :  { %v7876_v32 = vor.u32 %v8694_v6, %v7875_v5  ;;  %v7963_v5 = vld [vmem:[#allocation11 + $0x1d0] sm:$0xf]  ;;  %v8716_v6 = vld [vmem:[#allocation11 + $0x1d4] sm:$0xf0] }
 0x2c0   :  { %4647 = vmatpush.bf16.msrb.mxu3 %v7648_v2  ;;  %v7891_v2 = vld [vmem:[#allocation11 + $0x140] sm:$0xf] }
 0x2c1   :  { %5108 = vmatpush.bf16.msrb.mxu0 %v7768_v3  ;;  %v4405_v3 = vadd.f32 %v9398_v22, %v4392_v63  ;;  %v7908_v22 = vor.u32 %v8702_v12, %v7907_v17  ;;  %v8720_v17 = vld [vmem:[#allocation11 + $0x1f4] sm:$0xf0]  ;;  %v8691_v12 = vld [vmem:[#allocation11 + $0x114] sm:$0xf] }
 0x2c2   :  { %5121 = vmatpush.bf16.msrb.mxu1 %v7832_v45  ;;  %v7917_v45 = vld [vmem:[#allocation11 + $0x178] sm:$0xf0] }
 0x2c3   :  { %v4393_v7 = vpop.f32.mrf.mxu3  ;;  %v4418_v44 = vadd.f32 %v9400_v49, %v4405_v3  ;;  %v8698_v49 = vld [vmem:[#allocation11 + $0x144] sm:$0xf0] }
 0x2c4   :  { %4648 = vmatpush.bf16.msrb.mxu3 %v7632_v30  ;;  %v7892_v18 = vor.u32 %v8698_v49, %v7891_v2 }
 0x2c5   :  { %5109 = vmatpush.bf16.msrb.mxu0 %v7760_v15  ;;  %v4431_v36 = vadd.f32 %v9415_v33, %v4418_v44  ;;  %v7979_v44 = vld [vmem:[#allocation11 + $0x1f0] sm:$0xf] }
 0x2c6   :  { %5122 = vmatpush.bf16.msrb.mxu1 %v7824_v55 }
 0x2c8   :  { %4649 = vmatpush.bf16.msrb.mxu3 %v7616_v46  ;;  %v9426_v58 = vpop.f32.mrf.mxu2 }
 0x2c9   :  { %5110 = vmatpush.bf16.msrb.mxu0 %v7752_v34  ;;  %v8696_v34 = vld [vmem:[#allocation11 + $0x134] sm:$0xf0] }
 0x2ca   :  { %5123 = vmatpush.bf16.msrb.mxu1 %v7816_v61  ;;  %v7884_v28 = vor.u32 %v8696_v34, %v7883_v4  ;;  %v7901_v61 = vld [vmem:[#allocation11 + $0x158] sm:$0xf0]  ;;  %v8718_v4 = vld [vmem:[#allocation11 + $0x1e4] sm:$0xf0] }
 0x2cb   :  { %4650 = vmatmul.bf16.vlgmr.msrb.gmra.mxu3 %v9365_v20  ;;  %v7916_v20 = vor.u32 %v8704_v10, %v7915_v9  ;;  %v7904_v63 = vor.u32 %v8699_v26, %v7901_v61  ;;  %v8695_v9 = vld [vmem:[#allocation11 + $0x134] sm:$0xf]  ;;  %v7885_v10 = vld [vmem:[#allocation11 + $0x138] sm:$0xf0] }
 0x2cc   :  { %v7888_v0 = vor.u32 %v8695_v9, %v7885_v10  ;;  %v8713_v9 = vld [vmem:[#allocation11 + $0x1c4] sm:$0xf]  ;;  %v7957_v10 = vld [vmem:[#allocation11 + $0x1c8] sm:$0xf0] }
 0x2cd   :  { %5111 = vmatpush.bf16.msrb.mxu0 %v7744_v43  ;;  %5079 = vmatpush.bf16.msra.mxu2 %v7916_v20  ;;  %v7860_v43 = vor.u32 %v8690_v39, %v7859_v51  ;;  %v8693_v20 = vld [vmem:[#allocation11 + $0x124] sm:$0xf] }
 0x2ce   :  { %5124 = vmatpush.bf16.msrb.mxu1 %v7808_v59  ;;  %v4443_v42 = vpop.f32.mrf.mxu3  ;;  %v7896_v59 = vor.u32 %v8697_v31, %v7893_v1 }
 0x2cf   :  { %v4444_v24 = vadd.f32 %v4443_v42, %v4431_v36  ;;  %v4483_v36 = vadd.f32 %v9426_v58, %v9411_v8  ;;  %v7861_v42 = vld [vmem:[#allocation11 + $0x108] sm:$0xf0] }
 0x2d0   :  { %v4484_v25 = vpop.f32.mrf.mxu2 }
 0x2d1   :  { %5112 = vmatpush.bf16.msrb.mxu0 %v7736_v54  ;;  %v9421_v52 = vpop.f32.mrf.mxu0  ;;  %5080 = vmatpush.bf16.msra.mxu2 %v7908_v22  ;;  %8785 = vtanh.f32 %v4444_v24  ;;  %v7909_v54 = vld [vmem:[#allocation11 + $0x168] sm:$0xf0]  ;;  %v7869_v22 = vld [vmem:[#allocation11 + $0x118] sm:$0xf0] }
 0x2d2   :  { %v9423_v11 = vpop.f32.mrf.mxu1  ;;  %5125 = vmatpush.bf16.msrb.mxu1 %v7800_v29  ;;  %v7912_v55 = vor.u32 %v8701_v27, %v7909_v54  ;;  %v7880_v29 = vor.u32 %v8693_v20, %v7877_v53  ;;  %v7872_v13 = vor.u32 %v8691_v12, %v7869_v22  ;;  %v7923_v27 = vld [vmem:[#allocation11 + $0x180] sm:$0xf]  ;;  %v8709_v12 = vld [vmem:[#allocation11 + $0x1a4] sm:$0xf]  ;;  %v7941_v22 = vld [vmem:[#allocation11 + $0x1a8] sm:$0xf0] }
 0x2d4   :  { %5113 = vmatmul.bf16.vlgmr.msrb.gmra.mxu0 %v4659_v57  ;;  %v7920_v57 = vor.u32 %v8703_v40, %v7917_v45  ;;  %v7939_v40 = vld [vmem:[#allocation11 + $0x1a0] sm:$0xf] }
 0x2d5   :  { %5081 = vmatpush.bf16.msra.mxu2 %v7900_v23 }
 0x2d6   :  { %v4445_v30 = vpop.f32.mrf.mxu3 }
 0x2d7   :  { %v8786_v33 = vpop.eup %8785 }
 0x2d8   :  { %v4660_v19 = vpack.c.bf16 %v8786_v33, %v8786_v33 }
 0x2d9   :  { %v4510_v15 = vpop.f32.mrf.mxu0  ;;  %5082 = vmatpush.bf16.msra.mxu2 %v7892_v18  ;;  %v7971_v18 = vld [vmem:[#allocation11 + $0x1e0] sm:$0xf] }
 0x2da   :  { %v4523_v16 = vpop.f32.mrf.mxu1  ;;  %5074 = vmatmul.bf16.vlgmr.msra.gmra.mxu1 %v4660_v19  ;;  %v7980_v15 = vor.u32 %v8720_v17, %v7979_v44  ;;  %v7972_v8 = vor.u32 %v8718_v4, %v7971_v18  ;;  %v7949_v44 = vld [vmem:[#allocation11 + $0x1b8] sm:$0xf0]  ;;  %v7925_v18 = vld [vmem:[#allocation11 + $0x188] sm:$0xf0] }
 0x2db   :  { %v8689_v16 = vld [vmem:[#allocation11 + $0x104] sm:$0xf] }
 0x2dc   :  { %5092 = vmatpush.bf16.msra.mxu3 %v7980_v15  ;;  %v7864_v23 = vor.u32 %v8689_v16, %v7861_v42  ;;  %v7944_v15 = vor.u32 %v8709_v12, %v7941_v22 }
 0x2dd   :  { %5083 = vmatpush.bf16.msra.mxu2 %v7884_v28 }
 0x2e0   :  { %5093 = vmatpush.bf16.msra.mxu3 %v7972_v8 }
 0x2e1   :  { %5084 = vmatpush.bf16.msra.mxu2 %v7876_v32  ;;  %v7955_v32 = vld [vmem:[#allocation11 + $0x1c0] sm:$0xf] }
 0x2e2   :  { %v7956_v37 = vor.u32 %v8714_v35, %v7955_v32 }
 0x2e5   :  { %5085 = vmatpush.bf16.msra.mxu2 %v7868_v48  ;;  %v8712_v48 = vld [vmem:[#allocation11 + $0x1b4] sm:$0xf0] }
 0x2e9   :  { %5086 = vmatpush.bf16.msra.mxu2 %v7860_v43  ;;  %v4534_v60 = vpop.f32.mrf.mxu2  ;;  %v8710_v43 = vld [vmem:[#allocation11 + $0x1a4] sm:$0xf0] }
 0x2ea   :  { %5126 = vmatmul.bf16.vlgmr.msrb.gmra.mxu1 %v4660_v19  ;;  %v7964_v19 = vor.u32 %v8716_v6, %v7963_v5 }
 0x2ec   :  { %5094 = vmatpush.bf16.msra.mxu3 %v7964_v19  ;;  %v4727_v19 = vld [vmem:[#allocation13] sm:$0x3] }
 0x2ed   :  { %5131 = vmatpush.bf16.msrb.mxu2 %v7920_v57  ;;  %v4729_v32 = vperm.slane %v4727_v19, 0 }
 0x2ee   :  { %v4495_v41 = vpop.f32.mrf.mxu3 }
 0x2ef   :  { %v4496_v14 = vadd.f32 %v4495_v41, %v4483_v36  ;;  %v7981_v41 = vld [vmem:[#allocation11 + $0x1f8] sm:$0xf0]  ;;  %v8707_v36 = vld [vmem:[#allocation11 + $0x194] sm:$0xf] }
 0x2f0   :  { %5095 = vmatpush.bf16.msra.mxu3 %v7956_v37 }
 0x2f1   :  { %v4560_v46 = vpop.f32.mrf.mxu0  ;;  %5132 = vmatpush.bf16.msrb.mxu2 %v7912_v55  ;;  %v4536_v3 = vpop.f32.mrf.mxu2  ;;  %v4509_v24 = vadd.f32 %v9421_v52, %v4496_v14  ;;  %v8706_v55 = vld [vmem:[#allocation11 + $0x184] sm:$0xf0] }
 0x2f2   :  { %v4573_v47 = vpop.f32.mrf.mxu1  ;;  %v4561_v56 = vadd.f32 %v4560_v46, %v2954_v50  ;;  %v7940_v46 = vor.u32 %v8710_v43, %v7939_v40  ;;  %v7924_v26 = vor.u32 %v8706_v55, %v7923_v27  ;;  %v7965_v3 = vld [vmem:[#allocation11 + $0x1d8] sm:$0xf0] }
 0x2f3   :  { %v4522_v25 = vadd.f32 %v9423_v11, %v4509_v24  ;;  %v7947_v11 = vld [vmem:[#allocation11 + $0x1b0] sm:$0xf]  ;;  %v8728_v40 = vld [vmem:[#allocation14 + $0x38] sm:$0xff] }
 0x2f4   :  { %v9430_v38 = vadd.f32 %v4573_v47, %v4561_v56  ;;  %v7948_v51 = vor.u32 %v8712_v48, %v7947_v11  ;;  %v7931_v47 = vld [vmem:[#allocation11 + $0x190] sm:$0xf]  ;;  %v8708_v56 = vld [vmem:[#allocation11 + $0x194] sm:$0xf0]  ;;  %v4730_v48 = vperm.slane %v4727_v19, 1  ;;  %5293 = vmatpush.bf16.msra.mxu0 %v8728_v40 }
 0x2f5   :  { %5133 = vmatpush.bf16.msrb.mxu2 %v7904_v63  ;;  %v4535_v34 = vadd.f32 %v4534_v60, %v4522_v25  ;;  %v7932_v54 = vor.u32 %v8708_v56, %v7931_v47  ;;  %v8719_v60 = vld [vmem:[#allocation11 + $0x1f4] sm:$0xf]  ;;  %v8705_v25 = vld [vmem:[#allocation11 + $0x184] sm:$0xf]  ;;  %v8736_v43 = vld [vmem:[#allocation14 + $0x78] sm:$0xff] }
 0x2f6   :  { %v4497_v7 = vpop.f32.mrf.mxu3  ;;  %5096 = vmatpush.bf16.msra.mxu3 %v7948_v51  ;;  %v7984_v61 = vor.u32 %v8719_v60, %v7981_v41  ;;  %v7928_v4 = vor.u32 %v8705_v25, %v7925_v18  ;;  %5306 = vmatpush.bf16.msra.mxu1 %v8736_v43  ;;  %v8725_v47 = vld [vmem:[#allocation14 + $0x20] sm:$0xff]  ;;  %v8724_v56 = vld [vmem:[#allocation14 + $0x18] sm:$0xff]  ;;  %v8723_v60 = vld [vmem:[#allocation14 + $0x10] sm:$0xff] }
 0x2f7   :  { %v8735_v41 = vld [vmem:[#allocation14 + $0x70] sm:$0xff] }
 0x2f9   :  { %v4562_v21 = vpop.f32.mrf.mxu0  ;;  %5134 = vmatpush.bf16.msrb.mxu2 %v7896_v59  ;;  %v8715_v59 = vld [vmem:[#allocation11 + $0x1d4] sm:$0xf] }
 0x2fa   :  { %v4575_v62 = vpop.f32.mrf.mxu1  ;;  %5097 = vmatpush.bf16.msra.mxu3 %v7940_v46  ;;  %v8717_v21 = vld [vmem:[#allocation11 + $0x1e4] sm:$0xf]  ;;  %v7968_v7 = vor.u32 %v8715_v59, %v7965_v3  ;;  %5307 = vmatpush.bf16.msra.mxu1 %v8735_v41  ;;  %v8744_v3 = vld [vmem:[#allocation17 + $0x38] sm:$0xff] }
 0x2fb   :  { %v7973_v62 = vld [vmem:[#allocation11 + $0x1e8] sm:$0xf0]  ;;  %v8729_v59 = vld [vmem:[#allocation14 + $0x40] sm:$0xff] }
 0x2fc   :  { %v7976_v63 = vor.u32 %v8717_v21, %v7973_v62  ;;  %v8721_v21 = vld [vmem:[#allocation14] sm:$0xff] }
 0x2fd   :  { %5135 = vmatpush.bf16.msrb.mxu2 %v7888_v0  ;;  %v7960_v0 = vor.u32 %v8713_v9, %v7957_v10  ;;  %v8733_v62 = vld [vmem:[#allocation14 + $0x60] sm:$0xff] }
 0x2fe   :  { %5098 = vmatpush.bf16.msra.mxu3 %v7932_v54 }
 0x301   :  { %5136 = vmatpush.bf16.msrb.mxu2 %v7880_v29  ;;  %v8711_v29 = vld [vmem:[#allocation11 + $0x1b4] sm:$0xf] }
 0x302   :  { %5099 = vmatpush.bf16.msra.mxu3 %v7924_v26  ;;  %v7952_v17 = vor.u32 %v8711_v29, %v7949_v44  ;;  %v8722_v26 = vld [vmem:[#allocation14 + $0x8] sm:$0xff] }
 0x305   :  { %5137 = vmatpush.bf16.msrb.mxu2 %v7872_v13  ;;  %v7933_v13 = vld [vmem:[#allocation11 + $0x198] sm:$0xf0] }
 0x306   :  { %5144 = vmatpush.bf16.msrb.mxu3 %v7984_v61  ;;  %v7936_v16 = vor.u32 %v8707_v36, %v7933_v13  ;;  %v8734_v61 = vld [vmem:[#allocation14 + $0x68] sm:$0xff]  ;;  %v8743_v36 = vld [vmem:[#allocation17 + $0x30] sm:$0xff] }
 0x307   :  { %5308 = vmatpush.bf16.msra.mxu1 %v8734_v61  ;;  %v8742_v13 = vld [vmem:[#allocation17 + $0x28] sm:$0xff] }
 0x309   :  { %5138 = vmatpush.bf16.msrb.mxu2 %v7864_v23  ;;  %v9440_v58 = vpop.f32.mrf.mxu2 }
 0x30a   :  { %5145 = vmatpush.bf16.msrb.mxu3 %v7976_v63  ;;  %v4587_v14 = vadd.f32 %v9440_v58, %v9430_v38  ;;  %v8732_v63 = vld [vmem:[#allocation14 + $0x58] sm:$0xff] }
 0x30b   :  { %5309 = vmatpush.bf16.msra.mxu1 %v8733_v62 }
 0x30e   :  { %v4547_v28 = vpop.f32.mrf.mxu3  ;;  %5146 = vmatpush.bf16.msrb.mxu3 %v7968_v7 }
 0x30f   :  { %v4548_v30 = vadd.f32 %v4547_v28, %v4535_v34  ;;  %5310 = vmatpush.bf16.msra.mxu1 %v8732_v63 }
 0x311   :  { %v9435_v2 = vpop.f32.mrf.mxu0  ;;  %8787 = vtanh.f32 %v4548_v30  ;;  %v4588_v50 = vpop.f32.mrf.mxu2 }
 0x312   :  { %v9437_v49 = vpop.f32.mrf.mxu1  ;;  %5147 = vmatpush.bf16.msrb.mxu3 %v7960_v0 }
 0x316   :  { %v4549_v39 = vpop.f32.mrf.mxu3  ;;  %5148 = vmatpush.bf16.msrb.mxu3 %v7952_v17 }
 0x317   :  { %v8788_v45 = vpop.eup %8787 }
 0x318   :  { %v4661_v57 = vpack.c.bf16 %v8788_v45, %v8788_v45  ;;  %v8727_v45 = vld [vmem:[#allocation14 + $0x30] sm:$0xff] }
 0x319   :  { %v4614_v33 = vpop.f32.mrf.mxu0  ;;  %5294 = vmatpush.bf16.msra.mxu0 %v8727_v45 }
 0x31a   :  { %v4627_v52 = vpop.f32.mrf.mxu1  ;;  %5087 = vmatmul.bf16.vlgmr.msra.gmra.mxu2 %v4661_v57  ;;  %5149 = vmatpush.bf16.msrb.mxu3 %v7944_v15 }
 0x31b   :  { %5389 = vmatpush.bf16.msra.mxu2 %v8744_v3 }
 0x31e   :  { %5150 = vmatpush.bf16.msrb.mxu3 %v7936_v16  ;;  %v8740_v16 = vld [vmem:[#allocation17 + $0x18] sm:$0xff] }
 0x31f   :  { %5390 = vmatpush.bf16.msra.mxu2 %v8743_v36 }
 0x322   :  { %5151 = vmatpush.bf16.msrb.mxu3 %v7928_v4  ;;  %v8765_v4 = vld [vmem:[#allocation16] ss:$0 sm:$0xff] }
 0x323   :  { %5391 = vmatpush.bf16.msra.mxu2 %v8742_v13 }
 0x32a   :  { %5139 = vmatmul.bf16.vlgmr.msrb.gmra.mxu2 %v4661_v57  ;;  %v8726_v57 = vld [vmem:[#allocation14 + $0x28] sm:$0xff] }
 0x32b   :  { %5295 = vmatpush.bf16.msra.mxu0 %v8726_v57 }
 0x32d   :  { %v4638_v31 = vpop.f32.mrf.mxu2 }
 0x32e   :  { %v4599_v1 = vpop.f32.mrf.mxu3 }
 0x32f   :  { %v4600_v42 = vadd.f32 %v4599_v1, %v4587_v14  ;;  %5296 = vmatpush.bf16.msra.mxu0 %v8725_v47  ;;  %v8730_v1 = vld [vmem:[#allocation14 + $0x48] sm:$0xff] }
 0x330   :  { %v8741_v14 = vld [vmem:[#allocation17 + $0x20] sm:$0xff] }
 0x331   :  { %v4613_v24 = vadd.f32 %v9435_v2, %v4600_v42  ;;  %5392 = vmatpush.bf16.msra.mxu2 %v8741_v14  ;;  %v8739_v42 = vld [vmem:[#allocation17 + $0x10] sm:$0xff] }
 0x333   :  { %v4626_v8 = vadd.f32 %v9437_v49, %v4613_v24  ;;  %5297 = vmatpush.bf16.msra.mxu0 %v8724_v56  ;;  %v8737_v24 = vld [vmem:[#allocation17] sm:$0xff] }
 0x334   :  { %v5062_v23 = vpop.f32.mrf.mxu0 }
 0x335   :  { %v4640_v20 = vpop.f32.mrf.mxu2  ;;  %v4639_v28 = vadd.f32 %v4638_v31, %v4626_v8  ;;  %v5063_v2 = vadd.f32 %v5062_v23, %v4729_v32  ;;  %v8731_v31 = vld [vmem:[#allocation14 + $0x50] sm:$0xff]  ;;  %5393 = vmatpush.bf16.msra.mxu2 %v8740_v16 }
 0x336   :  { %v4601_v53 = vpop.f32.mrf.mxu3  ;;  %5311 = vmatpush.bf16.msra.mxu1 %v8731_v31  ;;  %v8738_v23 = vld [vmem:[#allocation17 + $0x8] sm:$0xff] }
 0x337   :  { %5298 = vmatpush.bf16.msra.mxu0 %v8723_v60 }
 0x339   :  { %5394 = vmatpush.bf16.msra.mxu2 %v8739_v42 }
 0x33a   :  { %5312 = vmatpush.bf16.msra.mxu1 %v8730_v1 }
 0x33b   :  { %5299 = vmatpush.bf16.msra.mxu0 %v8722_v26 }
 0x33c   :  { %v5064_v34 = vpop.f32.mrf.mxu0 }
 0x33d   :  { %5395 = vmatpush.bf16.msra.mxu2 %v8738_v23 }
 0x33e   :  { %5313 = vmatpush.bf16.msra.mxu1 %v8729_v59 }
 0x33f   :  { %5300 = vmatpush.bf16.msra.mxu0 %v8721_v21 }
 0x341   :  { %5396 = vmatpush.bf16.msra.mxu2 %v8737_v24 }
 0x34e   :  { %v4651_v5 = vpop.f32.mrf.mxu3 }
 0x34f   :  { %v4652_v6 = vadd.f32 %v4651_v5, %v4639_v28 }
 0x351   :  { %8789 = vtanh.f32 %v4652_v6  ;;  %v5114_v30 = vpop.f32.mrf.mxu0 }
 0x352   :  { %v5115_v49 = vadd.f32 %v5114_v30, %v4730_v48 }
 0x356   :  { %v4653_v38 = vpop.f32.mrf.mxu3 }
 0x357   :  { %v8790_v58 = vpop.eup %8789  ;;  %v5075_v35 = vpop.f32.mrf.mxu1  ;;  %v8766_v38 = vld [vmem:[#allocation19] ss:$0 sm:$0xff] }
 0x358   :  { %v4662_v33 = vpack.c.bf16 %v8790_v58, %v8790_v58  ;;  %v5076_v37 = vadd.f32 %v5075_v35, %v5063_v2 }
 0x359   :  { %v5116_v52 = vpop.f32.mrf.mxu0 }
 0x35a   :  { %5100 = vmatmul.bf16.vlgmr.msra.gmra.mxu3 %v4662_v33 }
 0x35f   :  { %v5077_v11 = vpop.f32.mrf.mxu1 }
 0x367   :  { %v5127_v50 = vpop.f32.mrf.mxu1 }
 0x368   :  { %v5128_v51 = vadd.f32 %v5127_v50, %v5115_v49 }
 0x36a   :  { %5152 = vmatmul.bf16.vlgmr.msrb.gmra.mxu3 %v4662_v33 }
 0x36f   :  { %v5129_v39 = vpop.f32.mrf.mxu1 }
 0x39d   :  { %v5088_v46 = vpop.f32.mrf.mxu2 }
 0x39e   :  { %v5089_v7 = vadd.f32 %v5088_v46, %v5076_v37 }
 0x3a5   :  { %v5090_v27 = vpop.f32.mrf.mxu2 }
 0x3ad   :  { %v5140_v54 = vpop.f32.mrf.mxu2 }
 0x3ae   :  { %v5141_v29 = vadd.f32 %v5140_v54, %v5128_v51 }
 0x3b5   :  { %v5142_v55 = vpop.f32.mrf.mxu2 }
 0x3dd   :  { %v5101_v9 = vpop.f32.mrf.mxu3 }
 0x3de   :  { %v5102_v10 = vadd.f32 %v5101_v9, %v5089_v7 }
 0x3e0   :  { %8791 = vtanh.f32 %v5102_v10 }
 0x3e5   :  { %v5103_v0 = vpop.f32.mrf.mxu3 }
 0x3e6   :  { %v8792_v20 = vpop.eup %8791 }
 0x3e7   :  { %v5159_v53 = vpack.c.bf16 %v8792_v20, %v8792_v20 }
 0x3e9   :  { %5301 = vmatmul.bf16.vlgmr.msra.gmra.mxu0 %v5159_v53 }
 0x3ed   :  { %v5153_v44 = vpop.f32.mrf.mxu3 }
 0x3ee   :  { %v5154_v17 = vadd.f32 %v5153_v44, %v5141_v29 }
 0x3f0   :  { %8793 = vtanh.f32 %v5154_v17 }
 0x3f5   :  { %v5155_v12 = vpop.f32.mrf.mxu3 }
 0x3f6   :  { %v8794_v22 = vpop.eup %8793 }
 0x3f7   :  { %v5160_v15 = vpack.c.bf16 %v8794_v22, %v8794_v22 }
 0x3f9   :  { %5314 = vmatmul.bf16.vlgmr.msra.gmra.mxu1 %v5160_v15 }
 0x466   :  { %v5302_v25 = vpop.f32.mrf.mxu0 }
 0x467   :  { %v5303_v8 = vadd.f32 %v8765_v4, %v5302_v25 }
 0x46e   :  { %v5304_v18 = vpop.f32.mrf.mxu0 }
 0x476   :  { %v5315_v34 = vpop.f32.mrf.mxu1 }
 0x477   :  { %v5316_v28 = vadd.f32 %v5315_v34, %v5303_v8 }
 0x479   :  { %8795 = vtanh.f32 %v5316_v28 }
 0x47e   :  { %v5317_v5 = vpop.f32.mrf.mxu1 }
 0x47f   :  { %v8796_v6 = vpop.eup %8795 }
 0x480   :  { %v5320_v30 = vpack.c.bf16 %v8796_v6, %v8796_v6 }
 0x482   :  { %5397 = vmatmul.bf16.vlgmr.msra.gmra.mxu2 %v5320_v30 }
 0x505   :  { %v5398_v58 = vpop.f32.mrf.mxu2 }
 0x506   :  { %v5399_v33 = vadd.f32 %v8766_v38, %v5398_v58 }
 0x508   :  { %5402 = vst [vmem:[#allocation20] sm:$0xff] %v5399_v33 }
 0x509   :  { %5413 = dma.vmem_to_hbm [thread:$0]  %s5409_s10, 128, %s5411_s1, [#allocation4]  }
 0x50d   :  { %v5400_v52 = vpop.f32.mrf.mxu2 }
 0x50e   :  { %9100 = dma.done.wait [#allocation4], 128  }
 0x50f   :  { %9101 = vsyncadd [#allocation4], 4294967168 }
 0x510   :  { %5418 = vsyncpa [#allocation3], 1 }
 0x511   :  { %5419 = vsyncpa [#allocation6], 1 }
 0x512   :  { %5420 = vsyncpa [#allocation9], 1 }
 0x513   :  { %5421 = vsyncpa [#allocation12], 1 }
 0x514   :  { %5422 = vsyncpa [#allocation15], 1 }
 0x515   :  { %5423 = vsyncpa [#allocation18], 1 }
 0x516   :  { %5424 = vsyncpa [#allocation4], 1 }

</bundles_post_ra>
